<compile_context>
chip_gen: v7x
topology: tpu7x:2x2x1
jax: 0.10.0
libtpu: 0.0.40
codegen_flags: <defaults>
</compile_context>

<pallas_src>
import functools

import numpy as np
import jax
import jax.numpy as jnp
from jax.experimental import pallas as pl
from jax.experimental.pallas import tpu as pltpu

F32 = jnp.float32
BF16 = jnp.bfloat16


def _elu(x):
    # nn.ELU(alpha=1.0); exp argument clamped so the untaken branch cannot overflow.
    return jnp.where(x > 0, x, jnp.exp(jnp.minimum(x, 0.0)) - 1.0)


# ----------------------------------------------------------------------------
# Fused MAC kernel: all reasoning steps (Control -> Read -> Write(rtom)) for one batch tile.
# Weights are VMEM-resident (DMA'd once, constant block index); state is carried as values.
# ----------------------------------------------------------------------------
def mac_fused_kernel(
    question_ref, context_ref, knowledge_ref, lengths_ref,
    w_ci_ref, b_ci_ref, w_u_ref, b_u_ref,
    w_cc_prev_ref, w_cc_q_ref, b_cc_ref,
    w_attn_c_ref, b_attn_c_ref,
    w_k_ref, b_k_ref, w_m_ref, b_m_ref,
    w_cat1_ref, w_cat2_ref, b_cat_ref,
    w_attn_r_ref, b_attn_r_ref,
    init_mem_ref,
    memory_out_ref,
    *, max_step,
):
    q = question_ref[...]                       # (Bt, D)    f32
    ctx_bf = context_ref[...]                   # (Bt, L, D) bf16
    know_bf = knowledge_ref[...]                # (Bt, K, D) bf16
    Bt, L, D = ctx_bf.shape
    K = know_bf.shape[1]

    # ---------------- step-invariant work (computed ONCE per batch tile) ----------------
    # Additive length mask in the (Bt, 1, L) layout of the control-attention logits.
    pos = jax.lax.broadcasted_iota(jnp.int32, (Bt, 1, L), 2)
    mask_add = jnp.where(pos < lengths_ref[...][:, :, None], 0.0, -1e30).astype(F32)

    # ControlUnit: q1 = tanh(Linear_ci(question))  (step-invariant)
    q1 = jnp.tanh(jnp.dot(q.astype(BF16), w_ci_ref[...],
                          preferred_element_type=F32) + b_ci_ref[...])
    q1_bf = q1.astype(BF16)

    # ReadUnit step-invariant projections as flat (Bt*K, D) @ (D, D) MXU matmuls
    # (weights loaded once, tall M = Bt*K; residents kept in bf16).
    know_flat = know_bf.reshape(Bt * K, D)
    kp = jnp.dot(know_flat, w_k_ref[...], preferred_element_type=F32) + b_k_ref[...]
    kp_bf = kp.astype(BF16)                                               # (Bt*K, D) bf16
    kc2_bf = (jnp.dot(kp_bf, w_cat2_ref[...], preferred_element_type=F32)
              + b_cat_ref[...]).astype(BF16)                              # (Bt*K, D) bf16
    kp_bf3 = kp_bf.reshape(Bt, K, D)

    # Hoist small weight loads / broadcasts out of the (unrolled) step loop.
    w_attn_c = w_attn_c_ref[...]                                          # (1, D) f32
    w_attn_r_bf3 = jnp.broadcast_to(w_attn_r_ref[...][:, None, :], (Bt, 1, D)).astype(BF16)
    b_attn_c = b_attn_c_ref[...]
    b_attn_r = b_attn_r_ref[...]
    w_cc_prev = w_cc_prev_ref[...]
    w_cc_q = w_cc_q_ref[...]
    b_cc = b_cc_ref[...]
    w_m = w_m_ref[...]
    b_m = b_m_ref[...]
    w_cat1 = w_cat1_ref[...]

    # zero_state: control = question, memory = expanded initial_memory.
    control = q                                                           # (Bt, D) f32
    control3 = control[:, None, :]                                        # (Bt, 1, D) f32
    memory = jnp.broadcast_to(init_mem_ref[...], (Bt, D))                 # (Bt, D) f32

    # ---------------- reasoning steps (static unroll; max_step is small & static) ----------------
    for step in range(max_step):
        # ----------------- ControlUnit -----------------
        q2 = jnp.dot(q1_bf, w_u_ref[step], preferred_element_type=F32) + b_u_ref[step]
        cc = jnp.tanh(
            jnp.dot(control.astype(BF16), w_cc_prev, preferred_element_type=F32)
            + jnp.dot(q2.astype(BF16), w_cc_q, preferred_element_type=F32)
            + b_cc)                                                        # (Bt, D)
        ccw_bf3 = ((cc * w_attn_c)[:, None, :]).astype(BF16)              # (Bt, 1, D)
        logits = (jnp.einsum("bqd,bkd->bqk", ccw_bf3, ctx_bf,
                             preferred_element_type=F32)
                  + b_attn_c + mask_add)                                   # (Bt, 1, L)
        logits = logits - jnp.max(logits, axis=-1, keepdims=True)
        p = jnp.exp(logits)
        attn_c = p * pl.reciprocal(jnp.sum(p, axis=-1, keepdims=True), approx=True)
        control3 = jnp.einsum("bqk,bkd->bqd", attn_c.astype(BF16), ctx_bf,
                              preferred_element_type=F32)                  # (Bt, 1, D) f32
        control = control3[:, 0, :]                                        # (Bt, D) f32

        # ----------------- ReadUnit (dropout = eval identity) -----------------
        mp = jnp.dot(memory.astype(BF16), w_m, preferred_element_type=F32) + b_m   # (Bt, D)
        kpm_bf = kp_bf3 * mp.astype(BF16)[:, None, :]                      # (Bt, K, D) bf16
        comb = (jnp.dot(kpm_bf.reshape(Bt * K, D), w_cat1, preferred_element_type=F32)
                + kc2_bf).reshape(Bt, K, D)                                # f32
        inter = _elu(_elu(comb) * control3)                                # f32 elementwise path
        scores = (jnp.einsum("bqd,bkd->bqk", w_attn_r_bf3, inter.astype(BF16),
                             preferred_element_type=F32) + b_attn_r)       # (Bt, 1, K)
        scores = scores - jnp.max(scores, axis=-1, keepdims=True)
        pr = jnp.exp(scores)
        attn_r = pr * pl.reciprocal(jnp.sum(pr, axis=-1, keepdims=True), approx=True)
        read3 = jnp.einsum("bqk,bkd->bqd", attn_r.astype(BF16), know_bf,
                           preferred_element_type=F32)                     # (Bt, 1, D)

        # ----------------- WriteUnit (rtom=True): new memory is the read vector -----------------
        memory = read3[:, 0, :]

    memory_out_ref[...] = memory


@functools.partial(jax.jit, static_argnames=("max_step", "batch_tile"))
def mac_unit_forward(params, context, question, knowledge, question_lengths,
                     max_step=4, batch_tile=None):
    B, L, D = context.shape
    K = knowledge.shape[1]
    Bt = B if batch_tile is None else batch_tile
    assert B % Bt == 0 and (Bt == B or Bt % 8 == 0), \
        "batch tile must divide B (and be a multiple of 8 when smaller than B)"
    lengths = question_lengths.astype(jnp.int32).reshape(B, 1)

    bf = lambda x: x.astype(BF16)
    # MXU operands pre-cast to bf16 in the wrapper: halves HBM->VMEM DMA and VMEM residency.
    args = (
        question, bf(context), bf(knowledge), lengths,
        bf(params["w_ci"]), params["b_ci"], bf(params["w_u"]), params["b_u"],
        bf(params["w_cc_prev"]), bf(params["w_cc_q"]), params["b_cc"],
        params["w_attn_c"], params["b_attn_c"],
        bf(params["w_k"]), params["b_k"], bf(params["w_m"]), params["b_m"],
        bf(params["w_cat1"]), bf(params["w_cat2"]), params["b_cat"],
        params["w_attn_r"], params["b_attn_r"],
        params["initial_memory"],
    )

    def batch_spec(shape):          # first dim tiled over the batch grid, trailing dims full
        nd = len(shape)
        return pl.BlockSpec(shape, lambda b, _n=nd: (b,) + (0,) * (_n - 1))

    def resident_spec(shape):       # whole array in VMEM; constant block index => DMA'd once
        nd = len(shape)
        return pl.BlockSpec(shape, lambda b, _n=nd: (0,) * _n)

    in_specs = [
        batch_spec((Bt, D)),        # question
        batch_spec((Bt, L, D)),     # context (bf16)
        batch_spec((Bt, K, D)),     # knowledge (bf16)
        batch_spec((Bt, 1)),        # question lengths
    ] + [resident_spec(a.shape) for a in args[4:]]

    kernel = functools.partial(mac_fused_kernel, max_step=max_step)
    return pl.pallas_call(
        kernel,
        out_shape=jax.ShapeDtypeStruct((B, D), jnp.float32),
        grid_spec=pltpu.PrefetchScalarGridSpec(
            num_scalar_prefetch=0,
            grid=(B // Bt,),
            in_specs=in_specs,
            out_specs=pl.BlockSpec((Bt, D), lambda b: (b, 0)),
        ),
        compiler_params=pltpu.CompilerParams(
            dimension_semantics=("parallel",),          # shard batch tiles across v7x's 2 TCs
            vmem_limit_bytes=48 * 1024 * 1024,          # explicit limit; < v7x's 64 MiB
        ),
    )(*args)


# ----------------------------------------------------------------------------
# Pure-JAX references.
#   mac_unit_reference_bf16: mirrors the kernel's bf16-MXU / f32-accumulate numerics (tight check).
#   mac_unit_reference_f32:  full-f32 math of the PyTorch module in eval mode (coarse parity check).
# ----------------------------------------------------------------------------
def _length_mask(L, question_lengths):
    idx = jnp.arange(L, dtype=jnp.int32)[None, :]
    return jnp.where(idx < question_lengths.astype(jnp.int32)[:, None], 0.0, -1e30).astype(F32)


def mac_unit_reference_bf16(p, context, question, knowledge, question_lengths, max_step=4):
    B, L, D = context.shape
    mask_add = _length_mask(L, question_lengths)
    bf = lambda x: x.astype(BF16)
    ctx_bf, know_bf = bf(context), bf(knowledge)
    q1 = jnp.tanh(jnp.dot(bf(question), bf(p["w_ci"]), preferred_element_type=F32) + p["b_ci"])
    q1_bf = bf(q1)
    kp = jnp.einsum("bkd,de->bke", know_bf, bf(p["w_k"]), preferred_element_type=F32) + p["b_k"]
    kp_bf = bf(kp)
    kc2_bf = bf(jnp.einsum("bkd,de->bke", kp_bf, bf(p["w_cat2"]),
                           preferred_element_type=F32) + p["b_cat"])
    w_attn_r_bf = jnp.broadcast_to(p["w_attn_r"], (B, D)).astype(BF16)
    control = question
    memory = jnp.broadcast_to(p["initial_memory"], (B, D))
    for step in range(max_step):
        q2 = jnp.dot(q1_bf, bf(p["w_u"][step]), preferred_element_type=F32) + p["b_u"][step]
        cc = jnp.tanh(jnp.dot(bf(control), bf(p["w_cc_prev"]), preferred_element_type=F32)
                      + jnp.dot(bf(q2), bf(p["w_cc_q"]), preferred_element_type=F32) + p["b_cc"])
        logits = (jnp.einsum("bd,bld->bl", bf(cc * p["w_attn_c"]), ctx_bf,
                             preferred_element_type=F32) + p["b_attn_c"] + mask_add)
        attn = jax.nn.softmax(logits, axis=1)
        control = jnp.einsum("bl,bld->bd", bf(attn), ctx_bf, preferred_element_type=F32)
        mp = jnp.dot(bf(memory), bf(p["w_m"]), preferred_element_type=F32) + p["b_m"]
        kpm_bf = kp_bf * bf(mp)[:, None, :]
        comb = jnp.einsum("bkd,de->bke", kpm_bf, bf(p["w_cat1"]),
                          preferred_element_type=F32) + kc2_bf
        inter = _elu(_elu(comb) * control[:, None, :])
        scores = (jnp.einsum("bkd,bd->bk", bf(inter), w_attn_r_bf,
                             preferred_element_type=F32) + p["b_attn_r"])
        attn_r = jax.nn.softmax(scores, axis=1)
        memory = jnp.einsum("bk,bkd->bd", bf(attn_r), know_bf, preferred_element_type=F32)
    return memory


def mac_unit_reference_f32(p, context, question, knowledge, question_lengths, max_step=4):
    B, L, D = context.shape
    mask_add = _length_mask(L, question_lengths)
    control = question
    memory = jnp.broadcast_to(p["initial_memory"], (B, D))
    q1 = jnp.tanh(question @ p["w_ci"] + p["b_ci"])
    for step in range(max_step):
        q2 = q1 @ p["w_u"][step] + p["b_u"][step]
        cc = jnp.tanh(control @ p["w_cc_prev"] + q2 @ p["w_cc_q"] + p["b_cc"])
        logits = jnp.sum(cc[:, None, :] * context * p["w_attn_c"], -1) + p["b_attn_c"] + mask_add
        attn = jax.nn.softmax(logits, axis=1)
        control = jnp.sum(attn[:, :, None] * context, axis=1)
        kp = knowledge @ p["w_k"] + p["b_k"]
        mp = memory @ p["w_m"] + p["b_m"]
        comb = (kp * mp[:, None, :]) @ p["w_cat1"] + kp @ p["w_cat2"] + p["b_cat"]
        inter = _elu(_elu(comb) * control[:, None, :])
        scores = jnp.sum(inter * p["w_attn_r"], -1) + p["b_attn_r"]
        a = jax.nn.softmax(scores, axis=1)
        memory = jnp.sum(a[:, :, None] * knowledge, axis=1)
    return memory


# ----------------------------------------------------------------------------
# Deterministic parameter init (shapes from the module's __init__; synthetic).
# Linear(in, out) stored as W [in, out] (x @ W + b), b as [1, out].
# ----------------------------------------------------------------------------
def init_params(key, D, max_step):
    ks = jax.random.split(key, 18)

    def lw(k, din, dout):
        return (jax.random.normal(k, (din, dout), jnp.float32) / jnp.sqrt(din)).astype(jnp.float32)

    def lb(k, dout):
        return (jax.random.normal(k, (1, dout), jnp.float32) * 0.01).astype(jnp.float32)

    p = {}
    # ControlUnit
    p["w_ci"] = lw(ks[0], D, D);            p["b_ci"] = lb(ks[1], D)          # control_input
    p["w_u"] = (jax.random.normal(ks[2], (max_step, D, D), jnp.float32) / jnp.sqrt(D)).astype(jnp.float32)
    p["b_u"] = (jax.random.normal(ks[3], (max_step, 1, D), jnp.float32) * 0.01).astype(jnp.float32)
    p["w_cc_prev"] = lw(ks[4], D, D)                                          # cont_control (split 2D -> D)
    p["w_cc_q"] = lw(ks[5], D, D);          p["b_cc"] = lb(ks[6], D)
    p["w_attn_c"] = lw(ks[7], D, 1).T.reshape(1, D)                           # attn Linear(D, 1)
    p["b_attn_c"] = jnp.zeros((1, 1), jnp.float32)
    # ReadUnit
    p["w_k"] = lw(ks[8], D, D);             p["b_k"] = lb(ks[9], D)           # kproj
    p["w_m"] = lw(ks[10], D, D);            p["b_m"] = lb(ks[11], D)          # mproj
    p["w_cat1"] = lw(ks[12], D, D)                                            # concat Linear(2D -> D), split
    p["w_cat2"] = lw(ks[13], D, D);         p["b_cat"] = lb(ks[14], D)
    p["w_attn_r"] = lw(ks[15], D, 1).T.reshape(1, D)                          # attn Linear(D, 1)
    p["b_attn_r"] = jnp.zeros((1, 1), jnp.float32)
    # MACUnit
    p["initial_memory"] = jax.random.normal(ks[16], (1, D), jnp.float32)      # cfg.init_mem == 'random'
    return p


if __name__ == "__main__":
    B, L, K, D, MAX_STEP = 2, 8, 16, 32, 4   # K = 4x4 flattened spatial knowledge base

    key = jax.random.PRNGKey(0)
    kp_, kq, kc, kk = jax.random.split(key, 4)
    params = init_params(kp_, D, MAX_STEP)
    question = jax.random.normal(kq, (B, D), jnp.float32)
    context = jax.random.normal(kc, (B, L, D), jnp.float32)
    knowledge = jax.random.normal(kk, (B, K, D), jnp.float32)
    # max(question_lengths) must equal L (same requirement as the PyTorch mask_by_length broadcast)
    question_lengths = jnp.array([L, 5], dtype=jnp.int32)

    memory = mac_unit_forward(params, context, question, knowledge, question_lengths, max_step=MAX_STEP)
    memory = jax.block_until_ready(memory)

    # Tight check against a reference that mirrors the kernel's bf16-MXU / f32-accumulate numerics;
    # remaining delta (~1e-3) comes from pl.reciprocal(approx=True) in the two softmaxes.
    ref_bf16 = mac_unit_reference_bf16(params, context, question, knowledge, question_lengths, MAX_STEP)
    np.testing.assert_allclose(np.asarray(memory), np.asarray(ref_bf16), rtol=2e-2, atol=2e-2)

    # Coarse parity check against the full-f32 math of the original module: bf16 MXU casting
    # compounded over 4 reasoning steps accounts for the (small) gap.
    ref_f32 = mac_unit_reference_f32(params, context, question, knowledge, question_lengths, MAX_STEP)
    np.testing.assert_allclose(np.asarray(memory), np.asarray(ref_f32), rtol=2e-1, atol=2e-1)

    print("KERNEL_OK")
</pallas_src>

<mosaic_0001>
module attributes {stable_mosaic.version = 11 : i64} {
  func.func @mac_fused_kernel(%arg0: i32, %arg1: memref<2x32xf32, #tpu.memory_space<vmem>>, %arg2: memref<2x8x32xbf16, #tpu.memory_space<vmem>>, %arg3: memref<2x16x32xbf16, #tpu.memory_space<vmem>>, %arg4: memref<2x1xi32, #tpu.memory_space<vmem>>, %arg5: memref<32x32xbf16, #tpu.memory_space<vmem>>, %arg6: memref<1x32xf32, #tpu.memory_space<vmem>>, %arg7: memref<4x32x32xbf16, #tpu.memory_space<vmem>>, %arg8: memref<4x1x32xf32, #tpu.memory_space<vmem>>, %arg9: memref<32x32xbf16, #tpu.memory_space<vmem>>, %arg10: memref<32x32xbf16, #tpu.memory_space<vmem>>, %arg11: memref<1x32xf32, #tpu.memory_space<vmem>>, %arg12: memref<1x32xf32, #tpu.memory_space<vmem>>, %arg13: memref<1x1xf32, #tpu.memory_space<vmem>>, %arg14: memref<32x32xbf16, #tpu.memory_space<vmem>>, %arg15: memref<1x32xf32, #tpu.memory_space<vmem>>, %arg16: memref<32x32xbf16, #tpu.memory_space<vmem>>, %arg17: memref<1x32xf32, #tpu.memory_space<vmem>>, %arg18: memref<32x32xbf16, #tpu.memory_space<vmem>>, %arg19: memref<32x32xbf16, #tpu.memory_space<vmem>>, %arg20: memref<1x32xf32, #tpu.memory_space<vmem>>, %arg21: memref<1x32xf32, #tpu.memory_space<vmem>>, %arg22: memref<1x1xf32, #tpu.memory_space<vmem>>, %arg23: memref<1x32xf32, #tpu.memory_space<vmem>>, %arg24: memref<2x32xf32, #tpu.memory_space<vmem>>) attributes {dimension_semantics = [#tpu.dimension_semantics<parallel>], iteration_bounds = array<i64: 1>, scalar_prefetch = 0 : i64, scratch_operands = 0 : i64, tpu.core_type = #tpu.core_type<tc>, window_params = [{transform_indices = @transform_0, window_bounds = array<i64: 2, 32>}, {transform_indices = @transform_1, window_bounds = array<i64: 2, 8, 32>}, {transform_indices = @transform_2, window_bounds = array<i64: 2, 16, 32>}, {transform_indices = @transform_3, window_bounds = array<i64: 2, 1>}, {pipeline_mode = #tpu.pipeline_mode<synchronous>, transform_indices = @transform_4, window_bounds = array<i64: 32, 32>}, {pipeline_mode = #tpu.pipeline_mode<synchronous>, transform_indices = @transform_5, window_bounds = array<i64: 1, 32>}, {pipeline_mode = #tpu.pipeline_mode<synchronous>, transform_indices = @transform_6, window_bounds = array<i64: 4, 32, 32>}, {pipeline_mode = #tpu.pipeline_mode<synchronous>, transform_indices = @transform_7, window_bounds = array<i64: 4, 1, 32>}, {pipeline_mode = #tpu.pipeline_mode<synchronous>, transform_indices = @transform_8, window_bounds = array<i64: 32, 32>}, {pipeline_mode = #tpu.pipeline_mode<synchronous>, transform_indices = @transform_9, window_bounds = array<i64: 32, 32>}, {pipeline_mode = #tpu.pipeline_mode<synchronous>, transform_indices = @transform_10, window_bounds = array<i64: 1, 32>}, {pipeline_mode = #tpu.pipeline_mode<synchronous>, transform_indices = @transform_11, window_bounds = array<i64: 1, 32>}, {pipeline_mode = #tpu.pipeline_mode<synchronous>, transform_indices = @transform_12, window_bounds = array<i64: 1, 1>}, {pipeline_mode = #tpu.pipeline_mode<synchronous>, transform_indices = @transform_13, window_bounds = array<i64: 32, 32>}, {pipeline_mode = #tpu.pipeline_mode<synchronous>, transform_indices = @transform_14, window_bounds = array<i64: 1, 32>}, {pipeline_mode = #tpu.pipeline_mode<synchronous>, transform_indices = @transform_15, window_bounds = array<i64: 32, 32>}, {pipeline_mode = #tpu.pipeline_mode<synchronous>, transform_indices = @transform_16, window_bounds = array<i64: 1, 32>}, {pipeline_mode = #tpu.pipeline_mode<synchronous>, transform_indices = @transform_17, window_bounds = array<i64: 32, 32>}, {pipeline_mode = #tpu.pipeline_mode<synchronous>, transform_indices = @transform_18, window_bounds = array<i64: 32, 32>}, {pipeline_mode = #tpu.pipeline_mode<synchronous>, transform_indices = @transform_19, window_bounds = array<i64: 1, 32>}, {pipeline_mode = #tpu.pipeline_mode<synchronous>, transform_indices = @transform_20, window_bounds = array<i64: 1, 32>}, {pipeline_mode = #tpu.pipeline_mode<synchronous>, transform_indices = @transform_21, window_bounds = array<i64: 1, 1>}, {pipeline_mode = #tpu.pipeline_mode<synchronous>, transform_indices = @transform_22, window_bounds = array<i64: 1, 32>}, {transform_indices = @transform_23, window_bounds = array<i64: 2, 32>}]} {
    %c0 = arith.constant 0 : index
    %c0_0 = arith.constant 0 : index
    %0 = vector.load %arg1[%c0, %c0_0] : memref<2x32xf32, #tpu.memory_space<vmem>>, vector<2x32xf32>
    %c0_1 = arith.constant 0 : index
    %c0_2 = arith.constant 0 : index
    %c0_3 = arith.constant 0 : index
    %1 = vector.load %arg2[%c0_1, %c0_2, %c0_3] : memref<2x8x32xbf16, #tpu.memory_space<vmem>>, vector<2x8x32xbf16>
    %c0_4 = arith.constant 0 : index
    %c0_5 = arith.constant 0 : index
    %c0_6 = arith.constant 0 : index
    %2 = vector.load %arg3[%c0_4, %c0_5, %c0_6] : memref<2x16x32xbf16, #tpu.memory_space<vmem>>, vector<2x16x32xbf16>
    %3 = tpu.iota {dimensions = array<i32: 2>} : vector<2x1x8xi32>
    %c0_7 = arith.constant 0 : index
    %c0_8 = arith.constant 0 : index
    %4 = vector.load %arg4[%c0_7, %c0_8] : memref<2x1xi32, #tpu.memory_space<vmem>>, vector<2x1xi32>
    %5 = vector.shape_cast %4 : vector<2x1xi32> to vector<2x1x1xi32>
    %6 = vector.broadcast %5 : vector<2x1x1xi32> to vector<2x1x8xi32>
    %7 = arith.cmpi slt, %3, %6 : vector<2x1x8xi32>
    %cst = arith.constant 0.000000e+00 : f32
    %cst_9 = arith.constant -1.000000e+30 : f32
    %8 = vector.broadcast %cst : f32 to vector<2x1x8xf32>
    %9 = vector.broadcast %cst_9 : f32 to vector<2x1x8xf32>
    %10 = arith.select %7, %8, %9 : vector<2x1x8xi1>, vector<2x1x8xf32>
    %11 = arith.truncf %0 : vector<2x32xf32> to vector<2x32xbf16>
    %c0_10 = arith.constant 0 : index
    %c0_11 = arith.constant 0 : index
    %12 = vector.load %arg5[%c0_10, %c0_11] : memref<32x32xbf16, #tpu.memory_space<vmem>>, vector<32x32xbf16>
    %cst_12 = arith.constant dense<0.000000e+00> : vector<2x32xf32>
    %13 = tpu.matmul %11, %12, %cst_12 {dimension_numbers = #tpu.dot_dimension_numbers<[1], [0], [0], [1], [0, 0, 1, 1], [], []>} : vector<2x32xbf16>, vector<32x32xbf16>, vector<2x32xf32> -> vector<2x32xf32>
    %c0_13 = arith.constant 0 : index
    %c0_14 = arith.constant 0 : index
    %14 = vector.load %arg6[%c0_13, %c0_14] : memref<1x32xf32, #tpu.memory_space<vmem>>, vector<1x32xf32>
    %15 = vector.broadcast %14 : vector<1x32xf32> to vector<2x32xf32>
    %16 = arith.addf %13, %15 : vector<2x32xf32>
    %17 = math.tanh %16 : vector<2x32xf32>
    %18 = arith.truncf %17 : vector<2x32xf32> to vector<2x32xbf16>
    %19 = vector.shape_cast %2 : vector<2x16x32xbf16> to vector<32x32xbf16>
    %c0_15 = arith.constant 0 : index
    %c0_16 = arith.constant 0 : index
    %20 = vector.load %arg14[%c0_15, %c0_16] : memref<32x32xbf16, #tpu.memory_space<vmem>>, vector<32x32xbf16>
    %cst_17 = arith.constant dense<0.000000e+00> : vector<32x32xf32>
    %21 = tpu.matmul %19, %20, %cst_17 {dimension_numbers = #tpu.dot_dimension_numbers<[1], [0], [0], [1], [0, 0, 1, 1], [], []>} : vector<32x32xbf16>, vector<32x32xbf16>, vector<32x32xf32> -> vector<32x32xf32>
    %c0_18 = arith.constant 0 : index
    %c0_19 = arith.constant 0 : index
    %22 = vector.load %arg15[%c0_18, %c0_19] : memref<1x32xf32, #tpu.memory_space<vmem>>, vector<1x32xf32>
    %23 = vector.broadcast %22 : vector<1x32xf32> to vector<32x32xf32>
    %24 = arith.addf %21, %23 : vector<32x32xf32>
    %25 = arith.truncf %24 : vector<32x32xf32> to vector<32x32xbf16>
    %c0_20 = arith.constant 0 : index
    %c0_21 = arith.constant 0 : index
    %26 = vector.load %arg19[%c0_20, %c0_21] : memref<32x32xbf16, #tpu.memory_space<vmem>>, vector<32x32xbf16>
    %cst_22 = arith.constant dense<0.000000e+00> : vector<32x32xf32>
    %27 = tpu.matmul %25, %26, %cst_22 {dimension_numbers = #tpu.dot_dimension_numbers<[1], [0], [0], [1], [0, 0, 1, 1], [], []>} : vector<32x32xbf16>, vector<32x32xbf16>, vector<32x32xf32> -> vector<32x32xf32>
    %c0_23 = arith.constant 0 : index
    %c0_24 = arith.constant 0 : index
    %28 = vector.load %arg20[%c0_23, %c0_24] : memref<1x32xf32, #tpu.memory_space<vmem>>, vector<1x32xf32>
    %29 = vector.broadcast %28 : vector<1x32xf32> to vector<32x32xf32>
    %30 = arith.addf %27, %29 : vector<32x32xf32>
    %31 = arith.truncf %30 : vector<32x32xf32> to vector<32x32xbf16>
    %32 = vector.shape_cast %25 : vector<32x32xbf16> to vector<2x16x32xbf16>
    %c0_25 = arith.constant 0 : index
    %c0_26 = arith.constant 0 : index
    %33 = vector.load %arg12[%c0_25, %c0_26] : memref<1x32xf32, #tpu.memory_space<vmem>>, vector<1x32xf32>
    %c0_27 = arith.constant 0 : index
    %c0_28 = arith.constant 0 : index
    %34 = vector.load %arg21[%c0_27, %c0_28] : memref<1x32xf32, #tpu.memory_space<vmem>>, vector<1x32xf32>
    %35 = vector.shape_cast %34 : vector<1x32xf32> to vector<1x1x32xf32>
    %36 = vector.shape_cast %35 : vector<1x1x32xf32> to vector<1x1x32xf32>
    %37 = vector.broadcast %36 : vector<1x1x32xf32> to vector<2x1x32xf32>
    %38 = arith.truncf %37 : vector<2x1x32xf32> to vector<2x1x32xbf16>
    %c0_29 = arith.constant 0 : index
    %c0_30 = arith.constant 0 : index
    %39 = vector.load %arg13[%c0_29, %c0_30] : memref<1x1xf32, #tpu.memory_space<vmem>>, vector<1x1xf32>
    %c0_31 = arith.constant 0 : index
    %c0_32 = arith.constant 0 : index
    %40 = vector.load %arg22[%c0_31, %c0_32] : memref<1x1xf32, #tpu.memory_space<vmem>>, vector<1x1xf32>
    %c0_33 = arith.constant 0 : index
    %c0_34 = arith.constant 0 : index
    %41 = vector.load %arg9[%c0_33, %c0_34] : memref<32x32xbf16, #tpu.memory_space<vmem>>, vector<32x32xbf16>
    %c0_35 = arith.constant 0 : index
    %c0_36 = arith.constant 0 : index
    %42 = vector.load %arg10[%c0_35, %c0_36] : memref<32x32xbf16, #tpu.memory_space<vmem>>, vector<32x32xbf16>
    %c0_37 = arith.constant 0 : index
    %c0_38 = arith.constant 0 : index
    %43 = vector.load %arg11[%c0_37, %c0_38] : memref<1x32xf32, #tpu.memory_space<vmem>>, vector<1x32xf32>
    %c0_39 = arith.constant 0 : index
    %c0_40 = arith.constant 0 : index
    %44 = vector.load %arg16[%c0_39, %c0_40] : memref<32x32xbf16, #tpu.memory_space<vmem>>, vector<32x32xbf16>
    %c0_41 = arith.constant 0 : index
    %c0_42 = arith.constant 0 : index
    %45 = vector.load %arg17[%c0_41, %c0_42] : memref<1x32xf32, #tpu.memory_space<vmem>>, vector<1x32xf32>
    %c0_43 = arith.constant 0 : index
    %c0_44 = arith.constant 0 : index
    %46 = vector.load %arg18[%c0_43, %c0_44] : memref<32x32xbf16, #tpu.memory_space<vmem>>, vector<32x32xbf16>
    %c0_45 = arith.constant 0 : index
    %c0_46 = arith.constant 0 : index
    %47 = vector.load %arg23[%c0_45, %c0_46] : memref<1x32xf32, #tpu.memory_space<vmem>>, vector<1x32xf32>
    %48 = vector.shape_cast %47 : vector<1x32xf32> to vector<1x32xf32>
    %49 = vector.broadcast %48 : vector<1x32xf32> to vector<2x32xf32>
    %c0_47 = arith.constant 0 : index
    %c0_48 = arith.constant 0 : index
    %c0_49 = arith.constant 0 : index
    %50 = vector.load %arg7[%c0_47, %c0_48, %c0_49] : memref<4x32x32xbf16, #tpu.memory_space<vmem>>, vector<1x32x32xbf16>
    %51 = vector.shape_cast %50 : vector<1x32x32xbf16> to vector<32x32xbf16>
    %cst_50 = arith.constant dense<0.000000e+00> : vector<2x32xf32>
    %52 = tpu.matmul %18, %51, %cst_50 {dimension_numbers = #tpu.dot_dimension_numbers<[1], [0], [0], [1], [0, 0, 1, 1], [], []>} : vector<2x32xbf16>, vector<32x32xbf16>, vector<2x32xf32> -> vector<2x32xf32>
    %c0_51 = arith.constant 0 : index
    %c0_52 = arith.constant 0 : index
    %c0_53 = arith.constant 0 : index
    %53 = vector.load %arg8[%c0_51, %c0_52, %c0_53] : memref<4x1x32xf32, #tpu.memory_space<vmem>>, vector<1x1x32xf32>
    %54 = vector.shape_cast %53 : vector<1x1x32xf32> to vector<1x32xf32>
    %55 = vector.broadcast %54 : vector<1x32xf32> to vector<2x32xf32>
    %56 = arith.addf %52, %55 : vector<2x32xf32>
    %57 = arith.truncf %0 : vector<2x32xf32> to vector<2x32xbf16>
    %cst_54 = arith.constant dense<0.000000e+00> : vector<2x32xf32>
    %58 = tpu.matmul %57, %41, %cst_54 {dimension_numbers = #tpu.dot_dimension_numbers<[1], [0], [0], [1], [0, 0, 1, 1], [], []>} : vector<2x32xbf16>, vector<32x32xbf16>, vector<2x32xf32> -> vector<2x32xf32>
    %59 = arith.truncf %56 : vector<2x32xf32> to vector<2x32xbf16>
    %cst_55 = arith.constant dense<0.000000e+00> : vector<2x32xf32>
    %60 = tpu.matmul %59, %42, %cst_55 {dimension_numbers = #tpu.dot_dimension_numbers<[1], [0], [0], [1], [0, 0, 1, 1], [], []>} : vector<2x32xbf16>, vector<32x32xbf16>, vector<2x32xf32> -> vector<2x32xf32>
    %61 = arith.addf %58, %60 : vector<2x32xf32>
    %62 = vector.broadcast %43 : vector<1x32xf32> to vector<2x32xf32>
    %63 = arith.addf %61, %62 : vector<2x32xf32>
    %64 = math.tanh %63 : vector<2x32xf32>
    %65 = vector.broadcast %33 : vector<1x32xf32> to vector<2x32xf32>
    %66 = arith.mulf %64, %65 : vector<2x32xf32>
    %67 = vector.shape_cast %66 : vector<2x32xf32> to vector<2x1x32xf32>
    %68 = arith.truncf %67 : vector<2x1x32xf32> to vector<2x1x32xbf16>
    "tpu.trace_start"() <{level = 10 : i32, message = "bqd,bkd->bqk"}> : () -> ()
    %cst_56 = arith.constant dense<0.000000e+00> : vector<2x1x8xf32>
    %69 = tpu.matmul %68, %1, %cst_56 {dimension_numbers = #tpu.dot_dimension_numbers<[2], [2], [1], [1], [0, 0, 0, 1, 1, 1], [0], [0]>} : vector<2x1x32xbf16>, vector<2x8x32xbf16>, vector<2x1x8xf32> -> vector<2x1x8xf32>
    "tpu.trace_stop"() : () -> ()
    %70 = vector.shape_cast %39 : vector<1x1xf32> to vector<1x1x1xf32>
    %71 = vector.broadcast %70 : vector<1x1x1xf32> to vector<2x1x8xf32>
    %72 = arith.addf %69, %71 : vector<2x1x8xf32>
    %73 = arith.addf %72, %10 : vector<2x1x8xf32>
    %cst_57 = arith.constant dense<0xFF800000> : vector<2x1xf32>
    %74 = vector.multi_reduction <maximumf>, %73, %cst_57 [2] : vector<2x1x8xf32> to vector<2x1xf32>
    %75 = vector.shape_cast %74 : vector<2x1xf32> to vector<2x1x1xf32>
    %76 = vector.broadcast %75 : vector<2x1x1xf32> to vector<2x1x8xf32>
    %77 = arith.subf %73, %76 : vector<2x1x8xf32>
    %78 = math.exp %77 : vector<2x1x8xf32>
    %cst_58 = arith.constant dense<0.000000e+00> : vector<2x1xf32>
    %79 = vector.multi_reduction <add>, %78, %cst_58 [2] : vector<2x1x8xf32> to vector<2x1xf32>
    %80 = vector.shape_cast %79 : vector<2x1xf32> to vector<2x1x1xf32>
    %81 = tpu.reciprocal %80 {approx = true} : vector<2x1x1xf32> -> vector<2x1x1xf32>
    %82 = vector.broadcast %81 : vector<2x1x1xf32> to vector<2x1x8xf32>
    %83 = arith.mulf %78, %82 : vector<2x1x8xf32>
    %84 = arith.truncf %83 : vector<2x1x8xf32> to vector<2x1x8xbf16>
    "tpu.trace_start"() <{level = 10 : i32, message = "bqk,bkd->bqd"}> : () -> ()
    %cst_59 = arith.constant dense<0.000000e+00> : vector<2x1x32xf32>
    %85 = tpu.matmul %84, %1, %cst_59 {dimension_numbers = #tpu.dot_dimension_numbers<[2], [1], [1], [2], [0, 0, 0, 1, 1, 2], [0], [0]>} : vector<2x1x8xbf16>, vector<2x8x32xbf16>, vector<2x1x32xf32> -> vector<2x1x32xf32>
    "tpu.trace_stop"() : () -> ()
    %86 = vector.shape_cast %85 : vector<2x1x32xf32> to vector<2x32xf32>
    %87 = arith.truncf %49 : vector<2x32xf32> to vector<2x32xbf16>
    %cst_60 = arith.constant dense<0.000000e+00> : vector<2x32xf32>
    %88 = tpu.matmul %87, %44, %cst_60 {dimension_numbers = #tpu.dot_dimension_numbers<[1], [0], [0], [1], [0, 0, 1, 1], [], []>} : vector<2x32xbf16>, vector<32x32xbf16>, vector<2x32xf32> -> vector<2x32xf32>
    %89 = vector.broadcast %45 : vector<1x32xf32> to vector<2x32xf32>
    %90 = arith.addf %88, %89 : vector<2x32xf32>
    %91 = arith.truncf %90 : vector<2x32xf32> to vector<2x32xbf16>
    %92 = vector.shape_cast %91 : vector<2x32xbf16> to vector<2x1x32xbf16>
    %93 = vector.broadcast %92 : vector<2x1x32xbf16> to vector<2x16x32xbf16>
    %94 = arith.mulf %32, %93 : vector<2x16x32xbf16>
    %95 = vector.shape_cast %94 : vector<2x16x32xbf16> to vector<32x32xbf16>
    %cst_61 = arith.constant dense<0.000000e+00> : vector<32x32xf32>
    %96 = tpu.matmul %95, %46, %cst_61 {dimension_numbers = #tpu.dot_dimension_numbers<[1], [0], [0], [1], [0, 0, 1, 1], [], []>} : vector<32x32xbf16>, vector<32x32xbf16>, vector<32x32xf32> -> vector<32x32xf32>
    %97 = arith.extf %31 : vector<32x32xbf16> to vector<32x32xf32>
    %98 = arith.addf %96, %97 : vector<32x32xf32>
    %99 = vector.shape_cast %98 : vector<32x32xf32> to vector<2x16x32xf32>
    %cst_62 = arith.constant 0.000000e+00 : f32
    %100 = vector.broadcast %cst_62 : f32 to vector<2x16x32xf32>
    %101 = arith.cmpf ogt, %99, %100 : vector<2x16x32xf32>
    %cst_63 = arith.constant 0.000000e+00 : f32
    %102 = vector.broadcast %cst_63 : f32 to vector<2x16x32xf32>
    %103 = arith.minimumf %99, %102 : vector<2x16x32xf32>
    %104 = math.exp %103 : vector<2x16x32xf32>
    %cst_64 = arith.constant 1.000000e+00 : f32
    %105 = vector.broadcast %cst_64 : f32 to vector<2x16x32xf32>
    %106 = arith.subf %104, %105 : vector<2x16x32xf32>
    %107 = arith.select %101, %99, %106 : vector<2x16x32xi1>, vector<2x16x32xf32>
    %108 = vector.broadcast %85 : vector<2x1x32xf32> to vector<2x16x32xf32>
    %109 = arith.mulf %107, %108 : vector<2x16x32xf32>
    %cst_65 = arith.constant 0.000000e+00 : f32
    %110 = vector.broadcast %cst_65 : f32 to vector<2x16x32xf32>
    %111 = arith.cmpf ogt, %109, %110 : vector<2x16x32xf32>
    %cst_66 = arith.constant 0.000000e+00 : f32
    %112 = vector.broadcast %cst_66 : f32 to vector<2x16x32xf32>
    %113 = arith.minimumf %109, %112 : vector<2x16x32xf32>
    %114 = math.exp %113 : vector<2x16x32xf32>
    %cst_67 = arith.constant 1.000000e+00 : f32
    %115 = vector.broadcast %cst_67 : f32 to vector<2x16x32xf32>
    %116 = arith.subf %114, %115 : vector<2x16x32xf32>
    %117 = arith.select %111, %109, %116 : vector<2x16x32xi1>, vector<2x16x32xf32>
    %118 = arith.truncf %117 : vector<2x16x32xf32> to vector<2x16x32xbf16>
    "tpu.trace_start"() <{level = 10 : i32, message = "bqd,bkd->bqk"}> : () -> ()
    %cst_68 = arith.constant dense<0.000000e+00> : vector<2x1x16xf32>
    %119 = tpu.matmul %38, %118, %cst_68 {dimension_numbers = #tpu.dot_dimension_numbers<[2], [2], [1], [1], [0, 0, 0, 1, 1, 1], [0], [0]>} : vector<2x1x32xbf16>, vector<2x16x32xbf16>, vector<2x1x16xf32> -> vector<2x1x16xf32>
    "tpu.trace_stop"() : () -> ()
    %120 = vector.shape_cast %40 : vector<1x1xf32> to vector<1x1x1xf32>
    %121 = vector.broadcast %120 : vector<1x1x1xf32> to vector<2x1x16xf32>
    %122 = arith.addf %119, %121 : vector<2x1x16xf32>
    %cst_69 = arith.constant dense<0xFF800000> : vector<2x1xf32>
    %123 = vector.multi_reduction <maximumf>, %122, %cst_69 [2] : vector<2x1x16xf32> to vector<2x1xf32>
    %124 = vector.shape_cast %123 : vector<2x1xf32> to vector<2x1x1xf32>
    %125 = vector.broadcast %124 : vector<2x1x1xf32> to vector<2x1x16xf32>
    %126 = arith.subf %122, %125 : vector<2x1x16xf32>
    %127 = math.exp %126 : vector<2x1x16xf32>
    %cst_70 = arith.constant dense<0.000000e+00> : vector<2x1xf32>
    %128 = vector.multi_reduction <add>, %127, %cst_70 [2] : vector<2x1x16xf32> to vector<2x1xf32>
    %129 = vector.shape_cast %128 : vector<2x1xf32> to vector<2x1x1xf32>
    %130 = tpu.reciprocal %129 {approx = true} : vector<2x1x1xf32> -> vector<2x1x1xf32>
    %131 = vector.broadcast %130 : vector<2x1x1xf32> to vector<2x1x16xf32>
    %132 = arith.mulf %127, %131 : vector<2x1x16xf32>
    %133 = arith.truncf %132 : vector<2x1x16xf32> to vector<2x1x16xbf16>
    "tpu.trace_start"() <{level = 10 : i32, message = "bqk,bkd->bqd"}> : () -> ()
    %cst_71 = arith.constant dense<0.000000e+00> : vector<2x1x32xf32>
    %134 = tpu.matmul %133, %2, %cst_71 {dimension_numbers = #tpu.dot_dimension_numbers<[2], [1], [1], [2], [0, 0, 0, 1, 1, 2], [0], [0]>} : vector<2x1x16xbf16>, vector<2x16x32xbf16>, vector<2x1x32xf32> -> vector<2x1x32xf32>
    "tpu.trace_stop"() : () -> ()
    %135 = vector.shape_cast %134 : vector<2x1x32xf32> to vector<2x32xf32>
    %c1 = arith.constant 1 : index
    %c0_72 = arith.constant 0 : index
    %c0_73 = arith.constant 0 : index
    %136 = vector.load %arg7[%c1, %c0_72, %c0_73] : memref<4x32x32xbf16, #tpu.memory_space<vmem>>, vector<1x32x32xbf16>
    %137 = vector.shape_cast %136 : vector<1x32x32xbf16> to vector<32x32xbf16>
    %cst_74 = arith.constant dense<0.000000e+00> : vector<2x32xf32>
    %138 = tpu.matmul %18, %137, %cst_74 {dimension_numbers = #tpu.dot_dimension_numbers<[1], [0], [0], [1], [0, 0, 1, 1], [], []>} : vector<2x32xbf16>, vector<32x32xbf16>, vector<2x32xf32> -> vector<2x32xf32>
    %c1_75 = arith.constant 1 : index
    %c0_76 = arith.constant 0 : index
    %c0_77 = arith.constant 0 : index
    %139 = vector.load %arg8[%c1_75, %c0_76, %c0_77] : memref<4x1x32xf32, #tpu.memory_space<vmem>>, vector<1x1x32xf32>
    %140 = vector.shape_cast %139 : vector<1x1x32xf32> to vector<1x32xf32>
    %141 = vector.broadcast %140 : vector<1x32xf32> to vector<2x32xf32>
    %142 = arith.addf %138, %141 : vector<2x32xf32>
    %143 = arith.truncf %86 : vector<2x32xf32> to vector<2x32xbf16>
    %cst_78 = arith.constant dense<0.000000e+00> : vector<2x32xf32>
    %144 = tpu.matmul %143, %41, %cst_78 {dimension_numbers = #tpu.dot_dimension_numbers<[1], [0], [0], [1], [0, 0, 1, 1], [], []>} : vector<2x32xbf16>, vector<32x32xbf16>, vector<2x32xf32> -> vector<2x32xf32>
    %145 = arith.truncf %142 : vector<2x32xf32> to vector<2x32xbf16>
    %cst_79 = arith.constant dense<0.000000e+00> : vector<2x32xf32>
    %146 = tpu.matmul %145, %42, %cst_79 {dimension_numbers = #tpu.dot_dimension_numbers<[1], [0], [0], [1], [0, 0, 1, 1], [], []>} : vector<2x32xbf16>, vector<32x32xbf16>, vector<2x32xf32> -> vector<2x32xf32>
    %147 = arith.addf %144, %146 : vector<2x32xf32>
    %148 = vector.broadcast %43 : vector<1x32xf32> to vector<2x32xf32>
    %149 = arith.addf %147, %148 : vector<2x32xf32>
    %150 = math.tanh %149 : vector<2x32xf32>
    %151 = vector.broadcast %33 : vector<1x32xf32> to vector<2x32xf32>
    %152 = arith.mulf %150, %151 : vector<2x32xf32>
    %153 = vector.shape_cast %152 : vector<2x32xf32> to vector<2x1x32xf32>
    %154 = arith.truncf %153 : vector<2x1x32xf32> to vector<2x1x32xbf16>
    "tpu.trace_start"() <{level = 10 : i32, message = "bqd,bkd->bqk"}> : () -> ()
    %cst_80 = arith.constant dense<0.000000e+00> : vector<2x1x8xf32>
    %155 = tpu.matmul %154, %1, %cst_80 {dimension_numbers = #tpu.dot_dimension_numbers<[2], [2], [1], [1], [0, 0, 0, 1, 1, 1], [0], [0]>} : vector<2x1x32xbf16>, vector<2x8x32xbf16>, vector<2x1x8xf32> -> vector<2x1x8xf32>
    "tpu.trace_stop"() : () -> ()
    %156 = vector.shape_cast %39 : vector<1x1xf32> to vector<1x1x1xf32>
    %157 = vector.broadcast %156 : vector<1x1x1xf32> to vector<2x1x8xf32>
    %158 = arith.addf %155, %157 : vector<2x1x8xf32>
    %159 = arith.addf %158, %10 : vector<2x1x8xf32>
    %cst_81 = arith.constant dense<0xFF800000> : vector<2x1xf32>
    %160 = vector.multi_reduction <maximumf>, %159, %cst_81 [2] : vector<2x1x8xf32> to vector<2x1xf32>
    %161 = vector.shape_cast %160 : vector<2x1xf32> to vector<2x1x1xf32>
    %162 = vector.broadcast %161 : vector<2x1x1xf32> to vector<2x1x8xf32>
    %163 = arith.subf %159, %162 : vector<2x1x8xf32>
    %164 = math.exp %163 : vector<2x1x8xf32>
    %cst_82 = arith.constant dense<0.000000e+00> : vector<2x1xf32>
    %165 = vector.multi_reduction <add>, %164, %cst_82 [2] : vector<2x1x8xf32> to vector<2x1xf32>
    %166 = vector.shape_cast %165 : vector<2x1xf32> to vector<2x1x1xf32>
    %167 = tpu.reciprocal %166 {approx = true} : vector<2x1x1xf32> -> vector<2x1x1xf32>
    %168 = vector.broadcast %167 : vector<2x1x1xf32> to vector<2x1x8xf32>
    %169 = arith.mulf %164, %168 : vector<2x1x8xf32>
    %170 = arith.truncf %169 : vector<2x1x8xf32> to vector<2x1x8xbf16>
    "tpu.trace_start"() <{level = 10 : i32, message = "bqk,bkd->bqd"}> : () -> ()
    %cst_83 = arith.constant dense<0.000000e+00> : vector<2x1x32xf32>
    %171 = tpu.matmul %170, %1, %cst_83 {dimension_numbers = #tpu.dot_dimension_numbers<[2], [1], [1], [2], [0, 0, 0, 1, 1, 2], [0], [0]>} : vector<2x1x8xbf16>, vector<2x8x32xbf16>, vector<2x1x32xf32> -> vector<2x1x32xf32>
    "tpu.trace_stop"() : () -> ()
    %172 = vector.shape_cast %171 : vector<2x1x32xf32> to vector<2x32xf32>
    %173 = arith.truncf %135 : vector<2x32xf32> to vector<2x32xbf16>
    %cst_84 = arith.constant dense<0.000000e+00> : vector<2x32xf32>
    %174 = tpu.matmul %173, %44, %cst_84 {dimension_numbers = #tpu.dot_dimension_numbers<[1], [0], [0], [1], [0, 0, 1, 1], [], []>} : vector<2x32xbf16>, vector<32x32xbf16>, vector<2x32xf32> -> vector<2x32xf32>
    %175 = vector.broadcast %45 : vector<1x32xf32> to vector<2x32xf32>
    %176 = arith.addf %174, %175 : vector<2x32xf32>
    %177 = arith.truncf %176 : vector<2x32xf32> to vector<2x32xbf16>
    %178 = vector.shape_cast %177 : vector<2x32xbf16> to vector<2x1x32xbf16>
    %179 = vector.broadcast %178 : vector<2x1x32xbf16> to vector<2x16x32xbf16>
    %180 = arith.mulf %32, %179 : vector<2x16x32xbf16>
    %181 = vector.shape_cast %180 : vector<2x16x32xbf16> to vector<32x32xbf16>
    %cst_85 = arith.constant dense<0.000000e+00> : vector<32x32xf32>
    %182 = tpu.matmul %181, %46, %cst_85 {dimension_numbers = #tpu.dot_dimension_numbers<[1], [0], [0], [1], [0, 0, 1, 1], [], []>} : vector<32x32xbf16>, vector<32x32xbf16>, vector<32x32xf32> -> vector<32x32xf32>
    %183 = arith.extf %31 : vector<32x32xbf16> to vector<32x32xf32>
    %184 = arith.addf %182, %183 : vector<32x32xf32>
    %185 = vector.shape_cast %184 : vector<32x32xf32> to vector<2x16x32xf32>
    %cst_86 = arith.constant 0.000000e+00 : f32
    %186 = vector.broadcast %cst_86 : f32 to vector<2x16x32xf32>
    %187 = arith.cmpf ogt, %185, %186 : vector<2x16x32xf32>
    %cst_87 = arith.constant 0.000000e+00 : f32
    %188 = vector.broadcast %cst_87 : f32 to vector<2x16x32xf32>
    %189 = arith.minimumf %185, %188 : vector<2x16x32xf32>
    %190 = math.exp %189 : vector<2x16x32xf32>
    %cst_88 = arith.constant 1.000000e+00 : f32
    %191 = vector.broadcast %cst_88 : f32 to vector<2x16x32xf32>
    %192 = arith.subf %190, %191 : vector<2x16x32xf32>
    %193 = arith.select %187, %185, %192 : vector<2x16x32xi1>, vector<2x16x32xf32>
    %194 = vector.broadcast %171 : vector<2x1x32xf32> to vector<2x16x32xf32>
    %195 = arith.mulf %193, %194 : vector<2x16x32xf32>
    %cst_89 = arith.constant 0.000000e+00 : f32
    %196 = vector.broadcast %cst_89 : f32 to vector<2x16x32xf32>
    %197 = arith.cmpf ogt, %195, %196 : vector<2x16x32xf32>
    %cst_90 = arith.constant 0.000000e+00 : f32
    %198 = vector.broadcast %cst_90 : f32 to vector<2x16x32xf32>
    %199 = arith.minimumf %195, %198 : vector<2x16x32xf32>
    %200 = math.exp %199 : vector<2x16x32xf32>
    %cst_91 = arith.constant 1.000000e+00 : f32
    %201 = vector.broadcast %cst_91 : f32 to vector<2x16x32xf32>
    %202 = arith.subf %200, %201 : vector<2x16x32xf32>
    %203 = arith.select %197, %195, %202 : vector<2x16x32xi1>, vector<2x16x32xf32>
    %204 = arith.truncf %203 : vector<2x16x32xf32> to vector<2x16x32xbf16>
    "tpu.trace_start"() <{level = 10 : i32, message = "bqd,bkd->bqk"}> : () -> ()
    %cst_92 = arith.constant dense<0.000000e+00> : vector<2x1x16xf32>
    %205 = tpu.matmul %38, %204, %cst_92 {dimension_numbers = #tpu.dot_dimension_numbers<[2], [2], [1], [1], [0, 0, 0, 1, 1, 1], [0], [0]>} : vector<2x1x32xbf16>, vector<2x16x32xbf16>, vector<2x1x16xf32> -> vector<2x1x16xf32>
    "tpu.trace_stop"() : () -> ()
    %206 = vector.shape_cast %40 : vector<1x1xf32> to vector<1x1x1xf32>
    %207 = vector.broadcast %206 : vector<1x1x1xf32> to vector<2x1x16xf32>
    %208 = arith.addf %205, %207 : vector<2x1x16xf32>
    %cst_93 = arith.constant dense<0xFF800000> : vector<2x1xf32>
    %209 = vector.multi_reduction <maximumf>, %208, %cst_93 [2] : vector<2x1x16xf32> to vector<2x1xf32>
    %210 = vector.shape_cast %209 : vector<2x1xf32> to vector<2x1x1xf32>
    %211 = vector.broadcast %210 : vector<2x1x1xf32> to vector<2x1x16xf32>
    %212 = arith.subf %208, %211 : vector<2x1x16xf32>
    %213 = math.exp %212 : vector<2x1x16xf32>
    %cst_94 = arith.constant dense<0.000000e+00> : vector<2x1xf32>
    %214 = vector.multi_reduction <add>, %213, %cst_94 [2] : vector<2x1x16xf32> to vector<2x1xf32>
    %215 = vector.shape_cast %214 : vector<2x1xf32> to vector<2x1x1xf32>
    %216 = tpu.reciprocal %215 {approx = true} : vector<2x1x1xf32> -> vector<2x1x1xf32>
    %217 = vector.broadcast %216 : vector<2x1x1xf32> to vector<2x1x16xf32>
    %218 = arith.mulf %213, %217 : vector<2x1x16xf32>
    %219 = arith.truncf %218 : vector<2x1x16xf32> to vector<2x1x16xbf16>
    "tpu.trace_start"() <{level = 10 : i32, message = "bqk,bkd->bqd"}> : () -> ()
    %cst_95 = arith.constant dense<0.000000e+00> : vector<2x1x32xf32>
    %220 = tpu.matmul %219, %2, %cst_95 {dimension_numbers = #tpu.dot_dimension_numbers<[2], [1], [1], [2], [0, 0, 0, 1, 1, 2], [0], [0]>} : vector<2x1x16xbf16>, vector<2x16x32xbf16>, vector<2x1x32xf32> -> vector<2x1x32xf32>
    "tpu.trace_stop"() : () -> ()
    %221 = vector.shape_cast %220 : vector<2x1x32xf32> to vector<2x32xf32>
    %c2 = arith.constant 2 : index
    %c0_96 = arith.constant 0 : index
    %c0_97 = arith.constant 0 : index
    %222 = vector.load %arg7[%c2, %c0_96, %c0_97] : memref<4x32x32xbf16, #tpu.memory_space<vmem>>, vector<1x32x32xbf16>
    %223 = vector.shape_cast %222 : vector<1x32x32xbf16> to vector<32x32xbf16>
    %cst_98 = arith.constant dense<0.000000e+00> : vector<2x32xf32>
    %224 = tpu.matmul %18, %223, %cst_98 {dimension_numbers = #tpu.dot_dimension_numbers<[1], [0], [0], [1], [0, 0, 1, 1], [], []>} : vector<2x32xbf16>, vector<32x32xbf16>, vector<2x32xf32> -> vector<2x32xf32>
    %c2_99 = arith.constant 2 : index
    %c0_100 = arith.constant 0 : index
    %c0_101 = arith.constant 0 : index
    %225 = vector.load %arg8[%c2_99, %c0_100, %c0_101] : memref<4x1x32xf32, #tpu.memory_space<vmem>>, vector<1x1x32xf32>
    %226 = vector.shape_cast %225 : vector<1x1x32xf32> to vector<1x32xf32>
    %227 = vector.broadcast %226 : vector<1x32xf32> to vector<2x32xf32>
    %228 = arith.addf %224, %227 : vector<2x32xf32>
    %229 = arith.truncf %172 : vector<2x32xf32> to vector<2x32xbf16>
    %cst_102 = arith.constant dense<0.000000e+00> : vector<2x32xf32>
    %230 = tpu.matmul %229, %41, %cst_102 {dimension_numbers = #tpu.dot_dimension_numbers<[1], [0], [0], [1], [0, 0, 1, 1], [], []>} : vector<2x32xbf16>, vector<32x32xbf16>, vector<2x32xf32> -> vector<2x32xf32>
    %231 = arith.truncf %228 : vector<2x32xf32> to vector<2x32xbf16>
    %cst_103 = arith.constant dense<0.000000e+00> : vector<2x32xf32>
    %232 = tpu.matmul %231, %42, %cst_103 {dimension_numbers = #tpu.dot_dimension_numbers<[1], [0], [0], [1], [0, 0, 1, 1], [], []>} : vector<2x32xbf16>, vector<32x32xbf16>, vector<2x32xf32> -> vector<2x32xf32>
    %233 = arith.addf %230, %232 : vector<2x32xf32>
    %234 = vector.broadcast %43 : vector<1x32xf32> to vector<2x32xf32>
    %235 = arith.addf %233, %234 : vector<2x32xf32>
    %236 = math.tanh %235 : vector<2x32xf32>
    %237 = vector.broadcast %33 : vector<1x32xf32> to vector<2x32xf32>
    %238 = arith.mulf %236, %237 : vector<2x32xf32>
    %239 = vector.shape_cast %238 : vector<2x32xf32> to vector<2x1x32xf32>
    %240 = arith.truncf %239 : vector<2x1x32xf32> to vector<2x1x32xbf16>
    "tpu.trace_start"() <{level = 10 : i32, message = "bqd,bkd->bqk"}> : () -> ()
    %cst_104 = arith.constant dense<0.000000e+00> : vector<2x1x8xf32>
    %241 = tpu.matmul %240, %1, %cst_104 {dimension_numbers = #tpu.dot_dimension_numbers<[2], [2], [1], [1], [0, 0, 0, 1, 1, 1], [0], [0]>} : vector<2x1x32xbf16>, vector<2x8x32xbf16>, vector<2x1x8xf32> -> vector<2x1x8xf32>
    "tpu.trace_stop"() : () -> ()
    %242 = vector.shape_cast %39 : vector<1x1xf32> to vector<1x1x1xf32>
    %243 = vector.broadcast %242 : vector<1x1x1xf32> to vector<2x1x8xf32>
    %244 = arith.addf %241, %243 : vector<2x1x8xf32>
    %245 = arith.addf %244, %10 : vector<2x1x8xf32>
    %cst_105 = arith.constant dense<0xFF800000> : vector<2x1xf32>
    %246 = vector.multi_reduction <maximumf>, %245, %cst_105 [2] : vector<2x1x8xf32> to vector<2x1xf32>
    %247 = vector.shape_cast %246 : vector<2x1xf32> to vector<2x1x1xf32>
    %248 = vector.broadcast %247 : vector<2x1x1xf32> to vector<2x1x8xf32>
    %249 = arith.subf %245, %248 : vector<2x1x8xf32>
    %250 = math.exp %249 : vector<2x1x8xf32>
    %cst_106 = arith.constant dense<0.000000e+00> : vector<2x1xf32>
    %251 = vector.multi_reduction <add>, %250, %cst_106 [2] : vector<2x1x8xf32> to vector<2x1xf32>
    %252 = vector.shape_cast %251 : vector<2x1xf32> to vector<2x1x1xf32>
    %253 = tpu.reciprocal %252 {approx = true} : vector<2x1x1xf32> -> vector<2x1x1xf32>
    %254 = vector.broadcast %253 : vector<2x1x1xf32> to vector<2x1x8xf32>
    %255 = arith.mulf %250, %254 : vector<2x1x8xf32>
    %256 = arith.truncf %255 : vector<2x1x8xf32> to vector<2x1x8xbf16>
    "tpu.trace_start"() <{level = 10 : i32, message = "bqk,bkd->bqd"}> : () -> ()
    %cst_107 = arith.constant dense<0.000000e+00> : vector<2x1x32xf32>
    %257 = tpu.matmul %256, %1, %cst_107 {dimension_numbers = #tpu.dot_dimension_numbers<[2], [1], [1], [2], [0, 0, 0, 1, 1, 2], [0], [0]>} : vector<2x1x8xbf16>, vector<2x8x32xbf16>, vector<2x1x32xf32> -> vector<2x1x32xf32>
    "tpu.trace_stop"() : () -> ()
    %258 = vector.shape_cast %257 : vector<2x1x32xf32> to vector<2x32xf32>
    %259 = arith.truncf %221 : vector<2x32xf32> to vector<2x32xbf16>
    %cst_108 = arith.constant dense<0.000000e+00> : vector<2x32xf32>
    %260 = tpu.matmul %259, %44, %cst_108 {dimension_numbers = #tpu.dot_dimension_numbers<[1], [0], [0], [1], [0, 0, 1, 1], [], []>} : vector<2x32xbf16>, vector<32x32xbf16>, vector<2x32xf32> -> vector<2x32xf32>
    %261 = vector.broadcast %45 : vector<1x32xf32> to vector<2x32xf32>
    %262 = arith.addf %260, %261 : vector<2x32xf32>
    %263 = arith.truncf %262 : vector<2x32xf32> to vector<2x32xbf16>
    %264 = vector.shape_cast %263 : vector<2x32xbf16> to vector<2x1x32xbf16>
    %265 = vector.broadcast %264 : vector<2x1x32xbf16> to vector<2x16x32xbf16>
    %266 = arith.mulf %32, %265 : vector<2x16x32xbf16>
    %267 = vector.shape_cast %266 : vector<2x16x32xbf16> to vector<32x32xbf16>
    %cst_109 = arith.constant dense<0.000000e+00> : vector<32x32xf32>
    %268 = tpu.matmul %267, %46, %cst_109 {dimension_numbers = #tpu.dot_dimension_numbers<[1], [0], [0], [1], [0, 0, 1, 1], [], []>} : vector<32x32xbf16>, vector<32x32xbf16>, vector<32x32xf32> -> vector<32x32xf32>
    %269 = arith.extf %31 : vector<32x32xbf16> to vector<32x32xf32>
    %270 = arith.addf %268, %269 : vector<32x32xf32>
    %271 = vector.shape_cast %270 : vector<32x32xf32> to vector<2x16x32xf32>
    %cst_110 = arith.constant 0.000000e+00 : f32
    %272 = vector.broadcast %cst_110 : f32 to vector<2x16x32xf32>
    %273 = arith.cmpf ogt, %271, %272 : vector<2x16x32xf32>
    %cst_111 = arith.constant 0.000000e+00 : f32
    %274 = vector.broadcast %cst_111 : f32 to vector<2x16x32xf32>
    %275 = arith.minimumf %271, %274 : vector<2x16x32xf32>
    %276 = math.exp %275 : vector<2x16x32xf32>
    %cst_112 = arith.constant 1.000000e+00 : f32
    %277 = vector.broadcast %cst_112 : f32 to vector<2x16x32xf32>
    %278 = arith.subf %276, %277 : vector<2x16x32xf32>
    %279 = arith.select %273, %271, %278 : vector<2x16x32xi1>, vector<2x16x32xf32>
    %280 = vector.broadcast %257 : vector<2x1x32xf32> to vector<2x16x32xf32>
    %281 = arith.mulf %279, %280 : vector<2x16x32xf32>
    %cst_113 = arith.constant 0.000000e+00 : f32
    %282 = vector.broadcast %cst_113 : f32 to vector<2x16x32xf32>
    %283 = arith.cmpf ogt, %281, %282 : vector<2x16x32xf32>
    %cst_114 = arith.constant 0.000000e+00 : f32
    %284 = vector.broadcast %cst_114 : f32 to vector<2x16x32xf32>
    %285 = arith.minimumf %281, %284 : vector<2x16x32xf32>
    %286 = math.exp %285 : vector<2x16x32xf32>
    %cst_115 = arith.constant 1.000000e+00 : f32
    %287 = vector.broadcast %cst_115 : f32 to vector<2x16x32xf32>
    %288 = arith.subf %286, %287 : vector<2x16x32xf32>
    %289 = arith.select %283, %281, %288 : vector<2x16x32xi1>, vector<2x16x32xf32>
    %290 = arith.truncf %289 : vector<2x16x32xf32> to vector<2x16x32xbf16>
    "tpu.trace_start"() <{level = 10 : i32, message = "bqd,bkd->bqk"}> : () -> ()
    %cst_116 = arith.constant dense<0.000000e+00> : vector<2x1x16xf32>
    %291 = tpu.matmul %38, %290, %cst_116 {dimension_numbers = #tpu.dot_dimension_numbers<[2], [2], [1], [1], [0, 0, 0, 1, 1, 1], [0], [0]>} : vector<2x1x32xbf16>, vector<2x16x32xbf16>, vector<2x1x16xf32> -> vector<2x1x16xf32>
    "tpu.trace_stop"() : () -> ()
    %292 = vector.shape_cast %40 : vector<1x1xf32> to vector<1x1x1xf32>
    %293 = vector.broadcast %292 : vector<1x1x1xf32> to vector<2x1x16xf32>
    %294 = arith.addf %291, %293 : vector<2x1x16xf32>
    %cst_117 = arith.constant dense<0xFF800000> : vector<2x1xf32>
    %295 = vector.multi_reduction <maximumf>, %294, %cst_117 [2] : vector<2x1x16xf32> to vector<2x1xf32>
    %296 = vector.shape_cast %295 : vector<2x1xf32> to vector<2x1x1xf32>
    %297 = vector.broadcast %296 : vector<2x1x1xf32> to vector<2x1x16xf32>
    %298 = arith.subf %294, %297 : vector<2x1x16xf32>
    %299 = math.exp %298 : vector<2x1x16xf32>
    %cst_118 = arith.constant dense<0.000000e+00> : vector<2x1xf32>
    %300 = vector.multi_reduction <add>, %299, %cst_118 [2] : vector<2x1x16xf32> to vector<2x1xf32>
    %301 = vector.shape_cast %300 : vector<2x1xf32> to vector<2x1x1xf32>
    %302 = tpu.reciprocal %301 {approx = true} : vector<2x1x1xf32> -> vector<2x1x1xf32>
    %303 = vector.broadcast %302 : vector<2x1x1xf32> to vector<2x1x16xf32>
    %304 = arith.mulf %299, %303 : vector<2x1x16xf32>
    %305 = arith.truncf %304 : vector<2x1x16xf32> to vector<2x1x16xbf16>
    "tpu.trace_start"() <{level = 10 : i32, message = "bqk,bkd->bqd"}> : () -> ()
    %cst_119 = arith.constant dense<0.000000e+00> : vector<2x1x32xf32>
    %306 = tpu.matmul %305, %2, %cst_119 {dimension_numbers = #tpu.dot_dimension_numbers<[2], [1], [1], [2], [0, 0, 0, 1, 1, 2], [0], [0]>} : vector<2x1x16xbf16>, vector<2x16x32xbf16>, vector<2x1x32xf32> -> vector<2x1x32xf32>
    "tpu.trace_stop"() : () -> ()
    %307 = vector.shape_cast %306 : vector<2x1x32xf32> to vector<2x32xf32>
    %c3 = arith.constant 3 : index
    %c0_120 = arith.constant 0 : index
    %c0_121 = arith.constant 0 : index
    %308 = vector.load %arg7[%c3, %c0_120, %c0_121] : memref<4x32x32xbf16, #tpu.memory_space<vmem>>, vector<1x32x32xbf16>
    %309 = vector.shape_cast %308 : vector<1x32x32xbf16> to vector<32x32xbf16>
    %cst_122 = arith.constant dense<0.000000e+00> : vector<2x32xf32>
    %310 = tpu.matmul %18, %309, %cst_122 {dimension_numbers = #tpu.dot_dimension_numbers<[1], [0], [0], [1], [0, 0, 1, 1], [], []>} : vector<2x32xbf16>, vector<32x32xbf16>, vector<2x32xf32> -> vector<2x32xf32>
    %c3_123 = arith.constant 3 : index
    %c0_124 = arith.constant 0 : index
    %c0_125 = arith.constant 0 : index
    %311 = vector.load %arg8[%c3_123, %c0_124, %c0_125] : memref<4x1x32xf32, #tpu.memory_space<vmem>>, vector<1x1x32xf32>
    %312 = vector.shape_cast %311 : vector<1x1x32xf32> to vector<1x32xf32>
    %313 = vector.broadcast %312 : vector<1x32xf32> to vector<2x32xf32>
    %314 = arith.addf %310, %313 : vector<2x32xf32>
    %315 = arith.truncf %258 : vector<2x32xf32> to vector<2x32xbf16>
    %cst_126 = arith.constant dense<0.000000e+00> : vector<2x32xf32>
    %316 = tpu.matmul %315, %41, %cst_126 {dimension_numbers = #tpu.dot_dimension_numbers<[1], [0], [0], [1], [0, 0, 1, 1], [], []>} : vector<2x32xbf16>, vector<32x32xbf16>, vector<2x32xf32> -> vector<2x32xf32>
    %317 = arith.truncf %314 : vector<2x32xf32> to vector<2x32xbf16>
    %cst_127 = arith.constant dense<0.000000e+00> : vector<2x32xf32>
    %318 = tpu.matmul %317, %42, %cst_127 {dimension_numbers = #tpu.dot_dimension_numbers<[1], [0], [0], [1], [0, 0, 1, 1], [], []>} : vector<2x32xbf16>, vector<32x32xbf16>, vector<2x32xf32> -> vector<2x32xf32>
    %319 = arith.addf %316, %318 : vector<2x32xf32>
    %320 = vector.broadcast %43 : vector<1x32xf32> to vector<2x32xf32>
    %321 = arith.addf %319, %320 : vector<2x32xf32>
    %322 = math.tanh %321 : vector<2x32xf32>
    %323 = vector.broadcast %33 : vector<1x32xf32> to vector<2x32xf32>
    %324 = arith.mulf %322, %323 : vector<2x32xf32>
    %325 = vector.shape_cast %324 : vector<2x32xf32> to vector<2x1x32xf32>
    %326 = arith.truncf %325 : vector<2x1x32xf32> to vector<2x1x32xbf16>
    "tpu.trace_start"() <{level = 10 : i32, message = "bqd,bkd->bqk"}> : () -> ()
    %cst_128 = arith.constant dense<0.000000e+00> : vector<2x1x8xf32>
    %327 = tpu.matmul %326, %1, %cst_128 {dimension_numbers = #tpu.dot_dimension_numbers<[2], [2], [1], [1], [0, 0, 0, 1, 1, 1], [0], [0]>} : vector<2x1x32xbf16>, vector<2x8x32xbf16>, vector<2x1x8xf32> -> vector<2x1x8xf32>
    "tpu.trace_stop"() : () -> ()
    %328 = vector.shape_cast %39 : vector<1x1xf32> to vector<1x1x1xf32>
    %329 = vector.broadcast %328 : vector<1x1x1xf32> to vector<2x1x8xf32>
    %330 = arith.addf %327, %329 : vector<2x1x8xf32>
    %331 = arith.addf %330, %10 : vector<2x1x8xf32>
    %cst_129 = arith.constant dense<0xFF800000> : vector<2x1xf32>
    %332 = vector.multi_reduction <maximumf>, %331, %cst_129 [2] : vector<2x1x8xf32> to vector<2x1xf32>
    %333 = vector.shape_cast %332 : vector<2x1xf32> to vector<2x1x1xf32>
    %334 = vector.broadcast %333 : vector<2x1x1xf32> to vector<2x1x8xf32>
    %335 = arith.subf %331, %334 : vector<2x1x8xf32>
    %336 = math.exp %335 : vector<2x1x8xf32>
    %cst_130 = arith.constant dense<0.000000e+00> : vector<2x1xf32>
    %337 = vector.multi_reduction <add>, %336, %cst_130 [2] : vector<2x1x8xf32> to vector<2x1xf32>
    %338 = vector.shape_cast %337 : vector<2x1xf32> to vector<2x1x1xf32>
    %339 = tpu.reciprocal %338 {approx = true} : vector<2x1x1xf32> -> vector<2x1x1xf32>
    %340 = vector.broadcast %339 : vector<2x1x1xf32> to vector<2x1x8xf32>
    %341 = arith.mulf %336, %340 : vector<2x1x8xf32>
    %342 = arith.truncf %341 : vector<2x1x8xf32> to vector<2x1x8xbf16>
    "tpu.trace_start"() <{level = 10 : i32, message = "bqk,bkd->bqd"}> : () -> ()
    %cst_131 = arith.constant dense<0.000000e+00> : vector<2x1x32xf32>
    %343 = tpu.matmul %342, %1, %cst_131 {dimension_numbers = #tpu.dot_dimension_numbers<[2], [1], [1], [2], [0, 0, 0, 1, 1, 2], [0], [0]>} : vector<2x1x8xbf16>, vector<2x8x32xbf16>, vector<2x1x32xf32> -> vector<2x1x32xf32>
    "tpu.trace_stop"() : () -> ()
    %344 = arith.truncf %307 : vector<2x32xf32> to vector<2x32xbf16>
    %cst_132 = arith.constant dense<0.000000e+00> : vector<2x32xf32>
    %345 = tpu.matmul %344, %44, %cst_132 {dimension_numbers = #tpu.dot_dimension_numbers<[1], [0], [0], [1], [0, 0, 1, 1], [], []>} : vector<2x32xbf16>, vector<32x32xbf16>, vector<2x32xf32> -> vector<2x32xf32>
    %346 = vector.broadcast %45 : vector<1x32xf32> to vector<2x32xf32>
    %347 = arith.addf %345, %346 : vector<2x32xf32>
    %348 = arith.truncf %347 : vector<2x32xf32> to vector<2x32xbf16>
    %349 = vector.shape_cast %348 : vector<2x32xbf16> to vector<2x1x32xbf16>
    %350 = vector.broadcast %349 : vector<2x1x32xbf16> to vector<2x16x32xbf16>
    %351 = arith.mulf %32, %350 : vector<2x16x32xbf16>
    %352 = vector.shape_cast %351 : vector<2x16x32xbf16> to vector<32x32xbf16>
    %cst_133 = arith.constant dense<0.000000e+00> : vector<32x32xf32>
    %353 = tpu.matmul %352, %46, %cst_133 {dimension_numbers = #tpu.dot_dimension_numbers<[1], [0], [0], [1], [0, 0, 1, 1], [], []>} : vector<32x32xbf16>, vector<32x32xbf16>, vector<32x32xf32> -> vector<32x32xf32>
    %354 = arith.extf %31 : vector<32x32xbf16> to vector<32x32xf32>
    %355 = arith.addf %353, %354 : vector<32x32xf32>
    %356 = vector.shape_cast %355 : vector<32x32xf32> to vector<2x16x32xf32>
    %cst_134 = arith.constant 0.000000e+00 : f32
    %357 = vector.broadcast %cst_134 : f32 to vector<2x16x32xf32>
    %358 = arith.cmpf ogt, %356, %357 : vector<2x16x32xf32>
    %cst_135 = arith.constant 0.000000e+00 : f32
    %359 = vector.broadcast %cst_135 : f32 to vector<2x16x32xf32>
    %360 = arith.minimumf %356, %359 : vector<2x16x32xf32>
    %361 = math.exp %360 : vector<2x16x32xf32>
    %cst_136 = arith.constant 1.000000e+00 : f32
    %362 = vector.broadcast %cst_136 : f32 to vector<2x16x32xf32>
    %363 = arith.subf %361, %362 : vector<2x16x32xf32>
    %364 = arith.select %358, %356, %363 : vector<2x16x32xi1>, vector<2x16x32xf32>
    %365 = vector.broadcast %343 : vector<2x1x32xf32> to vector<2x16x32xf32>
    %366 = arith.mulf %364, %365 : vector<2x16x32xf32>
    %cst_137 = arith.constant 0.000000e+00 : f32
    %367 = vector.broadcast %cst_137 : f32 to vector<2x16x32xf32>
    %368 = arith.cmpf ogt, %366, %367 : vector<2x16x32xf32>
    %cst_138 = arith.constant 0.000000e+00 : f32
    %369 = vector.broadcast %cst_138 : f32 to vector<2x16x32xf32>
    %370 = arith.minimumf %366, %369 : vector<2x16x32xf32>
    %371 = math.exp %370 : vector<2x16x32xf32>
    %cst_139 = arith.constant 1.000000e+00 : f32
    %372 = vector.broadcast %cst_139 : f32 to vector<2x16x32xf32>
    %373 = arith.subf %371, %372 : vector<2x16x32xf32>
    %374 = arith.select %368, %366, %373 : vector<2x16x32xi1>, vector<2x16x32xf32>
    %375 = arith.truncf %374 : vector<2x16x32xf32> to vector<2x16x32xbf16>
    "tpu.trace_start"() <{level = 10 : i32, message = "bqd,bkd->bqk"}> : () -> ()
    %cst_140 = arith.constant dense<0.000000e+00> : vector<2x1x16xf32>
    %376 = tpu.matmul %38, %375, %cst_140 {dimension_numbers = #tpu.dot_dimension_numbers<[2], [2], [1], [1], [0, 0, 0, 1, 1, 1], [0], [0]>} : vector<2x1x32xbf16>, vector<2x16x32xbf16>, vector<2x1x16xf32> -> vector<2x1x16xf32>
    "tpu.trace_stop"() : () -> ()
    %377 = vector.shape_cast %40 : vector<1x1xf32> to vector<1x1x1xf32>
    %378 = vector.broadcast %377 : vector<1x1x1xf32> to vector<2x1x16xf32>
    %379 = arith.addf %376, %378 : vector<2x1x16xf32>
    %cst_141 = arith.constant dense<0xFF800000> : vector<2x1xf32>
    %380 = vector.multi_reduction <maximumf>, %379, %cst_141 [2] : vector<2x1x16xf32> to vector<2x1xf32>
    %381 = vector.shape_cast %380 : vector<2x1xf32> to vector<2x1x1xf32>
    %382 = vector.broadcast %381 : vector<2x1x1xf32> to vector<2x1x16xf32>
    %383 = arith.subf %379, %382 : vector<2x1x16xf32>
    %384 = math.exp %383 : vector<2x1x16xf32>
    %cst_142 = arith.constant dense<0.000000e+00> : vector<2x1xf32>
    %385 = vector.multi_reduction <add>, %384, %cst_142 [2] : vector<2x1x16xf32> to vector<2x1xf32>
    %386 = vector.shape_cast %385 : vector<2x1xf32> to vector<2x1x1xf32>
    %387 = tpu.reciprocal %386 {approx = true} : vector<2x1x1xf32> -> vector<2x1x1xf32>
    %388 = vector.broadcast %387 : vector<2x1x1xf32> to vector<2x1x16xf32>
    %389 = arith.mulf %384, %388 : vector<2x1x16xf32>
    %390 = arith.truncf %389 : vector<2x1x16xf32> to vector<2x1x16xbf16>
    "tpu.trace_start"() <{level = 10 : i32, message = "bqk,bkd->bqd"}> : () -> ()
    %cst_143 = arith.constant dense<0.000000e+00> : vector<2x1x32xf32>
    %391 = tpu.matmul %390, %2, %cst_143 {dimension_numbers = #tpu.dot_dimension_numbers<[2], [1], [1], [2], [0, 0, 0, 1, 1, 2], [0], [0]>} : vector<2x1x16xbf16>, vector<2x16x32xbf16>, vector<2x1x32xf32> -> vector<2x1x32xf32>
    "tpu.trace_stop"() : () -> ()
    %392 = vector.shape_cast %391 : vector<2x1x32xf32> to vector<2x32xf32>
    %c0_144 = arith.constant 0 : index
    %c0_145 = arith.constant 0 : index
    %393 = vector.load %arg24[%c0_144, %c0_145] : memref<2x32xf32, #tpu.memory_space<vmem>>, vector<2x32xf32>
    tpu.vector_store %arg24[%c0_144, %c0_145], %392 {strides = array<i32>} : memref<2x32xf32, #tpu.memory_space<vmem>>, vector<2x32xf32>,
    return
  }
  func.func @transform_0(%arg0: i32) -> (i32, i32) {
    %c0_i32 = arith.constant 0 : i32
    %c0_i32_0 = arith.constant 0 : i32
    return %arg0, %c0_i32 : i32, i32
  }
  func.func @transform_1(%arg0: i32) -> (i32, i32, i32) {
    %c0_i32 = arith.constant 0 : i32
    %c0_i32_0 = arith.constant 0 : i32
    %c0_i32_1 = arith.constant 0 : i32
    return %arg0, %c0_i32, %c0_i32_0 : i32, i32, i32
  }
  func.func @transform_2(%arg0: i32) -> (i32, i32, i32) {
    %c0_i32 = arith.constant 0 : i32
    %c0_i32_0 = arith.constant 0 : i32
    %c0_i32_1 = arith.constant 0 : i32
    return %arg0, %c0_i32, %c0_i32_0 : i32, i32, i32
  }
  func.func @transform_3(%arg0: i32) -> (i32, i32) {
    %c0_i32 = arith.constant 0 : i32
    %c0_i32_0 = arith.constant 0 : i32
    return %arg0, %c0_i32 : i32, i32
  }
  func.func @transform_4(%arg0: i32) -> (i32, i32) {
    %c0_i32 = arith.constant 0 : i32
    %c0_i32_0 = arith.constant 0 : i32
    %c0_i32_1 = arith.constant 0 : i32
    return %c0_i32, %c0_i32_0 : i32, i32
  }
  func.func @transform_5(%arg0: i32) -> (i32, i32) {
    %c0_i32 = arith.constant 0 : i32
    %c0_i32_0 = arith.constant 0 : i32
    %c0_i32_1 = arith.constant 0 : i32
    return %c0_i32, %c0_i32_0 : i32, i32
  }
  func.func @transform_6(%arg0: i32) -> (i32, i32, i32) {
    %c0_i32 = arith.constant 0 : i32
    %c0_i32_0 = arith.constant 0 : i32
    %c0_i32_1 = arith.constant 0 : i32
    %c0_i32_2 = arith.constant 0 : i32
    return %c0_i32, %c0_i32_0, %c0_i32_1 : i32, i32, i32
  }
  func.func @transform_7(%arg0: i32) -> (i32, i32, i32) {
    %c0_i32 = arith.constant 0 : i32
    %c0_i32_0 = arith.constant 0 : i32
    %c0_i32_1 = arith.constant 0 : i32
    %c0_i32_2 = arith.constant 0 : i32
    return %c0_i32, %c0_i32_0, %c0_i32_1 : i32, i32, i32
  }
  func.func @transform_8(%arg0: i32) -> (i32, i32) {
    %c0_i32 = arith.constant 0 : i32
    %c0_i32_0 = arith.constant 0 : i32
    %c0_i32_1 = arith.constant 0 : i32
    return %c0_i32, %c0_i32_0 : i32, i32
  }
  func.func @transform_9(%arg0: i32) -> (i32, i32) {
    %c0_i32 = arith.constant 0 : i32
    %c0_i32_0 = arith.constant 0 : i32
    %c0_i32_1 = arith.constant 0 : i32
    return %c0_i32, %c0_i32_0 : i32, i32
  }
  func.func @transform_10(%arg0: i32) -> (i32, i32) {
    %c0_i32 = arith.constant 0 : i32
    %c0_i32_0 = arith.constant 0 : i32
    %c0_i32_1 = arith.constant 0 : i32
    return %c0_i32, %c0_i32_0 : i32, i32
  }
  func.func @transform_11(%arg0: i32) -> (i32, i32) {
    %c0_i32 = arith.constant 0 : i32
    %c0_i32_0 = arith.constant 0 : i32
    %c0_i32_1 = arith.constant 0 : i32
    return %c0_i32, %c0_i32_0 : i32, i32
  }
  func.func @transform_12(%arg0: i32) -> (i32, i32) {
    %c0_i32 = arith.constant 0 : i32
    %c0_i32_0 = arith.constant 0 : i32
    %c0_i32_1 = arith.constant 0 : i32
    return %c0_i32, %c0_i32_0 : i32, i32
  }
  func.func @transform_13(%arg0: i32) -> (i32, i32) {
    %c0_i32 = arith.constant 0 : i32
    %c0_i32_0 = arith.constant 0 : i32
    %c0_i32_1 = arith.constant 0 : i32
    return %c0_i32, %c0_i32_0 : i32, i32
  }
  func.func @transform_14(%arg0: i32) -> (i32, i32) {
    %c0_i32 = arith.constant 0 : i32
    %c0_i32_0 = arith.constant 0 : i32
    %c0_i32_1 = arith.constant 0 : i32
    return %c0_i32, %c0_i32_0 : i32, i32
  }
  func.func @transform_15(%arg0: i32) -> (i32, i32) {
    %c0_i32 = arith.constant 0 : i32
    %c0_i32_0 = arith.constant 0 : i32
    %c0_i32_1 = arith.constant 0 : i32
    return %c0_i32, %c0_i32_0 : i32, i32
  }
  func.func @transform_16(%arg0: i32) -> (i32, i32) {
    %c0_i32 = arith.constant 0 : i32
    %c0_i32_0 = arith.constant 0 : i32
    %c0_i32_1 = arith.constant 0 : i32
    return %c0_i32, %c0_i32_0 : i32, i32
  }
  func.func @transform_17(%arg0: i32) -> (i32, i32) {
    %c0_i32 = arith.constant 0 : i32
    %c0_i32_0 = arith.constant 0 : i32
    %c0_i32_1 = arith.constant 0 : i32
    return %c0_i32, %c0_i32_0 : i32, i32
  }
  func.func @transform_18(%arg0: i32) -> (i32, i32) {
    %c0_i32 = arith.constant 0 : i32
    %c0_i32_0 = arith.constant 0 : i32
    %c0_i32_1 = arith.constant 0 : i32
    return %c0_i32, %c0_i32_0 : i32, i32
  }
  func.func @transform_19(%arg0: i32) -> (i32, i32) {
    %c0_i32 = arith.constant 0 : i32
    %c0_i32_0 = arith.constant 0 : i32
    %c0_i32_1 = arith.constant 0 : i32
    return %c0_i32, %c0_i32_0 : i32, i32
  }
  func.func @transform_20(%arg0: i32) -> (i32, i32) {
    %c0_i32 = arith.constant 0 : i32
    %c0_i32_0 = arith.constant 0 : i32
    %c0_i32_1 = arith.constant 0 : i32
    return %c0_i32, %c0_i32_0 : i32, i32
  }
  func.func @transform_21(%arg0: i32) -> (i32, i32) {
    %c0_i32 = arith.constant 0 : i32
    %c0_i32_0 = arith.constant 0 : i32
    %c0_i32_1 = arith.constant 0 : i32
    return %c0_i32, %c0_i32_0 : i32, i32
  }
  func.func @transform_22(%arg0: i32) -> (i32, i32) {
    %c0_i32 = arith.constant 0 : i32
    %c0_i32_0 = arith.constant 0 : i32
    %c0_i32_1 = arith.constant 0 : i32
    return %c0_i32, %c0_i32_0 : i32, i32
  }
  func.func @transform_23(%arg0: i32) -> (i32, i32) {
    %c0_i32 = arith.constant 0 : i32
    %c0_i32_0 = arith.constant 0 : i32
    return %arg0, %c0_i32 : i32, i32
  }
}

</mosaic_0001>

<bundles_post_ra>
// kernel: mac_unit_forward.1
= control target key start
LH: loop header
LB: loop body
LE: loop exit
PB: predicated region body
PF: predicated region fallthrough
CT: control target
= control target key end

     0   :  { %s5491_s0 = inlined_call_operand.vmem [shape: f32[2,32], index: 0, kind: input, shape index: {}]   ;;  %s5492_s1 = inlined_call_operand.vmem [shape: bf16[2,8,32], index: 1, kind: input, shape index: {}]   ;;  %s5493_s2 = inlined_call_operand.vmem [shape: bf16[2,16,32], index: 2, kind: input, shape index: {}]   ;;  %s5494_s3 = inlined_call_operand.vmem [shape: s32[2,1], index: 3, kind: input, shape index: {}]   ;;  %s5495_s4 = inlined_call_operand.vmem [shape: bf16[32,32], index: 4, kind: input, shape index: {}]   ;;  %s5496_s5 = inlined_call_operand.vmem [shape: f32[1,32], index: 5, kind: input, shape index: {}]   ;;  %s5497_s6 = inlined_call_operand.vmem [shape: bf16[4,32,32], index: 6, kind: input, shape index: {}]   ;;  %s5498_s7 = inlined_call_operand.vmem [shape: f32[4,1,32], index: 7, kind: input, shape index: {}]   ;;  %s5499_s8 = inlined_call_operand.vmem [shape: bf16[32,32], index: 8, kind: input, shape index: {}]   ;;  %s5500_s9 = inlined_call_operand.vmem [shape: bf16[32,32], index: 9, kind: input, shape index: {}]   ;;  %s5501_s10 = inlined_call_operand.vmem [shape: f32[1,32], index: 10, kind: input, shape index: {}]   ;;  %s5502_s11 = inlined_call_operand.vmem [shape: f32[1,32], index: 11, kind: input, shape index: {}]   ;;  %s5503_s12 = inlined_call_operand.<no memory space> [shape: f32[1,1], index: 12, kind: input, shape index: {}]   ;;  %s5504_s13 = inlined_call_operand.vmem [shape: bf16[32,32], index: 13, kind: input, shape index: {}]   ;;  %s5505_s14 = inlined_call_operand.vmem [shape: f32[1,32], index: 14, kind: input, shape index: {}]   ;;  %s5506_s15 = inlined_call_operand.vmem [shape: bf16[32,32], index: 15, kind: input, shape index: {}]   ;;  %s5507_s16 = inlined_call_operand.vmem [shape: f32[1,32], index: 16, kind: input, shape index: {}]   ;;  %s5508_s17 = inlined_call_operand.vmem [shape: bf16[32,32], index: 17, kind: input, shape index: {}]   ;;  %s5509_s18 = inlined_call_operand.vmem [shape: bf16[32,32], index: 18, kind: input, shape index: {}]   ;;  %s5510_s19 = inlined_call_operand.vmem [shape: f32[1,32], index: 19, kind: input, shape index: {}]   ;;  %s5511_s20 = inlined_call_operand.vmem [shape: f32[1,32], index: 20, kind: input, shape index: {}]   ;;  %s5512_s22 = inlined_call_operand.vmem [shape: f32[1,32], index: 22, kind: input, shape index: {}]   ;;  %s5513_s23 = inlined_call_operand.hbm [shape: f32[2,32], index: 23, kind: output, shape index: {}]   ;;  %s5514_s21 = inlined_call_operand.<no memory space> [shape: f32[1,1], index: 21, kind: input, shape index: {}]  }
   0x1   :  { %5520 = sst [smem:[#allocation7_spill]] %s5491_s0  ;;  %v28_v0 = vstv %s5503_s12  ;;  %v30_v1 = vstv %s5514_s21 }
   0x2   :  { %5521 = sst [smem:[#allocation8_spill]] %s5492_s1  ;;  %29 = vst [vmem:[#allocation2] sm:$0x1] %v28_v0  ;;  %31 = vst [vmem:[#allocation3] sm:$0x1] %v30_v1 }
   0x3   :  { %5522 = sst [smem:[#allocation9_spill]] %s5493_s2 }
   0x4   :  { %5523 = sst [smem:[#allocation10_spill]] %s5494_s3 }
   0x5   :  { %5524 = sst [smem:[#allocation11_spill]] %s5495_s4 }
   0x6   :  { %5525 = sst [smem:[#allocation12_spill]] %s5496_s5 }
   0x7   :  { %5526 = sst [smem:[#allocation13_spill]] %s5497_s6 }
   0x8   :  { %5527 = sst [smem:[#allocation14_spill]] %s5498_s7 }
   0x9   :  { %s5528_s26 = sld [smem:[#allocation11_spill]]  ;;  %v4575_v3 = vmov 0.0   ;;  %vm4576_vm0 = vmmov 0   ;;  %s5529_s27 = sld [smem:[#allocation7_spill]]  ;;  %v4376_v6 = vld [vmem:[%s5504_s13] sm:$0xff]   ;;  %v4377_v7 = vld [vmem:[%s5504_s13 + $0x8] sm:$0xff]  }
   0xa   :  { %3990 = vmatprep.subr.bf16.mxu0 %v4575_v3  ;;  %3994 = vmatprep.mubr.msk.bf16.mxu0 %vm4576_vm0, %v4575_v3  ;;  %s5530_s30 = sld [smem:[#allocation9_spill]]  ;;  %vm154_vm1 = vcmask 261120  }
   0xb   :  { %3998 = vmatprep.subr.bf16.mxu1 %v4376_v6 }
   0xc   :  { %3999 = vmatpush3.bf16.msra.mxu1 %v4376_v6 }
   0xd   :  { %4000 = vmatprep.subr.bf16.mxu1 %v4377_v7 }
   0xf   :  { %v4374_v2 = vld [vmem:[%s5528_s26] sm:$0xff]   ;;  %v4375_v4 = vld [vmem:[%s5528_s26 + $0x8] sm:$0xff]  }
  0x10   :  { %3991 = vmatpush3.bf16.msra.mxu0 %v4374_v2  ;;  %v80_v5 = vld [vmem:[%s5529_s27] sm:$0x3]  ;;  %v4734_v10 = vld [vmem:[%s5530_s30 + $0x8] sm:$0xff]   ;;  %4001 = vmatpush3.bf16.msra.mxu1 %v4377_v7 }
  0x11   :  { %3992 = vmatprep.subr.bf16.mxu0 %v4575_v3  ;;  %v130_v8 = vpack.c.bf16 %v80_v5, %v80_v5  ;;  %v4729_v9 = vld [vmem:[%s5530_s30] sm:$0xff]   ;;  %4014 = vmatprep.subr.bf16.mxu1 %v4575_v3 }
  0x12   :  { %4002 = vmatprep.mubr.msk.bf16.mxu1 %vm154_vm1, %v4729_v9 }
  0x13   :  { %4003 = vmatmul.mubr.msk.bf16.vlgmr.msra.gmra.mrb[0].mxu1 %vm154_vm1, %v4734_v10 }
  0x14   :  { %3993 = vmatpush3.bf16.msra.mxu0 %v4375_v4  ;;  %4018 = vmatprep.mubr.msk.bf16.mxu1 %vm4576_vm0, %v4575_v3 }
  0x17   :  { %3995 = vmatmul.mubr.msk.bf16.vlgmr.msra.gmra.mrb[0].mxu0 %vm154_vm1, %v130_v8 }
  0x18   :  { %32 = vsyncpa [#allocation5], 0  ;;  %s5531_s1 = sld [smem:[#allocation13_spill]]  ;;  %v4382_v13 = vld [vmem:[%s5509_s18] sm:$0xff]   ;;  %v4383_v14 = vld [vmem:[%s5509_s18 + $0x8] sm:$0xff]   ;;  %s5532_s29 = sld [smem:[#allocation12_spill]]  ;;  %v87_v0 = vlaneseq }
  0x19   :  { %4006 = vmatprep.subr.bf16.mxu0 %v4382_v13  ;;  %v3708_v19 = vld [vmem:[%s5505_s14] ss:$0 sm:$0xff]  ;;  %v4795_v36 = vld [vmem:[%s5499_s8 + $0x8] sm:$0xff]   ;;  %s5533_s27 = sld [smem:[#allocation14_spill]]  ;;  %s5534_s28 = sld [smem:[#allocation8_spill]]  ;;  %vm719_vm4 = vcmask 57344  }
  0x1a   :  { %4007 = vmatpush3.bf16.msra.mxu0 %v4382_v13  ;;  %v4772_v32 = vld [vmem:[%s5500_s9] sm:$0xff]   ;;  %v4808_v37 = vld [vmem:[%s5500_s9 + $0x8] sm:$0xff]   ;;  %v4577_v1 = vmov 1966171168   ;;  %v102_v5 = vshrl.u32 %v87_v0, 7  ;;  %s5535_s4 = sld [smem:[#allocation10_spill]] }
  0x1b   :  { %4008 = vmatprep.subr.bf16.mxu0 %v4383_v14  ;;  %v4781_v34 = vld [vmem:[%s5499_s8] sm:$0xff]   ;;  %v99_v2 = vunpack.c.l.s4 %v4577_v1  ;;  %vm748_vm5 = vcmask 1043456   ;;  %vm744_vm6 = vcmask 64512   ;;  %vm1403_vm7 = vcmask 1041409  }
  0x1c   :  { %v3715_v38 = vld [vmem:[%s5510_s19] ss:$0 sm:$0xff] }
  0x1d   :  { %v100_v4 = vunpack.c.0.s8 %v99_v2  ;;  %v373_v13 = vld [vmem:[#allocation2] sm:$0x1] }
  0x1e   :  { %v4380_v11 = vld [vmem:[%s5531_s1] sm:$0xff]   ;;  %v4381_v12 = vld [vmem:[%s5531_s1 + $0x8] sm:$0xff]   ;;  %4009 = vmatpush3.bf16.msra.mxu0 %v4383_v14 }
  0x1f   :  { %4015 = vmatpush3.bf16.msra.mxu1 %v4380_v11  ;;  %4022 = vmatprep.subr.bf16.mxu0 %v4575_v3  ;;  %v3704_v15 = vld [vmem:[%s5532_s29] ss:$0 sm:$0xff]  ;;  %v4837_v62 = vld [vmem:[%s5534_s28 + $0x4] sm:$0xf]  ;;  %v4847_v6 = vsub.s32 %v100_v4, %v102_v5 }
  0x20   :  { %4016 = vmatprep.subr.bf16.mxu1 %v4575_v3  ;;  %v3721_v42 = vld [vmem:[%s5533_s27] ss:$0 sm:$0xff]  ;;  %v4842_v63 = vsel %vm154_vm1, %v4837_v62, 0 }
  0x21   :  { %v4828_v60 = vld [vmem:[%s5534_s28] sm:$0xf] }
  0x22   :  { %v4832_v61 = vsel %vm154_vm1, %v4828_v60, 0  ;;  %v3703_v7 = vld.sshfl [vmem:[%s5535_s4] sm:$0x11 pattern:$0x75316420] }
  0x23   :  { %4017 = vmatpush3.bf16.msra.mxu1 %v4381_v12  ;;  %v104_v11 = vrot.slane %v3703_v7, %v4847_v6  ;;  %v97_v12 = vcombine.high %v3703_v7, %v3703_v7 }
  0x24   :  { %4030 = vmatprep.subr.bf16.mxu1 %v4575_v3 }
  0x25   :  { %v111_v14 = vrot.slane %v97_v12, %v4847_v6 }
  0xe6   :  { %v4004_v22 = vpop.f32.mrb[0].mxu1 }
  0xe7   :  { %v282_v23 = vadd.f32 %v4004_v22, %v3708_v19  ;;  %v273_v24 = vpop.f32.mrb[1].mxu1  ;;  %v4863_v22 = vld [vmem:[%s5502_s11] ss:$0 sm:$0xff] }
  0xe8   :  { %v274_v25 = vadd.f32 %v3708_v19, %v273_v24  ;;  %v4005_v26 = vpop.f32.mrb[2].mxu1 }
  0xe9   :  { %v285_v27 = vadd.f32 %v4005_v26, %v3708_v19  ;;  %v276_v28 = vpop.f32.mrb[3].mxu1 }
  0xea   :  { %v192_v16 = vpop.f32.mrb[0].mxu0  ;;  %v277_v29 = vadd.f32 %v3708_v19, %v276_v28 }
  0xeb   :  { %v193_v17 = vadd.f32 %v3704_v15, %v192_v16  ;;  %v3996_v18 = vpop.f32.mrb[1].mxu0  ;;  %v4765_v30 = vpack.c.bf16 %v285_v27, %v282_v23  ;;  %v4857_v15 = vld [vmem:[%s5501_s10] ss:$0 sm:$0xff] }
  0xec   :  { %v195_v20 = vpop.f32.mrb[2].mxu0  ;;  %v4767_v31 = vpack.c.bf16 %v277_v29, %v274_v25 }
  0xed   :  { %4398 = vtanh.f32 %v193_v17  ;;  %v3997_v21 = vpop.f32.mrb[3].mxu0 }
  0xee   :  { %4010 = vmatprep.mubr.msk.bf16.mxu0 %vm154_vm1, %v4767_v31 }
  0xef   :  { %4011 = vmatmul.mubr.msk.bf16.vlgmr.msra.gmra.mrb[4].mxu0 %vm154_vm1, %v4765_v30 }
  0xf0   :  { %4023 = vmatpush3.bf16.msra.mxu0 %v4772_v32  ;;  %4026 = vmatprep.mubr.msk.bf16.mxu0 %vm4576_vm0, %v4575_v3 }
  0xf1   :  { %4024 = vmatprep.subr.bf16.mxu0 %v4575_v3 }
  0xf4   :  { %4025 = vmatpush3.bf16.msra.mxu0 %v4808_v37 }
  0xf5   :  { %4038 = vmatprep.subr.bf16.mxu0 %v4575_v3 }
  0xf7   :  { %v4399_v33 = vpop.eup %4398 }
  0xf8   :  { %v4786_v35 = vpack.c.bf16 %v4399_v33, %v4399_v33 }
  0xfa   :  { %4019 = vmatmul.mubr.msk.bf16.vlgmr.msra.gmra.mrb[4].mxu1 %vm154_vm1, %v4786_v35 }
  0xfb   :  { %4031 = vmatpush3.bf16.msra.mxu1 %v4781_v34  ;;  %4034 = vmatprep.mubr.msk.bf16.mxu1 %vm4576_vm0, %v4575_v3 }
  0xfc   :  { %4032 = vmatprep.subr.bf16.mxu1 %v4575_v3 }
  0xff   :  { %4033 = vmatpush3.bf16.msra.mxu1 %v4795_v36 }
 0x100   :  { %4044 = vmatprep.subr.bf16.mxu1 %v4575_v3 }
 0x102   :  { %4035 = vmatmul.mubr.msk.bf16.vlgmr.msra.gmra.mrb[8].mxu1 %vm154_vm1, %v130_v8  ;;  %v4578_v8 = vmov 0  }
 0x103   :  { %4046 = vmatprep.mubr.msk.bf16.mxu1 %vm4576_vm0, %v4575_v3  ;;  %4372 = vset.pattern.permute.xlu0 %v4578_v8 }
 0x104   :  { %4373 = vset.pattern.permute.xlu1 %v4578_v8  ;;  %113 = vperm.xlu0 %4372, %v104_v11  }
 0x108   :  { %4045 = vmatpush3.bf16.xpose.msra.mxu1 %v4842_v63  ;;  %618 = vperm.xlu0 %4372, %v373_v13  }
 0x109   :  { %4056 = vmatprep.subr.bf16.mxu1 %v4575_v3 }
 0x10c   :  { %120 = vperm.xlu0 %4372, %v111_v14   ;;  %v4895_v14 = vsel %vm748_vm5, %v4828_v60, 0 }
 0x1c2   :  { %v4012_v39 = vpop.f32.mrb[4].mxu0 }
 0x1c3   :  { %v362_v40 = vadd.f32 %v4012_v39, %v3715_v38  ;;  %v353_v41 = vpop.f32.mrb[5].mxu0 }
 0x1c4   :  { %v354_v43 = vadd.f32 %v3715_v38, %v353_v41  ;;  %v4013_v44 = vpop.f32.mrb[6].mxu0  ;;  %v88_v41 = vand.u32 127, %v87_v0 }
 0x1c5   :  { %v365_v45 = vadd.f32 %v4013_v44, %v3715_v38  ;;  %v356_v46 = vpop.f32.mrb[7].mxu0  ;;  %v4579_v44 = vmov -1e+30  }
 0x1c6   :  { %v357_v48 = vadd.f32 %v3715_v38, %v356_v46  ;;  %v114_v38 = vpop.permute.xlu0 %113 }
 0x1c7   :  { %v4818_v51 = vpack.c.bf16 %v365_v45, %v362_v40  ;;  %v4875_v40 = vsub.s32 0, %v102_v5 }
 0x1c8   :  { %v4820_v53 = vpack.c.bf16 %v357_v48, %v354_v43 }
 0x1c9   :  { %v118_v46 = vrot.slane %v114_v38, %v4875_v40 }
 0x1ca   :  { %v619_v39 = vpop.permute.xlu0 %618 }
 0x1cb   :  { %vm126_vm3 = vcmp.lt.s32.totalorder %v88_v41, %v118_v46 }
 0x1cd   :  { %v460_v47 = vpop.f32.mrb[4].mxu1 }
 0x1ce   :  { %v461_v49 = vadd.f32 %v3721_v42, %v460_v47  ;;  %v4020_v50 = vpop.f32.mrb[5].mxu1  ;;  %v121_v42 = vpop.permute.xlu0 %120  ;;  %v4882_v47 = vrot.slane %v619_v39, %v4875_v40 }
 0x1cf   :  { %v463_v52 = vpop.f32.mrb[6].mxu1  ;;  %v125_v43 = vrot.slane %v121_v42, %v4875_v40 }
 0x1d0   :  { %v466_v54 = vpack.c.bf16 %v461_v49, %v461_v49  ;;  %v4021_v55 = vpop.f32.mrb[7].mxu1  ;;  %v4885_v52 = vsel %vm126_vm3, 0.0, %v4579_v44  ;;  %vm1199_vm3 = vcmask 130048  }
 0x1d1   :  { %vm127_vm2 = vcmp.lt.s32.totalorder %v88_v41, %v125_v43  ;;  %v4937_v43 = vld [vmem:[%s5508_s17 + $0x8] sm:$0xff]  }
 0x1d2   :  { %4027 = vmatmul.mubr.msk.bf16.vlgmr.msra.gmra.mrb[8].mxu0 %vm154_vm1, %v466_v54  ;;  %v4878_v45 = vsel %vm127_vm2, 0.0, %v4579_v44  ;;  %vm1173_vm2 = vcmask 122880  }
 0x1d3   :  { %4040 = vmatprep.mubr.msk.bf16.mxu0 %vm4576_vm0, %v4575_v3  ;;  %4039 = vmatpush3.bf16.xpose.msra.mxu0 %v4832_v61 }
 0x1d4   :  { %4050 = vmatprep.subr.bf16.mxu0 %v4575_v3 }
 0x1d5   :  { %v568_v56 = vpop.f32.mrb[8].mxu1 }
 0x1d6   :  { %v4036_v57 = vpop.f32.mrb[9].mxu1 }
 0x1d7   :  { %v571_v58 = vpop.f32.mrb[10].mxu1 }
 0x1d8   :  { %v4037_v59 = vpop.f32.mrb[11].mxu1 }
 0x2a5   :  { %v516_v16 = vpop.f32.mrb[8].mxu0 }
 0x2a6   :  { %v569_v17 = vadd.f32 %v568_v56, %v516_v16  ;;  %v4028_v18 = vpop.f32.mrb[9].mxu0 }
 0x2a7   :  { %v519_v19 = vpop.f32.mrb[10].mxu0 }
 0x2a8   :  { %v580_v20 = vadd.f32 %v4857_v15, %v569_v17  ;;  %v4029_v21 = vpop.f32.mrb[11].mxu0 }
 0x2aa   :  { %4400 = vtanh.f32 %v580_v20 }
 0x2b4   :  { %v4401_v23 = vpop.eup %4400 }
 0x2b5   :  { %v588_v24 = vmul.f32 %v4401_v23, %v4863_v22  ;;  %v4902_v23 = vld [vmem:[%s5506_s15] sm:$0xff]  }
 0x2b7   :  { %v596_v25 = vrot.slane %v588_v24, %v4847_v6  ;;  %v4909_v24 = vld [vmem:[%s5506_s15 + $0x8] sm:$0xff]  }
 0x2b9   :  { %v604_v26 = vrot.slane %v596_v25, %v4847_v6  ;;  %v597_v27 = vcombine.high %v596_v25, %v596_v25  ;;  %v3720_v25 = vld [vmem:[%s5512_s22] ss:$0 sm:$0xff] }
 0x2bb   :  { %v614_v28 = vpack.c.bf16 %v604_v26, %v604_v26  ;;  %v611_v29 = vrot.slane %v597_v27, %v4847_v6 }
 0x2bd   :  { %4041 = vmatmul.mubr.msk.bf16.vlgmr.msra.gmra.mrb[12].mxu0 %vm154_vm1, %v614_v28  ;;  %v615_v33 = vpack.c.bf16 %v611_v29, %v611_v29  ;;  %v836_v28 = vpack.c.bf16 %v3720_v25, %v3720_v25  ;;  %v4925_v29 = vsel %vm748_vm5, %v4837_v62, 0 }
 0x2be   :  { %4052 = vmatprep.mubr.msk.bf16.mxu0 %vm4576_vm0, %v4575_v3  ;;  %4051 = vmatpush3.bf16.msra.mxu0 %v4895_v14 }
 0x2bf   :  { %4047 = vmatmul.mubr.msk.bf16.vlgmr.msra.gmra.mrb[12].mxu1 %vm154_vm1, %v615_v33  ;;  %4062 = vmatprep.subr.bf16.mxu0 %v4575_v3  ;;  %v4931_v33 = vld [vmem:[%s5508_s17] sm:$0xff]  }
 0x2c0   :  { %4058 = vmatprep.mubr.msk.bf16.mxu1 %vm4576_vm0, %v4575_v3  ;;  %4057 = vmatpush3.bf16.msra.mxu1 %v4925_v29 }
 0x2c1   :  { %4070 = vmatprep.subr.bf16.mxu1 %v4931_v33 }
 0x390   :  { %v665_v48 = vpop.f32.mrb[12].mxu0 }
 0x391   :  { %v666_v49 = vadd.f32 %v665_v48, %v4882_v47  ;;  %v4042_v50 = vpop.f32.mrb[13].mxu0 }
 0x392   :  { %v668_v54 = vpop.f32.mrb[14].mxu0  ;;  %v711_v55 = vpop.f32.mrb[12].mxu1 }
 0x393   :  { %v4043_v56 = vpop.f32.mrb[15].mxu0  ;;  %v4048_v57 = vpop.f32.mrb[13].mxu1  ;;  %v717_v58 = vadd.f32 %v666_v49, %v4885_v52  ;;  %v712_v7 = vadd.f32 %v711_v55, %v4882_v47  ;;  %v4949_v49 = vld [vmem:[%s5507_s16] ss:$0 sm:$0xff] }
 0x394   :  { %v714_v59 = vpop.f32.mrb[14].mxu1 }
 0x395   :  { %v4049_v0 = vpop.f32.mrb[15].mxu1  ;;  %v720_v1 = vsel %vm719_vm4, %v717_v58, -inf  ;;  %v718_v12 = vadd.f32 %v712_v7, %v4878_v45 }
 0x396   :  { %721 = vmax.xlane.f32.xlu1 %v720_v1 }
 0x397   :  { %v723_v13 = vsel %vm719_vm4, %v718_v12, -inf }
 0x423   :  { %v722_v2 = vpop.xlane.xlu1 %721 }
 0x424   :  { %v726_v4 = vsub.f32 %v717_v58, %v722_v2 }
 0x426   :  { %v728_v5 = vmul.f32 1.442695, %v726_v4 }
 0x428   :  { %4402 = vpow2.f32 %v728_v5 }
 0x432   :  { %v4403_v8 = vpop.eup %4402 }
 0x433   :  { %v732_v11 = vsel %vm719_vm4, %v4403_v8, 0.0 }
 0x434   :  { %733 = vadd.xlane.f32.xlu1 %v732_v11 }
 0x438   :  { %724 = vmax.xlane.f32.xlu1 %v723_v13 }
 0x4c1   :  { %v734_v16 = vpop.xlane.xlu1 %733 }
 0x4c2   :  { %4404 = vrcp.f32 %v734_v16 }
 0x4c5   :  { %v725_v17 = vpop.xlane.xlu1 %724 }
 0x4c6   :  { %v727_v18 = vsub.f32 %v718_v12, %v725_v17 }
 0x4c8   :  { %v730_v19 = vmul.f32 1.442695, %v727_v18 }
 0x4ca   :  { %4406 = vpow2.f32 %v730_v19 }
 0x4cc   :  { %v4405_v20 = vpop.eup %4404 }
 0x4cd   :  { %v740_v21 = vmul.f32 %v4405_v20, %v4403_v8 }
 0x4cf   :  { %v742_v60 = vpack.c.bf16 %v740_v21, %v740_v21 }
 0x4d1   :  { %4053 = vmatmul.mubr.msk.bf16.vlgmr.msra.gmra.mrb[16].mxu0 %vm744_vm6, %v742_v60 }
 0x4d2   :  { %4063 = vmatpush3.bf16.msra.mxu0 %v4902_v23  ;;  %4066 = vmatprep.mubr.msk.bf16.mxu0 %vm4576_vm0, %v4575_v3 }
 0x4d3   :  { %4064 = vmatprep.subr.bf16.mxu0 %v4575_v3 }
 0x4d4   :  { %v4407_v26 = vpop.eup %4406 }
 0x4d5   :  { %v735_v27 = vsel %vm719_vm4, %v4407_v26, 0.0 }
 0x4d6   :  { %4065 = vmatpush3.bf16.msra.mxu0 %v4909_v24  ;;  %736 = vadd.xlane.f32.xlu0 %v735_v27  ;;  %v374_v27 = vld [vmem:[#allocation3] sm:$0x1] }
 0x4d7   :  { %4078 = vmatprep.subr.bf16.mxu0 %v4575_v3  ;;  %1077 = vperm.xlu1 %4373, %v374_v27  }
 0x4d9   :  { %4067 = vmatmul.mubr.msk.bf16.vlgmr.msra.gmra.mrb[20].mxu0 %vm154_vm1, %v836_v28 }
 0x4da   :  { %4080 = vmatprep.mubr.msk.bf16.mxu0 %vm4576_vm0, %v4575_v3 }
 0x563   :  { %v737_v38 = vpop.xlane.xlu0 %736 }
 0x564   :  { %4408 = vrcp.f32 %v737_v38 }
 0x56e   :  { %v4409_v39 = vpop.eup %4408 }
 0x56f   :  { %v741_v41 = vmul.f32 %v4409_v39, %v4407_v26 }
 0x571   :  { %v743_v42 = vpack.c.bf16 %v741_v41, %v741_v41  ;;  %v4970_v41 = vunpack.c.l.bf16 %v4818_v51 }
 0x573   :  { %4059 = vmatmul.mubr.msk.bf16.vlgmr.msra.gmra.mrb[16].mxu1 %vm744_vm6, %v743_v42  ;;  %v4973_v42 = vunpack.c.l.bf16 %v4820_v53 }
 0x574   :  { %4071 = vmatpush3.bf16.msra.mxu1 %v4931_v33 }
 0x575   :  { %4072 = vmatprep.subr.bf16.mxu1 %v4937_v43 }
 0x578   :  { %4073 = vmatpush3.bf16.msra.mxu1 %v4937_v43 }
 0x579   :  { %4084 = vmatprep.subr.bf16.mxu1 %v4575_v3 }
 0x5a4   :  { %v4944_v62 = vpop.f32.mrb[16].mxu0 }
 0x5a5   :  { %v4054_v44 = vpop.f32.mrb[17].mxu0  ;;  %v1352_v19 = vpack.c.bf16 %v4944_v62, %v4944_v62 }
 0x5a6   :  { %v788_v46 = vpop.f32.mrb[18].mxu0 }
 0x5a7   :  { %v4055_v48 = vpop.f32.mrb[19].mxu0  ;;  %v1400_v28 = vunpack.c.l.b16 %v1352_v19  ;;  %v4976_v46 = vunpack.c.h.bf16 %v4818_v51 }
 0x5ac   :  { %v892_v50 = vpop.f32.mrb[20].mxu0 }
 0x5ad   :  { %v893_v54 = vadd.f32 %v4949_v49, %v892_v50  ;;  %v4068_v55 = vpop.f32.mrb[21].mxu0 }
 0x5ae   :  { %v895_v56 = vpop.f32.mrb[22].mxu0 }
 0x5af   :  { %v898_v57 = vpack.c.bf16 %v893_v54, %v893_v54  ;;  %v4069_v58 = vpop.f32.mrb[23].mxu0  ;;  %v4980_v54 = vunpack.c.h.bf16 %v4820_v53 }
 0x5b1   :  { %v906_v59 = vrot.slane %v898_v57, %v4847_v6 }
 0x5b3   :  { %v913_v0 = vrot.slane %v906_v59, %v4847_v6 }
 0x5b5   :  { %v915_v1 = vunpack.i.h.s16 %v913_v0  ;;  %v3741_v2 = vpack.i.b16 %v913_v0, %v913_v0 }
 0x5b7   :  { %v917_v4 = vpack.i.b16 %v915_v1, %v915_v1  ;;  %v921_v5 = vrot.slane %v3741_v2, %v4875_v40 }
 0x5b9   :  { %v925_v7 = vrot.slane %v917_v4, %v4875_v40  ;;  %v927_v8 = vpack.i.b16 %v921_v5, %v921_v5 }
 0x5bb   :  { %v934_v11 = vpack.i.b16 %v925_v7, %v925_v7  ;;  %v932_v12 = vrot.slane %v927_v8, %v4875_v40 }
 0x5bd   :  { %v939_v13 = vrot.slane %v934_v11, %v4875_v40  ;;  %v940_v16 = vmul.bf16 %v932_v12, %v4767_v31 }
 0x5bf   :  { %4074 = vmatprep.mubr.msk.bf16.mxu1 %vm154_vm1, %v940_v16  ;;  %v941_v17 = vmul.bf16 %v939_v13, %v4765_v30 }
 0x5c1   :  { %4075 = vmatmul.mubr.msk.bf16.vlgmr.msra.gmra.mrb[20].mxu1 %vm154_vm1, %v941_v17 }
 0x5c2   :  { %4086 = vmatprep.mubr.msk.bf16.mxu1 %vm4576_vm0, %v4575_v3 }
 0x646   :  { %v830_v18 = vpop.f32.mrb[16].mxu1 }
 0x647   :  { %v1353_v20 = vpack.c.bf16 %v830_v18, %v830_v18  ;;  %v4060_v21 = vpop.f32.mrb[17].mxu1  ;;  %v1044_v16 = vrot.slane %v830_v18, %v4875_v40 }
 0x648   :  { %v833_v60 = vpop.f32.mrb[18].mxu1 }
 0x649   :  { %v1401_v25 = vunpack.c.l.b16 %v1353_v20  ;;  %v4061_v26 = vpop.f32.mrb[19].mxu1  ;;  %v1040_v20 = vrot.slane %v4944_v62, %v4875_v40 }
 0x64b   :  { %v1402_v38 = vrot.slane %v1401_v25, 7 }
 0x64d   :  { %v4967_v39 = vsel %vm1403_vm7, %v1402_v38, %v1400_v28 }
 0x694   :  { %v4076_v44 = vpop.f32.mrb[20].mxu1 }
 0x695   :  { %v1007_v48 = vadd.f32 %v4076_v44, %v4970_v41  ;;  %v998_v50 = vpop.f32.mrb[21].mxu1 }
 0x696   :  { %v999_v55 = vadd.f32 %v998_v50, %v4973_v42  ;;  %v4077_v56 = vpop.f32.mrb[22].mxu1 }
 0x697   :  { %v1019_v57 = vmin.f32 %v1007_v48, 0.0  ;;  %v1010_v58 = vadd.f32 %v4077_v56, %v4976_v46  ;;  %v1001_v59 = vpop.f32.mrb[23].mxu1  ;;  %vm1015_vm8 = vcmp.gt.f32.partialorder %v1007_v48, 0.0 }
 0x698   :  { %v1017_v0 = vmin.f32 %v999_v55, 0.0  ;;  %v1002_v1 = vadd.f32 %v1001_v59, %v4980_v54  ;;  %vm1013_vm9 = vcmp.gt.f32.partialorder %v999_v55, 0.0 }
 0x699   :  { %v1025_v2 = vmul.f32 1.442695, %v1019_v57  ;;  %v1020_v4 = vmin.f32 %v1010_v58, 0.0  ;;  %vm1016_vm10 = vcmp.gt.f32.partialorder %v1010_v58, 0.0 }
 0x69a   :  { %v1021_v51 = vmul.f32 1.442695, %v1017_v0  ;;  %v1018_v5 = vmin.f32 %v1002_v1, 0.0  ;;  %vm1014_vm11 = vcmp.gt.f32.partialorder %v1002_v1, 0.0 }
 0x69b   :  { %4410 = vpow2.f32 %v1025_v2  ;;  %v1027_v7 = vmul.f32 1.442695, %v1020_v4 }
 0x69c   :  { %4412 = vpow2.f32 %v1021_v51  ;;  %v1023_v8 = vmul.f32 1.442695, %v1018_v5 }
 0x69d   :  { %4414 = vpow2.f32 %v1027_v7 }
 0x69e   :  { %4416 = vpow2.f32 %v1023_v8 }
 0x6a5   :  { %v4411_v53 = vpop.eup %4410 }
 0x6a6   :  { %v4413_v11 = vpop.eup %4412  ;;  %v3748_v12 = vadd.f32 -1.0, %v4411_v53 }
 0x6a7   :  { %v4415_v13 = vpop.eup %4414  ;;  %v3746_v17 = vadd.f32 -1.0, %v4413_v11 }
 0x6a8   :  { %v4417_v19 = vpop.eup %4416  ;;  %v1035_v21 = vsel %vm1015_vm8, %v1007_v48, %v3748_v12  ;;  %v3749_v60 = vadd.f32 -1.0, %v4415_v13 }
 0x6a9   :  { %v1047_v25 = vmul.f32 %v1044_v16, %v1035_v21  ;;  %v1033_v26 = vsel %vm1013_vm9, %v999_v55, %v3746_v17  ;;  %v3747_v27 = vadd.f32 -1.0, %v4417_v19 }
 0x6aa   :  { %v1045_v28 = vmul.f32 %v1040_v20, %v1033_v26  ;;  %v1036_v38 = vsel %vm1016_vm10, %v1010_v58, %v3749_v60  ;;  %v371_v60 = vld [vmem:[%s5511_s20] sm:$0x1]  ;;  %v1078_v26 = vpop.permute.xlu1 %1077 }
 0x6ab   :  { %v1055_v44 = vmin.f32 %v1047_v25, 0.0  ;;  %v1048_v50 = vmul.f32 %v1044_v16, %v1036_v38  ;;  %v1034_v56 = vsel %vm1014_vm11, %v1002_v1, %v3747_v27  ;;  %vm1051_vm12 = vcmp.gt.f32.partialorder %v1047_v25, 0.0 }
 0x6ac   :  { %v1053_v18 = vmin.f32 %v1045_v28, 0.0  ;;  %v1046_v57 = vmul.f32 %v1040_v20, %v1034_v56  ;;  %vm1049_vm14 = vcmp.gt.f32.partialorder %v1045_v28, 0.0  ;;  %v5010_v27 = vrot.slane %v1078_v26, %v4875_v40 }
 0x6ad   :  { %v1061_v59 = vmul.f32 1.442695, %v1055_v44  ;;  %v1056_v0 = vmin.f32 %v1048_v50, 0.0  ;;  %vm1052_vm13 = vcmp.gt.f32.partialorder %v1048_v50, 0.0 }
 0x6ae   :  { %v1057_v2 = vmul.f32 1.442695, %v1053_v18  ;;  %v1054_v4 = vmin.f32 %v1046_v57, 0.0  ;;  %vm1050_vm15 = vcmp.gt.f32.partialorder %v1046_v57, 0.0 }
 0x6af   :  { %4418 = vpow2.f32 %v1061_v59  ;;  %v1063_v62 = vmul.f32 1.442695, %v1056_v0 }
 0x6b0   :  { %4420 = vpow2.f32 %v1057_v2  ;;  %v1059_v48 = vmul.f32 1.442695, %v1054_v4 }
 0x6b1   :  { %4422 = vpow2.f32 %v1063_v62 }
 0x6b2   :  { %4424 = vpow2.f32 %v1059_v48 }
 0x6b9   :  { %v4419_v55 = vpop.eup %4418 }
 0x6ba   :  { %v4421_v51 = vpop.eup %4420  ;;  %v3752_v5 = vadd.f32 -1.0, %v4419_v55 }
 0x6bb   :  { %v4423_v58 = vpop.eup %4422  ;;  %v3750_v7 = vadd.f32 -1.0, %v4421_v51 }
 0x6bc   :  { %v4425_v8 = vpop.eup %4424  ;;  %v3753_v53 = vadd.f32 -1.0, %v4423_v58  ;;  %v1071_v11 = vsel %vm1051_vm12, %v1047_v25, %v3752_v5  ;;  %v4995_v25 = vpack.c.bf16 %v371_v60, %v371_v60 }
 0x6bd   :  { %v3751_v1 = vadd.f32 -1.0, %v4425_v8  ;;  %v1069_v16 = vsel %vm1049_vm14, %v1045_v28, %v3750_v7 }
 0x6be   :  { %v1072_v12 = vsel %vm1052_vm13, %v1048_v50, %v3753_v53 }
 0x6bf   :  { %v1074_v13 = vpack.c.bf16 %v1072_v12, %v1071_v11  ;;  %v1070_v17 = vsel %vm1050_vm15, %v1046_v57, %v3751_v1  ;;  %v4392_v11 = vld [vmem:[%s5531_s1 + $0x10] sm:$0xff]  }
 0x6c0   :  { %v1073_v19 = vpack.c.bf16 %v1070_v17, %v1069_v16 }
 0x6c1   :  { %v1131_v20 = vsel %vm154_vm1, %v1074_v13, 0  ;;  %v4393_v13 = vld [vmem:[%s5531_s1 + $0x18] sm:$0xff]  }
 0x6c2   :  { %4085 = vmatpush3.bf16.xpose.msra.mxu1 %v1131_v20  ;;  %v1088_v21 = vsel %vm154_vm1, %v1073_v19, 0  ;;  %v1405_v19 = vpack.c.b16 %v4967_v39, %v4967_v39 }
 0x6c3   :  { %4079 = vmatpush3.bf16.xpose.msra.mxu0 %v1088_v21  ;;  %4096 = vmatprep.subr.bf16.mxu1 %v4575_v3 }
 0x6c4   :  { %4090 = vmatprep.subr.bf16.mxu0 %v4575_v3 }
 0x6c9   :  { %4087 = vmatmul.mubr.msk.bf16.vlgmr.msra.gmra.mrb[24].mxu1 %vm154_vm1, %v4995_v25 }
 0x6ca   :  { %4081 = vmatmul.mubr.msk.bf16.vlgmr.msra.gmra.mrb[24].mxu0 %vm154_vm1, %v4995_v25  ;;  %4097 = vmatpush3.bf16.msra.mxu1 %v4734_v10 }
 0x6cb   :  { %4091 = vmatpush3.bf16.msra.mxu0 %v4729_v9  ;;  %4092 = vmatprep.mubr.msk.bf16.mxu0 %vm4576_vm0, %v4575_v3 }
 0x6cc   :  { %4102 = vmatprep.subr.bf16.mxu0 %v4575_v3  ;;  %4098 = vmatprep.mubr.msk.bf16.mxu1 %vm4576_vm0, %v4575_v3 }
 0x6cd   :  { %4110 = vmatprep.subr.bf16.mxu1 %v4575_v3 }
 0x79c   :  { %v1167_v28 = vpop.f32.mrb[24].mxu1 }
 0x79d   :  { %v1124_v38 = vpop.f32.mrb[24].mxu0  ;;  %v4088_v10 = vpop.f32.mrb[25].mxu1  ;;  %v1168_v48 = vadd.f32 %v1167_v28, %v5010_v27 }
 0x79e   :  { %v1125_v9 = vadd.f32 %v1124_v38, %v5010_v27  ;;  %v4082_v44 = vpop.f32.mrb[25].mxu0  ;;  %v1170_v50 = vpop.f32.mrb[26].mxu1  ;;  %v3763_v38 = vld [vmem:[%s5533_s27 + $0x1] ss:$0 sm:$0xff] }
 0x79f   :  { %v1127_v56 = vpop.f32.mrb[26].mxu0  ;;  %v4089_v18 = vpop.f32.mrb[27].mxu1  ;;  %v1177_v51 = vsel %vm1173_vm2, %v1168_v48, -inf }
 0x7a0   :  { %v4083_v57 = vpop.f32.mrb[27].mxu0  ;;  %v1174_v59 = vsel %vm1173_vm2, %v1125_v9, -inf }
 0x7a1   :  { %1175 = vmax.xlane.f32.xlu1 %v1174_v59 }
 0x82e   :  { %v1176_v0 = vpop.xlane.xlu1 %1175 }
 0x82f   :  { %v1180_v2 = vsub.f32 %v1125_v9, %v1176_v0 }
 0x831   :  { %v1182_v4 = vmul.f32 1.442695, %v1180_v2 }
 0x833   :  { %4426 = vpow2.f32 %v1182_v4 }
 0x83d   :  { %v4427_v62 = vpop.eup %4426 }
 0x83e   :  { %v1186_v55 = vsel %vm1173_vm2, %v4427_v62, 0.0 }
 0x83f   :  { %1187 = vadd.xlane.f32.xlu0 %v1186_v55 }
 0x843   :  { %1178 = vmax.xlane.f32.xlu0 %v1177_v51 }
 0x8cc   :  { %v1188_v5 = vpop.xlane.xlu0 %1187 }
 0x8cd   :  { %4428 = vrcp.f32 %v1188_v5 }
 0x8d0   :  { %v1179_v58 = vpop.xlane.xlu0 %1178 }
 0x8d1   :  { %v1181_v7 = vsub.f32 %v1168_v48, %v1179_v58 }
 0x8d3   :  { %v1184_v8 = vmul.f32 1.442695, %v1181_v7 }
 0x8d5   :  { %4430 = vpow2.f32 %v1184_v8 }
 0x8d7   :  { %v4429_v53 = vpop.eup %4428 }
 0x8d8   :  { %v1194_v1 = vmul.f32 %v4429_v53, %v4427_v62 }
 0x8da   :  { %v1196_v12 = vpack.c.bf16 %v1194_v1, %v1194_v1 }
 0x8dc   :  { %4093 = vmatmul.mubr.msk.bf16.vlgmr.msra.gmra.mrb[28].mxu0 %vm1199_vm3, %v1196_v12 }
 0x8dd   :  { %4103 = vmatpush3.bf16.msra.mxu0 %v4392_v11  ;;  %4106 = vmatprep.mubr.msk.bf16.mxu0 %vm4576_vm0, %v4575_v3 }
 0x8de   :  { %4104 = vmatprep.subr.bf16.mxu0 %v4575_v3 }
 0x8df   :  { %v4431_v16 = vpop.eup %4430 }
 0x8e0   :  { %v1189_v17 = vsel %vm1173_vm2, %v4431_v16, 0.0 }
 0x8e1   :  { %4105 = vmatpush3.bf16.msra.mxu0 %v4393_v13  ;;  %1190 = vadd.xlane.f32.xlu0 %v1189_v17 }
 0x8e2   :  { %4118 = vmatprep.subr.bf16.mxu0 %v4575_v3 }
 0x8e4   :  { %4107 = vmatmul.mubr.msk.bf16.vlgmr.msra.gmra.mrb[32].mxu0 %vm154_vm1, %v4786_v35 }
 0x8e5   :  { %4119 = vmatpush3.bf16.msra.mxu0 %v4781_v34  ;;  %4122 = vmatprep.mubr.msk.bf16.mxu0 %vm4576_vm0, %v4575_v3 }
 0x8e6   :  { %4120 = vmatprep.subr.bf16.mxu0 %v4575_v3 }
 0x8e9   :  { %4121 = vmatpush3.bf16.msra.mxu0 %v4795_v36 }
 0x8ea   :  { %4132 = vmatprep.subr.bf16.mxu0 %v4575_v3 }
 0x8ec   :  { %4123 = vmatmul.mubr.msk.bf16.vlgmr.msra.gmra.mrb[36].mxu0 %vm154_vm1, %v1405_v19 }
 0x8ed   :  { %4134 = vmatprep.mubr.msk.bf16.mxu0 %vm4576_vm0, %v4575_v3 }
 0x8f2   :  { %4133 = vmatpush3.bf16.xpose.msra.mxu0 %v4842_v63 }
 0x8f3   :  { %4144 = vmatprep.subr.bf16.mxu0 %v4575_v3 }
 0x96e   :  { %v1191_v34 = vpop.xlane.xlu0 %1190 }
 0x96f   :  { %4432 = vrcp.f32 %v1191_v34 }
 0x979   :  { %v4433_v20 = vpop.eup %4432 }
 0x97a   :  { %v1195_v21 = vmul.f32 %v4433_v20, %v4431_v16 }
 0x97c   :  { %v1197_v60 = vpack.c.bf16 %v1195_v21, %v1195_v21 }
 0x97e   :  { %4099 = vmatmul.mubr.msk.bf16.vlgmr.msra.gmra.mrb[28].mxu1 %vm1199_vm3, %v1197_v60 }
 0x97f   :  { %4111 = vmatpush3.bf16.msra.mxu1 %v4772_v32  ;;  %4114 = vmatprep.mubr.msk.bf16.mxu1 %vm4576_vm0, %v4575_v3 }
 0x980   :  { %4112 = vmatprep.subr.bf16.mxu1 %v4575_v3 }
 0x983   :  { %4113 = vmatpush3.bf16.msra.mxu1 %v4808_v37 }
 0x984   :  { %4126 = vmatprep.subr.bf16.mxu1 %v4575_v3 }
 0x9af   :  { %v1237_v36 = vpop.f32.mrb[28].mxu0 }
 0x9b0   :  { %v4094_v39 = vpop.f32.mrb[29].mxu0  ;;  %v1677_v2 = vpack.c.bf16 %v1237_v36, %v1237_v36 }
 0x9b1   :  { %v1240_v26 = vpop.f32.mrb[30].mxu0 }
 0x9b2   :  { %v4095_v28 = vpop.f32.mrb[31].mxu0  ;;  %v1681_v5 = vunpack.c.l.b16 %v1677_v2 }
 0x9b7   :  { %v1346_v10 = vpop.f32.mrb[32].mxu0 }
 0x9b8   :  { %v1347_v9 = vadd.f32 %v3763_v38, %v1346_v10  ;;  %v4108_v32 = vpop.f32.mrb[33].mxu0 }
 0x9b9   :  { %v1349_v44 = vpop.f32.mrb[34].mxu0 }
 0x9ba   :  { %v1354_v50 = vpack.c.bf16 %v1347_v9, %v1347_v9  ;;  %v4109_v56 = vpop.f32.mrb[35].mxu0 }
 0x9bc   :  { %4115 = vmatmul.mubr.msk.bf16.vlgmr.msra.gmra.mrb[32].mxu1 %vm154_vm1, %v1354_v50 }
 0x9bd   :  { %4127 = vmatpush3.bf16.xpose.msra.mxu1 %v4832_v61  ;;  %4128 = vmatprep.mubr.msk.bf16.mxu1 %vm4576_vm0, %v4575_v3 }
 0x9be   :  { %4138 = vmatprep.subr.bf16.mxu1 %v4575_v3 }
 0x9bf   :  { %v1443_v37 = vpop.f32.mrb[36].mxu0 }
 0x9c0   :  { %v4124_v18 = vpop.f32.mrb[37].mxu0 }
 0x9c1   :  { %v1446_v57 = vpop.f32.mrb[38].mxu0 }
 0x9c2   :  { %v4125_v59 = vpop.f32.mrb[39].mxu0 }
 0xa51   :  { %v1281_v0 = vpop.f32.mrb[28].mxu1 }
 0xa52   :  { %v1678_v4 = vpack.c.bf16 %v1281_v0, %v1281_v0  ;;  %v4100_v62 = vpop.f32.mrb[29].mxu1 }
 0xa53   :  { %v1284_v48 = vpop.f32.mrb[30].mxu1 }
 0xa54   :  { %v1682_v55 = vunpack.c.l.b16 %v1678_v4  ;;  %v4101_v51 = vpop.f32.mrb[31].mxu1 }
 0xa56   :  { %v1683_v58 = vrot.slane %v1682_v55, 7 }
 0xa58   :  { %v5060_v7 = vsel %vm1403_vm7, %v1683_v58, %v1681_v5 }
 0xa8f   :  { %v1392_v8 = vpop.f32.mrb[32].mxu1 }
 0xa90   :  { %v1444_v53 = vadd.f32 %v1443_v37, %v1392_v8  ;;  %v4116_v1 = vpop.f32.mrb[33].mxu1 }
 0xa91   :  { %v1395_v11 = vpop.f32.mrb[34].mxu1 }
 0xa92   :  { %v1449_v12 = vadd.f32 %v4857_v15, %v1444_v53  ;;  %v4117_v13 = vpop.f32.mrb[35].mxu1  ;;  %v1685_v11 = vpack.c.b16 %v5060_v7, %v5060_v7 }
 0xa94   :  { %4434 = vtanh.f32 %v1449_v12 }
 0xa9e   :  { %v4435_v16 = vpop.eup %4434 }
 0xa9f   :  { %v1451_v17 = vmul.f32 %v4435_v16, %v4863_v22 }
 0xaa1   :  { %v1459_v19 = vrot.slane %v1451_v17, %v4847_v6 }
 0xaa3   :  { %v1467_v34 = vrot.slane %v1459_v19, %v4847_v6  ;;  %v1460_v20 = vcombine.high %v1459_v19, %v1459_v19 }
 0xaa5   :  { %v1477_v21 = vpack.c.bf16 %v1467_v34, %v1467_v34  ;;  %v1474_v60 = vrot.slane %v1460_v20, %v4847_v6 }
 0xaa7   :  { %4129 = vmatmul.mubr.msk.bf16.vlgmr.msra.gmra.mrb[36].mxu1 %vm154_vm1, %v1477_v21  ;;  %v1478_v36 = vpack.c.bf16 %v1474_v60, %v1474_v60 }
 0xaa8   :  { %4139 = vmatpush3.bf16.msra.mxu1 %v4895_v14  ;;  %4140 = vmatprep.mubr.msk.bf16.mxu1 %vm4576_vm0, %v4575_v3 }
 0xaa9   :  { %4135 = vmatmul.mubr.msk.bf16.vlgmr.msra.gmra.mrb[40].mxu0 %vm154_vm1, %v1478_v36  ;;  %4150 = vmatprep.subr.bf16.mxu1 %v4575_v3 }
 0xaaa   :  { %4145 = vmatpush3.bf16.msra.mxu0 %v4925_v29  ;;  %4146 = vmatprep.mubr.msk.bf16.mxu0 %vm4576_vm0, %v4575_v3 }
 0xaab   :  { %4158 = vmatprep.subr.bf16.mxu0 %v4931_v33 }
 0xb7a   :  { %v1516_v15 = vpop.f32.mrb[36].mxu1 }
 0xb7b   :  { %v1517_v22 = vadd.f32 %v1516_v15, %v4882_v47  ;;  %v4130_v39 = vpop.f32.mrb[37].mxu1 }
 0xb7c   :  { %v1519_v26 = vpop.f32.mrb[38].mxu1  ;;  %v1559_v28 = vpop.f32.mrb[40].mxu0 }
 0xb7d   :  { %v4131_v38 = vpop.f32.mrb[39].mxu1  ;;  %v4136_v10 = vpop.f32.mrb[41].mxu0  ;;  %v1565_v9 = vadd.f32 %v1517_v22, %v4885_v52  ;;  %v1560_v57 = vadd.f32 %v1559_v28, %v4882_v47 }
 0xb7e   :  { %v1562_v32 = vpop.f32.mrb[42].mxu0 }
 0xb7f   :  { %v4137_v44 = vpop.f32.mrb[43].mxu0  ;;  %v1567_v50 = vsel %vm719_vm4, %v1565_v9, -inf  ;;  %v1566_v2 = vadd.f32 %v1560_v57, %v4878_v45 }
 0xb80   :  { %1568 = vmax.xlane.f32.xlu0 %v1567_v50 }
 0xb81   :  { %v1570_v4 = vsel %vm719_vm4, %v1566_v2, -inf }
 0xc0d   :  { %v1569_v56 = vpop.xlane.xlu0 %1568 }
 0xc0e   :  { %v1573_v37 = vsub.f32 %v1565_v9, %v1569_v56 }
 0xc10   :  { %v1575_v18 = vmul.f32 1.442695, %v1573_v37 }
 0xc12   :  { %4436 = vpow2.f32 %v1575_v18 }
 0xc1c   :  { %v4437_v59 = vpop.eup %4436 }
 0xc1d   :  { %v1579_v0 = vsel %vm719_vm4, %v4437_v59, 0.0 }
 0xc1e   :  { %1580 = vadd.xlane.f32.xlu0 %v1579_v0 }
 0xc22   :  { %1571 = vmax.xlane.f32.xlu0 %v1570_v4 }
 0xcab   :  { %v1581_v62 = vpop.xlane.xlu0 %1580 }
 0xcac   :  { %4438 = vrcp.f32 %v1581_v62 }
 0xcaf   :  { %v1572_v48 = vpop.xlane.xlu0 %1571 }
 0xcb0   :  { %v1574_v55 = vsub.f32 %v1566_v2, %v1572_v48 }
 0xcb2   :  { %v1577_v51 = vmul.f32 1.442695, %v1574_v55 }
 0xcb4   :  { %4440 = vpow2.f32 %v1577_v51 }
 0xcb6   :  { %v4439_v5 = vpop.eup %4438 }
 0xcb7   :  { %v1587_v58 = vmul.f32 %v4439_v5, %v4437_v59 }
 0xcb9   :  { %v1589_v8 = vpack.c.bf16 %v1587_v58, %v1587_v58 }
 0xcbb   :  { %4141 = vmatmul.mubr.msk.bf16.vlgmr.msra.gmra.mrb[40].mxu1 %vm744_vm6, %v1589_v8 }
 0xcbc   :  { %4151 = vmatpush3.bf16.msra.mxu1 %v4902_v23  ;;  %4154 = vmatprep.mubr.msk.bf16.mxu1 %vm4576_vm0, %v4575_v3 }
 0xcbd   :  { %4152 = vmatprep.subr.bf16.mxu1 %v4575_v3 }
 0xcbe   :  { %v4441_v53 = vpop.eup %4440 }
 0xcbf   :  { %v1582_v1 = vsel %vm719_vm4, %v4441_v53, 0.0 }
 0xcc0   :  { %4153 = vmatpush3.bf16.msra.mxu1 %v4909_v24  ;;  %1583 = vadd.xlane.f32.xlu1 %v1582_v1 }
 0xcc1   :  { %4166 = vmatprep.subr.bf16.mxu1 %v4575_v3 }
 0xcc3   :  { %4155 = vmatmul.mubr.msk.bf16.vlgmr.msra.gmra.mrb[44].mxu1 %vm154_vm1, %v1685_v11 }
 0xcc4   :  { %4168 = vmatprep.mubr.msk.bf16.mxu1 %vm4576_vm0, %v4575_v3 }
 0xd4d   :  { %v1584_v23 = vpop.xlane.xlu1 %1583 }
 0xd4e   :  { %4442 = vrcp.f32 %v1584_v23 }
 0xd58   :  { %v4443_v12 = vpop.eup %4442 }
 0xd59   :  { %v1588_v13 = vmul.f32 %v4443_v12, %v4441_v53 }
 0xd5b   :  { %v1590_v16 = vpack.c.bf16 %v1588_v13, %v1588_v13 }
 0xd5d   :  { %4147 = vmatmul.mubr.msk.bf16.vlgmr.msra.gmra.mrb[44].mxu0 %vm744_vm6, %v1590_v16 }
 0xd5e   :  { %4159 = vmatpush3.bf16.msra.mxu0 %v4931_v33 }
 0xd5f   :  { %4160 = vmatprep.subr.bf16.mxu0 %v4937_v43 }
 0xd62   :  { %4161 = vmatpush3.bf16.msra.mxu0 %v4937_v43 }
 0xd63   :  { %4172 = vmatprep.subr.bf16.mxu0 %v4575_v3 }
 0xd8e   :  { %v5102_v24 = vpop.f32.mrb[40].mxu1 }
 0xd8f   :  { %v4142_v7 = vpop.f32.mrb[41].mxu1  ;;  %v2151_v37 = vpack.c.bf16 %v5102_v24, %v5102_v24 }
 0xd90   :  { %v1631_v17 = vpop.f32.mrb[42].mxu1 }
 0xd91   :  { %v4143_v19 = vpop.f32.mrb[43].mxu1  ;;  %v2199_v4 = vunpack.c.l.b16 %v2151_v37 }
 0xd96   :  { %v1723_v34 = vpop.f32.mrb[44].mxu1 }
 0xd97   :  { %v1724_v20 = vadd.f32 %v4949_v49, %v1723_v34  ;;  %v4156_v21 = vpop.f32.mrb[45].mxu1 }
 0xd98   :  { %v1726_v60 = vpop.f32.mrb[46].mxu1 }
 0xd99   :  { %v1729_v36 = vpack.c.bf16 %v1724_v20, %v1724_v20  ;;  %v4157_v15 = vpop.f32.mrb[47].mxu1 }
 0xd9b   :  { %v1737_v33 = vrot.slane %v1729_v36, %v4847_v6 }
 0xd9d   :  { %v1744_v22 = vrot.slane %v1737_v33, %v4847_v6 }
 0xd9f   :  { %v1746_v39 = vunpack.i.h.s16 %v1744_v22  ;;  %v3774_v43 = vpack.i.b16 %v1744_v22, %v1744_v22 }
 0xda1   :  { %v1748_v26 = vpack.i.b16 %v1746_v39, %v1746_v39  ;;  %v1752_v28 = vrot.slane %v3774_v43, %v4875_v40  ;;  %v1855_v39 = vrot.slane %v5102_v24, %v4875_v40 }
 0xda3   :  { %v1756_v38 = vrot.slane %v1748_v26, %v4875_v40  ;;  %v1758_v10 = vpack.i.b16 %v1752_v28, %v1752_v28 }
 0xda5   :  { %v1765_v9 = vpack.i.b16 %v1756_v38, %v1756_v38  ;;  %v1763_v32 = vrot.slane %v1758_v10, %v4875_v40 }
 0xda7   :  { %v1770_v49 = vrot.slane %v1765_v9, %v4875_v40  ;;  %v1771_v44 = vmul.bf16 %v1763_v32, %v4767_v31 }
 0xda9   :  { %4162 = vmatprep.mubr.msk.bf16.mxu0 %vm154_vm1, %v1771_v44  ;;  %v1772_v50 = vmul.bf16 %v1770_v49, %v4765_v30 }
 0xdab   :  { %4163 = vmatmul.mubr.msk.bf16.vlgmr.msra.gmra.mrb[48].mxu0 %vm154_vm1, %v1772_v50 }
 0xdac   :  { %4174 = vmatprep.mubr.msk.bf16.mxu0 %vm4576_vm0, %v4575_v3 }
 0xe30   :  { %v1671_v56 = vpop.f32.mrb[44].mxu0 }
 0xe31   :  { %v2152_v18 = vpack.c.bf16 %v1671_v56, %v1671_v56  ;;  %v4148_v57 = vpop.f32.mrb[45].mxu0  ;;  %v1859_v15 = vrot.slane %v1671_v56, %v4875_v40 }
 0xe32   :  { %v1674_v59 = vpop.f32.mrb[46].mxu0 }
 0xe33   :  { %v2200_v0 = vunpack.c.l.b16 %v2152_v18  ;;  %v4149_v2 = vpop.f32.mrb[47].mxu0 }
 0xe35   :  { %v2201_v62 = vrot.slane %v2200_v0, 7 }
 0xe37   :  { %v5120_v48 = vsel %vm1403_vm7, %v2201_v62, %v2199_v4 }
 0xe7e   :  { %v4164_v55 = vpop.f32.mrb[48].mxu0 }
 0xe7f   :  { %v1822_v51 = vadd.f32 %v4164_v55, %v4970_v41  ;;  %v1813_v5 = vpop.f32.mrb[49].mxu0 }
 0xe80   :  { %v1814_v58 = vadd.f32 %v1813_v5, %v4973_v42  ;;  %v4165_v8 = vpop.f32.mrb[50].mxu0 }
 0xe81   :  { %v1834_v53 = vmin.f32 %v1822_v51, 0.0  ;;  %v1825_v1 = vadd.f32 %v4165_v8, %v4976_v46  ;;  %v1816_v11 = vpop.f32.mrb[51].mxu0  ;;  %vm1830_vm5 = vcmp.gt.f32.partialorder %v1822_v51, 0.0 }
 0xe82   :  { %v1832_v23 = vmin.f32 %v1814_v58, 0.0  ;;  %v1817_v12 = vadd.f32 %v1816_v11, %v4980_v54  ;;  %vm1828_vm8 = vcmp.gt.f32.partialorder %v1814_v58, 0.0 }
 0xe83   :  { %v1840_v13 = vmul.f32 1.442695, %v1834_v53  ;;  %v1835_v16 = vmin.f32 %v1825_v1, 0.0  ;;  %vm1831_vm9 = vcmp.gt.f32.partialorder %v1825_v1, 0.0 }
 0xe84   :  { %v1836_v7 = vmul.f32 1.442695, %v1832_v23  ;;  %v1833_v17 = vmin.f32 %v1817_v12, 0.0  ;;  %vm1829_vm10 = vcmp.gt.f32.partialorder %v1817_v12, 0.0 }
 0xe85   :  { %4444 = vpow2.f32 %v1840_v13  ;;  %v1842_v19 = vmul.f32 1.442695, %v1835_v16 }
 0xe86   :  { %4446 = vpow2.f32 %v1836_v7  ;;  %v1838_v34 = vmul.f32 1.442695, %v1833_v17 }
 0xe87   :  { %4448 = vpow2.f32 %v1842_v19  ;;  %v5140_v19 = vld [vmem:[%s5530_s30 + $0x8] sm:$0xff]  }
 0xe88   :  { %4450 = vpow2.f32 %v1838_v34  ;;  %v5146_v34 = vld [vmem:[%s5530_s30] sm:$0xff]  }
 0xe8f   :  { %v4445_v20 = vpop.eup %4444 }
 0xe90   :  { %v4447_v21 = vpop.eup %4446  ;;  %v3779_v60 = vadd.f32 -1.0, %v4445_v20 }
 0xe91   :  { %v4449_v36 = vpop.eup %4448  ;;  %v3777_v33 = vadd.f32 -1.0, %v4447_v21 }
 0xe92   :  { %v4451_v22 = vpop.eup %4450  ;;  %v1850_v43 = vsel %vm1830_vm5, %v1822_v51, %v3779_v60  ;;  %v3780_v26 = vadd.f32 -1.0, %v4449_v36 }
 0xe93   :  { %v1862_v28 = vmul.f32 %v1859_v15, %v1850_v43  ;;  %v1848_v38 = vsel %vm1828_vm8, %v1814_v58, %v3777_v33  ;;  %v3778_v10 = vadd.f32 -1.0, %v4451_v22 }
 0xe94   :  { %v1860_v9 = vmul.f32 %v1855_v39, %v1848_v38  ;;  %v1851_v32 = vsel %vm1831_vm9, %v1825_v1, %v3780_v26 }
 0xe95   :  { %v1870_v49 = vmin.f32 %v1862_v28, 0.0  ;;  %v1863_v44 = vmul.f32 %v1859_v15, %v1851_v32  ;;  %v1849_v50 = vsel %vm1829_vm10, %v1817_v12, %v3778_v10  ;;  %vm1866_vm11 = vcmp.gt.f32.partialorder %v1862_v28, 0.0 }
 0xe96   :  { %v1868_v56 = vmin.f32 %v1860_v9, 0.0  ;;  %v1861_v37 = vmul.f32 %v1855_v39, %v1849_v50  ;;  %vm1864_vm13 = vcmp.gt.f32.partialorder %v1860_v9, 0.0 }
 0xe97   :  { %v1876_v18 = vmul.f32 1.442695, %v1870_v49  ;;  %v1871_v57 = vmin.f32 %v1863_v44, 0.0  ;;  %vm1867_vm12 = vcmp.gt.f32.partialorder %v1863_v44, 0.0 }
 0xe98   :  { %v1872_v59 = vmul.f32 1.442695, %v1868_v56  ;;  %v1869_v0 = vmin.f32 %v1861_v37, 0.0  ;;  %vm1865_vm14 = vcmp.gt.f32.partialorder %v1861_v37, 0.0 }
 0xe99   :  { %4452 = vpow2.f32 %v1876_v18  ;;  %v1878_v24 = vmul.f32 1.442695, %v1871_v57 }
 0xe9a   :  { %4454 = vpow2.f32 %v1872_v59  ;;  %v1874_v2 = vmul.f32 1.442695, %v1869_v0 }
 0xe9b   :  { %4456 = vpow2.f32 %v1878_v24 }
 0xe9c   :  { %4458 = vpow2.f32 %v1874_v2 }
 0xea3   :  { %v4453_v4 = vpop.eup %4452 }
 0xea4   :  { %v4455_v62 = vpop.eup %4454  ;;  %v3783_v55 = vadd.f32 -1.0, %v4453_v4  ;;  %v4394_v4 = vld [vmem:[%s5531_s1 + $0x20] sm:$0xff]  }
 0xea5   :  { %v4457_v51 = vpop.eup %4456  ;;  %v3781_v5 = vadd.f32 -1.0, %v4455_v62 }
 0xea6   :  { %v4459_v58 = vpop.eup %4458  ;;  %v3784_v8 = vadd.f32 -1.0, %v4457_v51  ;;  %v1886_v1 = vsel %vm1866_vm11, %v1862_v28, %v3783_v55 }
 0xea7   :  { %v3782_v53 = vadd.f32 -1.0, %v4459_v58  ;;  %v1884_v12 = vsel %vm1864_vm13, %v1860_v9, %v3781_v5  ;;  %v4395_v5 = vld [vmem:[%s5531_s1 + $0x28] sm:$0xff]  }
 0xea8   :  { %v1887_v11 = vsel %vm1867_vm12, %v1863_v44, %v3784_v8  ;;  %v5175_v8 = vld [vmem:[%s5500_s9] sm:$0xff]  }
 0xea9   :  { %v1889_v23 = vpack.c.bf16 %v1887_v11, %v1886_v1  ;;  %v1885_v13 = vsel %vm1865_vm14, %v1861_v37, %v3782_v53  ;;  %v5187_v53 = vld [vmem:[%s5499_s8] sm:$0xff]   ;;  %v5196_v1 = vld [vmem:[%s5500_s9 + $0x8] sm:$0xff]  }
 0xeaa   :  { %v1888_v16 = vpack.c.bf16 %v1885_v13, %v1884_v12  ;;  %v5203_v11 = vld [vmem:[%s5499_s8 + $0x8] sm:$0xff]  }
 0xeab   :  { %v1934_v7 = vsel %vm154_vm1, %v1889_v23, 0  ;;  %v2203_v23 = vpack.c.b16 %v5120_v48, %v5120_v48 }
 0xeac   :  { %4173 = vmatpush3.bf16.xpose.msra.mxu0 %v1934_v7  ;;  %v1891_v17 = vsel %vm154_vm1, %v1888_v16, 0 }
 0xead   :  { %4167 = vmatpush3.bf16.xpose.msra.mxu1 %v1891_v17  ;;  %4184 = vmatprep.subr.bf16.mxu0 %v4575_v3 }
 0xeae   :  { %4178 = vmatprep.subr.bf16.mxu1 %v4575_v3 }
 0xeb3   :  { %4175 = vmatmul.mubr.msk.bf16.vlgmr.msra.gmra.mrb[52].mxu0 %vm154_vm1, %v4995_v25 }
 0xeb4   :  { %4169 = vmatmul.mubr.msk.bf16.vlgmr.msra.gmra.mrb[48].mxu1 %vm154_vm1, %v4995_v25  ;;  %4185 = vmatpush3.bf16.msra.mxu0 %v5140_v19 }
 0xeb5   :  { %4179 = vmatpush3.bf16.msra.mxu1 %v5146_v34  ;;  %4180 = vmatprep.mubr.msk.bf16.mxu1 %vm4576_vm0, %v4575_v3 }
 0xeb6   :  { %4190 = vmatprep.subr.bf16.mxu1 %v4575_v3  ;;  %4186 = vmatprep.mubr.msk.bf16.mxu0 %vm4576_vm0, %v4575_v3 }
 0xeb7   :  { %4198 = vmatprep.subr.bf16.mxu0 %v4575_v3 }
 0xf86   :  { %v1970_v20 = vpop.f32.mrb[52].mxu0 }
 0xf87   :  { %v1927_v21 = vpop.f32.mrb[48].mxu1  ;;  %v4176_v60 = vpop.f32.mrb[53].mxu0  ;;  %v1971_v43 = vadd.f32 %v1970_v20, %v5010_v27 }
 0xf88   :  { %v1928_v36 = vadd.f32 %v1927_v21, %v5010_v27  ;;  %v4170_v15 = vpop.f32.mrb[49].mxu1  ;;  %v1973_v33 = vpop.f32.mrb[54].mxu0 }
 0xf89   :  { %v1930_v22 = vpop.f32.mrb[50].mxu1  ;;  %v4177_v39 = vpop.f32.mrb[55].mxu0  ;;  %v1979_v38 = vsel %vm1173_vm2, %v1971_v43, -inf }
 0xf8a   :  { %v4171_v26 = vpop.f32.mrb[51].mxu1  ;;  %v1976_v28 = vsel %vm1173_vm2, %v1928_v36, -inf }
 0xf8b   :  { %1977 = vmax.xlane.f32.xlu0 %v1976_v28 }
 0xf8f   :  { %1980 = vmax.xlane.f32.xlu0 %v1979_v38 }
0x1018   :  { %v1978_v10 = vpop.xlane.xlu0 %1977 }
0x1019   :  { %v1982_v9 = vsub.f32 %v1928_v36, %v1978_v10  ;;  %v3794_v36 = vld [vmem:[%s5533_s27 + $0x2] ss:$0 sm:$0xff] }
0x101b   :  { %v1984_v32 = vmul.f32 1.442695, %v1982_v9 }
0x101c   :  { %v1981_v49 = vpop.xlane.xlu0 %1980 }
0x101d   :  { %4460 = vpow2.f32 %v1984_v32  ;;  %v1983_v44 = vsub.f32 %v1971_v43, %v1981_v49 }
0x101f   :  { %v1986_v50 = vmul.f32 1.442695, %v1983_v44 }
0x1021   :  { %4462 = vpow2.f32 %v1986_v50 }
0x1027   :  { %v4461_v56 = vpop.eup %4460 }
0x1028   :  { %v1988_v37 = vsel %vm1173_vm2, %v4461_v56, 0.0 }
0x1029   :  { %1989 = vadd.xlane.f32.xlu1 %v1988_v37 }
0x102b   :  { %v4463_v18 = vpop.eup %4462 }
0x102c   :  { %v1991_v57 = vsel %vm1173_vm2, %v4463_v18, 0.0 }
0x102d   :  { %1992 = vadd.xlane.f32.xlu1 %v1991_v57 }
0x10b6   :  { %v1990_v59 = vpop.xlane.xlu1 %1989 }
0x10b7   :  { %4464 = vrcp.f32 %v1990_v59 }
0x10ba   :  { %v1993_v0 = vpop.xlane.xlu1 %1992 }
0x10bb   :  { %4466 = vrcp.f32 %v1993_v0  ;;  %v5228_v0 = vld [vmem:[%s5501_s10] ss:$0 sm:$0xff] }
0x10c1   :  { %v4465_v24 = vpop.eup %4464 }
0x10c2   :  { %v1996_v2 = vmul.f32 %v4465_v24, %v4461_v56 }
0x10c4   :  { %v1998_v62 = vpack.c.bf16 %v1996_v2, %v1996_v2 }
0x10c5   :  { %v4467_v55 = vpop.eup %4466 }
0x10c6   :  { %v1997_v51 = vmul.f32 %v4467_v55, %v4463_v18  ;;  %4181 = vmatmul.mubr.msk.bf16.vlgmr.msra.gmra.mrb[52].mxu1 %vm1199_vm3, %v1998_v62  ;;  %v5234_v62 = vld [vmem:[%s5502_s11] ss:$0 sm:$0xff] }
0x10c7   :  { %4191 = vmatpush3.bf16.msra.mxu1 %v4394_v4  ;;  %4194 = vmatprep.mubr.msk.bf16.mxu1 %vm4576_vm0, %v4575_v3 }
0x10c8   :  { %v1999_v58 = vpack.c.bf16 %v1997_v51, %v1997_v51  ;;  %4192 = vmatprep.subr.bf16.mxu1 %v4575_v3 }
0x10ca   :  { %4187 = vmatmul.mubr.msk.bf16.vlgmr.msra.gmra.mrb[56].mxu0 %vm1199_vm3, %v1999_v58 }
0x10cb   :  { %4193 = vmatpush3.bf16.msra.mxu1 %v4395_v5  ;;  %4199 = vmatpush3.bf16.msra.mxu0 %v5175_v8 }
0x10cc   :  { %4206 = vmatprep.subr.bf16.mxu1 %v4575_v3  ;;  %4200 = vmatprep.subr.bf16.mxu0 %v4575_v3 }
0x10cd   :  { %4202 = vmatprep.mubr.msk.bf16.mxu0 %vm4576_vm0, %v4575_v3 }
0x10ce   :  { %4195 = vmatmul.mubr.msk.bf16.vlgmr.msra.gmra.mrb[56].mxu1 %vm154_vm1, %v4786_v35 }
0x10cf   :  { %4207 = vmatpush3.bf16.msra.mxu1 %v5187_v53  ;;  %4210 = vmatprep.mubr.msk.bf16.mxu1 %vm4576_vm0, %v4575_v3 }
0x10d0   :  { %4208 = vmatprep.subr.bf16.mxu1 %v4575_v3  ;;  %4201 = vmatpush3.bf16.msra.mxu0 %v5196_v1 }
0x10d1   :  { %4214 = vmatprep.subr.bf16.mxu0 %v4575_v3 }
0x10d3   :  { %4209 = vmatpush3.bf16.msra.mxu1 %v5203_v11 }
0x10d4   :  { %4220 = vmatprep.subr.bf16.mxu1 %v4575_v3 }
0x10d6   :  { %4211 = vmatmul.mubr.msk.bf16.vlgmr.msra.gmra.mrb[60].mxu1 %vm154_vm1, %v2203_v23 }
0x10d7   :  { %4222 = vmatprep.mubr.msk.bf16.mxu1 %vm4576_vm0, %v4575_v3 }
0x10dc   :  { %4221 = vmatpush3.bf16.xpose.msra.mxu1 %v4842_v63 }
0x10dd   :  { %4232 = vmatprep.subr.bf16.mxu1 %v4575_v3 }
0x1199   :  { %v2037_v12 = vpop.f32.mrb[52].mxu1 }
0x119a   :  { %v4182_v13 = vpop.f32.mrb[53].mxu1  ;;  %v2475_v20 = vpack.c.bf16 %v2037_v12, %v2037_v12 }
0x119b   :  { %v2040_v16 = vpop.f32.mrb[54].mxu1 }
0x119c   :  { %v4183_v7 = vpop.f32.mrb[55].mxu1  ;;  %v2479_v39 = vunpack.c.l.b16 %v2475_v20  ;;  %v5252_v16 = vld [vmem:[%s5508_s17] sm:$0xff]  }
0x119d   :  { %v2080_v17 = vpop.f32.mrb[56].mxu0 }
0x119e   :  { %v2476_v21 = vpack.c.bf16 %v2080_v17, %v2080_v17  ;;  %v4188_v60 = vpop.f32.mrb[57].mxu0 }
0x119f   :  { %v2083_v48 = vpop.f32.mrb[58].mxu0 }
0x11a0   :  { %v2480_v15 = vunpack.c.l.b16 %v2476_v21  ;;  %v4189_v33 = vpop.f32.mrb[59].mxu0 }
0x11a1   :  { %v2145_v22 = vpop.f32.mrb[56].mxu1 }
0x11a2   :  { %v2481_v43 = vrot.slane %v2480_v15, 7  ;;  %v2146_v26 = vadd.f32 %v3794_v36, %v2145_v22  ;;  %v4196_v28 = vpop.f32.mrb[57].mxu1 }
0x11a3   :  { %v2148_v38 = vpop.f32.mrb[58].mxu1 }
0x11a4   :  { %v5218_v10 = vsel %vm1403_vm7, %v2481_v43, %v2479_v39  ;;  %v2153_v9 = vpack.c.bf16 %v2146_v26, %v2146_v26  ;;  %v4197_v32 = vpop.f32.mrb[59].mxu1 }
0x11a6   :  { %4203 = vmatmul.mubr.msk.bf16.vlgmr.msra.gmra.mrb[60].mxu0 %vm154_vm1, %v2153_v9 }
0x11a7   :  { %4215 = vmatpush3.bf16.xpose.msra.mxu0 %v4832_v61  ;;  %4216 = vmatprep.mubr.msk.bf16.mxu0 %vm4576_vm0, %v4575_v3 }
0x11a8   :  { %4226 = vmatprep.subr.bf16.mxu0 %v4575_v3 }
0x11a9   :  { %v2241_v49 = vpop.f32.mrb[60].mxu1 }
0x11aa   :  { %v4212_v44 = vpop.f32.mrb[61].mxu1 }
0x11ab   :  { %v2244_v50 = vpop.f32.mrb[62].mxu1 }
0x11ac   :  { %v4213_v56 = vpop.f32.mrb[63].mxu1 }
0x1279   :  { %v2191_v37 = vpop.f32.mrb[60].mxu0 }
0x127a   :  { %v2242_v18 = vadd.f32 %v2241_v49, %v2191_v37  ;;  %v4204_v57 = vpop.f32.mrb[61].mxu0 }
0x127b   :  { %v2194_v59 = vpop.f32.mrb[62].mxu0 }
0x127c   :  { %v2247_v24 = vadd.f32 %v5228_v0, %v2242_v18  ;;  %v4205_v2 = vpop.f32.mrb[63].mxu0 }
0x127e   :  { %4468 = vtanh.f32 %v2247_v24 }
0x1288   :  { %v4469_v4 = vpop.eup %4468 }
0x1289   :  { %v2249_v55 = vmul.f32 %v5234_v62, %v4469_v4 }
0x128b   :  { %v2257_v51 = vrot.slane %v2249_v55, %v4847_v6 }
0x128d   :  { %v2265_v5 = vrot.slane %v2257_v51, %v4847_v6  ;;  %v2258_v58 = vcombine.high %v2257_v51, %v2257_v51 }
0x128f   :  { %v2275_v23 = vpack.c.bf16 %v2265_v5, %v2265_v5  ;;  %v2272_v12 = vrot.slane %v2258_v58, %v4847_v6  ;;  %v5267_v58 = vld [vmem:[%s5506_s15] sm:$0xff]  }
0x1291   :  { %4217 = vmatmul.mubr.msk.bf16.vlgmr.msra.gmra.mrb[64].mxu0 %vm154_vm1, %v2275_v23  ;;  %v2276_v13 = vpack.c.bf16 %v2272_v12, %v2272_v12  ;;  %v5277_v12 = vld [vmem:[%s5506_s15 + $0x8] sm:$0xff]  }
0x1292   :  { %4227 = vmatpush3.bf16.msra.mxu0 %v4895_v14  ;;  %4228 = vmatprep.mubr.msk.bf16.mxu0 %vm4576_vm0, %v4575_v3 }
0x1293   :  { %4223 = vmatmul.mubr.msk.bf16.vlgmr.msra.gmra.mrb[64].mxu1 %vm154_vm1, %v2276_v13  ;;  %4238 = vmatprep.subr.bf16.mxu0 %v4575_v3  ;;  %v2483_v13 = vpack.c.b16 %v5218_v10, %v5218_v10 }
0x1294   :  { %4233 = vmatpush3.bf16.msra.mxu1 %v4925_v29  ;;  %4234 = vmatprep.mubr.msk.bf16.mxu1 %vm4576_vm0, %v4575_v3 }
0x1295   :  { %4246 = vmatprep.subr.bf16.mxu1 %v5252_v16 }
0x1364   :  { %v2314_v7 = vpop.f32.mrb[64].mxu0 }
0x1365   :  { %v2315_v17 = vadd.f32 %v2314_v7, %v4882_v47  ;;  %v4218_v20 = vpop.f32.mrb[65].mxu0  ;;  %v5286_v7 = vld [vmem:[%s5508_s17 + $0x8] sm:$0xff]  }
0x1366   :  { %v2317_v21 = vpop.f32.mrb[66].mxu0  ;;  %v2357_v60 = vpop.f32.mrb[64].mxu1 }
0x1367   :  { %v2358_v48 = vadd.f32 %v2357_v60, %v4882_v47  ;;  %v4219_v36 = vpop.f32.mrb[67].mxu0  ;;  %v4224_v15 = vpop.f32.mrb[65].mxu1  ;;  %v2363_v33 = vadd.f32 %v2315_v17, %v4885_v52 }
0x1368   :  { %v2360_v22 = vpop.f32.mrb[66].mxu1 }
0x1369   :  { %v4225_v39 = vpop.f32.mrb[67].mxu1  ;;  %v2365_v43 = vsel %vm719_vm4, %v2363_v33, -inf  ;;  %v2364_v26 = vadd.f32 %v2358_v48, %v4878_v45 }
0x136a   :  { %2366 = vmax.xlane.f32.xlu0 %v2365_v43 }
0x136b   :  { %v2368_v28 = vsel %vm719_vm4, %v2364_v26, -inf }
0x136e   :  { %2369 = vmax.xlane.f32.xlu0 %v2368_v28 }
0x13f7   :  { %v2367_v38 = vpop.xlane.xlu0 %2366 }
0x13f8   :  { %v2371_v9 = vsub.f32 %v2363_v33, %v2367_v38  ;;  %v5302_v38 = vld [vmem:[%s5507_s16] ss:$0 sm:$0xff] }
0x13fa   :  { %v2373_v32 = vmul.f32 1.442695, %v2371_v9 }
0x13fb   :  { %v2370_v49 = vpop.xlane.xlu0 %2369 }
0x13fc   :  { %4470 = vpow2.f32 %v2373_v32  ;;  %v2372_v44 = vsub.f32 %v2364_v26, %v2370_v49 }
0x13fe   :  { %v2375_v50 = vmul.f32 1.442695, %v2372_v44 }
0x1400   :  { %4472 = vpow2.f32 %v2375_v50 }
0x1406   :  { %v4471_v56 = vpop.eup %4470 }
0x1407   :  { %v2377_v37 = vsel %vm719_vm4, %v4471_v56, 0.0 }
0x1408   :  { %2378 = vadd.xlane.f32.xlu1 %v2377_v37 }
0x140a   :  { %v4473_v18 = vpop.eup %4472 }
0x140b   :  { %v2380_v57 = vsel %vm719_vm4, %v4473_v18, 0.0 }
0x140c   :  { %2381 = vadd.xlane.f32.xlu1 %v2380_v57 }
0x1495   :  { %v2379_v59 = vpop.xlane.xlu1 %2378 }
0x1496   :  { %4474 = vrcp.f32 %v2379_v59 }
0x1499   :  { %v2382_v24 = vpop.xlane.xlu1 %2381 }
0x149a   :  { %4476 = vrcp.f32 %v2382_v24 }
0x14a0   :  { %v4475_v2 = vpop.eup %4474 }
0x14a1   :  { %v2385_v4 = vmul.f32 %v4475_v2, %v4471_v56 }
0x14a3   :  { %v2387_v55 = vpack.c.bf16 %v2385_v4, %v2385_v4 }
0x14a4   :  { %v4477_v51 = vpop.eup %4476 }
0x14a5   :  { %v2386_v5 = vmul.f32 %v4477_v51, %v4473_v18  ;;  %4229 = vmatmul.mubr.msk.bf16.vlgmr.msra.gmra.mrb[68].mxu0 %vm744_vm6, %v2387_v55 }
0x14a6   :  { %4239 = vmatpush3.bf16.msra.mxu0 %v5267_v58  ;;  %4242 = vmatprep.mubr.msk.bf16.mxu0 %vm4576_vm0, %v4575_v3 }
0x14a7   :  { %v2388_v23 = vpack.c.bf16 %v2386_v5, %v2386_v5  ;;  %4240 = vmatprep.subr.bf16.mxu0 %v4575_v3 }
0x14a9   :  { %4235 = vmatmul.mubr.msk.bf16.vlgmr.msra.gmra.mrb[68].mxu1 %vm744_vm6, %v2388_v23 }
0x14aa   :  { %4241 = vmatpush3.bf16.msra.mxu0 %v5277_v12  ;;  %4247 = vmatpush3.bf16.msra.mxu1 %v5252_v16 }
0x14ab   :  { %4248 = vmatprep.subr.bf16.mxu1 %v5286_v7  ;;  %4254 = vmatprep.subr.bf16.mxu0 %v4575_v3 }
0x14ad   :  { %4243 = vmatmul.mubr.msk.bf16.vlgmr.msra.gmra.mrb[72].mxu0 %vm154_vm1, %v2483_v13 }
0x14ae   :  { %4249 = vmatpush3.bf16.msra.mxu1 %v5286_v7  ;;  %4256 = vmatprep.mubr.msk.bf16.mxu0 %vm4576_vm0, %v4575_v3 }
0x14af   :  { %4260 = vmatprep.subr.bf16.mxu1 %v4575_v3 }
0x1578   :  { %v5295_v17 = vpop.f32.mrb[68].mxu0 }
0x1579   :  { %v4230_v10 = vpop.f32.mrb[69].mxu0  ;;  %v2949_v48 = vpack.c.bf16 %v5295_v17, %v5295_v17 }
0x157a   :  { %v2429_v20 = vpop.f32.mrb[70].mxu0 }
0x157b   :  { %v4231_v21 = vpop.f32.mrb[71].mxu0  ;;  %v2997_v26 = vunpack.c.l.b16 %v2949_v48 }
0x157c   :  { %v2469_v60 = vpop.f32.mrb[68].mxu1 }
0x157d   :  { %v2950_v36 = vpack.c.bf16 %v2469_v60, %v2469_v60  ;;  %v4236_v15 = vpop.f32.mrb[69].mxu1 }
0x157e   :  { %v2472_v33 = vpop.f32.mrb[70].mxu1 }
0x157f   :  { %v2998_v22 = vunpack.c.l.b16 %v2950_v36  ;;  %v4237_v39 = vpop.f32.mrb[71].mxu1 }
0x1580   :  { %v2521_v43 = vpop.f32.mrb[72].mxu0 }
0x1581   :  { %v2999_v28 = vrot.slane %v2998_v22, 7  ;;  %v2522_v9 = vadd.f32 %v5302_v38, %v2521_v43  ;;  %v4244_v32 = vpop.f32.mrb[73].mxu0 }
0x1582   :  { %v2524_v49 = vpop.f32.mrb[74].mxu0 }
0x1583   :  { %v5306_v44 = vsel %vm1403_vm7, %v2999_v28, %v2997_v26  ;;  %v2527_v50 = vpack.c.bf16 %v2522_v9, %v2522_v9  ;;  %v4245_v56 = vpop.f32.mrb[75].mxu0 }
0x1585   :  { %v2535_v37 = vrot.slane %v2527_v50, %v4847_v6 }
0x1587   :  { %v2542_v18 = vrot.slane %v2535_v37, %v4847_v6 }
0x1589   :  { %v2544_v57 = vunpack.i.h.s16 %v2542_v18  ;;  %v3805_v59 = vpack.i.b16 %v2542_v18, %v2542_v18 }
0x158b   :  { %v2546_v24 = vpack.i.b16 %v2544_v57, %v2544_v57  ;;  %v2550_v2 = vrot.slane %v3805_v59, %v4875_v40 }
0x158d   :  { %v2554_v4 = vrot.slane %v2546_v24, %v4875_v40  ;;  %v2556_v55 = vpack.i.b16 %v2550_v2, %v2550_v2  ;;  %v2657_v24 = vrot.slane %v2469_v60, %v4875_v40 }
0x158f   :  { %v2563_v51 = vpack.i.b16 %v2554_v4, %v2554_v4  ;;  %v2561_v5 = vrot.slane %v2556_v55, %v4875_v40  ;;  %v2653_v55 = vrot.slane %v5295_v17, %v4875_v40 }
0x1591   :  { %v2568_v23 = vrot.slane %v2563_v51, %v4875_v40  ;;  %v2569_v13 = vmul.bf16 %v2561_v5, %v4767_v31 }
0x1593   :  { %4250 = vmatprep.mubr.msk.bf16.mxu1 %vm154_vm1, %v2569_v13  ;;  %v2570_v10 = vmul.bf16 %v2568_v23, %v4765_v30 }
0x1595   :  { %4251 = vmatmul.mubr.msk.bf16.vlgmr.msra.gmra.mrb[72].mxu1 %vm154_vm1, %v2570_v10 }
0x1596   :  { %4262 = vmatprep.mubr.msk.bf16.mxu1 %vm4576_vm0, %v4575_v3 }
0x1668   :  { %v4252_v20 = vpop.f32.mrb[72].mxu1 }
0x1669   :  { %v2620_v21 = vadd.f32 %v4252_v20, %v4970_v41  ;;  %v2611_v48 = vpop.f32.mrb[73].mxu1 }
0x166a   :  { %v2612_v36 = vadd.f32 %v2611_v48, %v4973_v42  ;;  %v4253_v15 = vpop.f32.mrb[74].mxu1 }
0x166b   :  { %v2632_v33 = vmin.f32 %v2620_v21, 0.0  ;;  %v2623_v22 = vadd.f32 %v4253_v15, %v4976_v46  ;;  %v2614_v39 = vpop.f32.mrb[75].mxu1  ;;  %vm2628_vm15 = vcmp.gt.f32.partialorder %v2620_v21, 0.0 }
0x166c   :  { %v2630_v43 = vmin.f32 %v2612_v36, 0.0  ;;  %v2615_v26 = vadd.f32 %v2614_v39, %v4980_v54  ;;  %vm2626_vm5 = vcmp.gt.f32.partialorder %v2612_v36, 0.0 }
0x166d   :  { %v2638_v28 = vmul.f32 1.442695, %v2632_v33  ;;  %v2633_v9 = vmin.f32 %v2623_v22, 0.0  ;;  %vm2629_vm8 = vcmp.gt.f32.partialorder %v2623_v22, 0.0 }
0x166e   :  { %v2634_v32 = vmul.f32 1.442695, %v2630_v43  ;;  %v2631_v49 = vmin.f32 %v2615_v26, 0.0  ;;  %vm2627_vm9 = vcmp.gt.f32.partialorder %v2615_v26, 0.0 }
0x166f   :  { %4478 = vpow2.f32 %v2638_v28  ;;  %v2640_v50 = vmul.f32 1.442695, %v2633_v9 }
0x1670   :  { %4480 = vpow2.f32 %v2634_v32  ;;  %v2636_v56 = vmul.f32 1.442695, %v2631_v49 }
0x1671   :  { %4482 = vpow2.f32 %v2640_v50 }
0x1672   :  { %4484 = vpow2.f32 %v2636_v56 }
0x1679   :  { %v4479_v37 = vpop.eup %4478 }
0x167a   :  { %v4481_v18 = vpop.eup %4480  ;;  %v3810_v57 = vadd.f32 -1.0, %v4479_v37 }
0x167b   :  { %v4483_v59 = vpop.eup %4482  ;;  %v3808_v2 = vadd.f32 -1.0, %v4481_v18 }
0x167c   :  { %v4485_v4 = vpop.eup %4484  ;;  %v2648_v51 = vsel %vm2628_vm15, %v2620_v21, %v3810_v57  ;;  %v3811_v5 = vadd.f32 -1.0, %v4483_v59 }
0x167d   :  { %v2660_v23 = vmul.f32 %v2657_v24, %v2648_v51  ;;  %v2646_v13 = vsel %vm2626_vm5, %v2612_v36, %v3808_v2  ;;  %v3809_v10 = vadd.f32 -1.0, %v4485_v4 }
0x167e   :  { %v2658_v20 = vmul.f32 %v2653_v55, %v2646_v13  ;;  %v2649_v48 = vsel %vm2629_vm8, %v2623_v22, %v3811_v5 }
0x167f   :  { %v2668_v15 = vmin.f32 %v2660_v23, 0.0  ;;  %v2661_v33 = vmul.f32 %v2657_v24, %v2649_v48  ;;  %v2647_v39 = vsel %vm2627_vm9, %v2615_v26, %v3809_v10  ;;  %vm2664_vm10 = vcmp.gt.f32.partialorder %v2660_v23, 0.0 }
0x1680   :  { %v2666_v60 = vmin.f32 %v2658_v20, 0.0  ;;  %v2659_v43 = vmul.f32 %v2653_v55, %v2647_v39  ;;  %vm2662_vm12 = vcmp.gt.f32.partialorder %v2658_v20, 0.0 }
0x1681   :  { %v2674_v28 = vmul.f32 1.442695, %v2668_v15  ;;  %v2669_v9 = vmin.f32 %v2661_v33, 0.0  ;;  %vm2665_vm11 = vcmp.gt.f32.partialorder %v2661_v33, 0.0 }
0x1682   :  { %v2670_v32 = vmul.f32 1.442695, %v2666_v60  ;;  %v2667_v49 = vmin.f32 %v2659_v43, 0.0  ;;  %vm2663_vm13 = vcmp.gt.f32.partialorder %v2659_v43, 0.0 }
0x1683   :  { %4486 = vpow2.f32 %v2674_v28  ;;  %v2676_v17 = vmul.f32 1.442695, %v2669_v9 }
0x1684   :  { %4488 = vpow2.f32 %v2670_v32  ;;  %v2672_v21 = vmul.f32 1.442695, %v2667_v49 }
0x1685   :  { %4490 = vpow2.f32 %v2676_v17 }
0x1686   :  { %4492 = vpow2.f32 %v2672_v21 }
0x168d   :  { %v4487_v36 = vpop.eup %4486 }
0x168e   :  { %v4489_v50 = vpop.eup %4488  ;;  %v3814_v56 = vadd.f32 -1.0, %v4487_v36 }
0x168f   :  { %v4491_v22 = vpop.eup %4490  ;;  %v3812_v37 = vadd.f32 -1.0, %v4489_v50 }
0x1690   :  { %v4493_v18 = vpop.eup %4492  ;;  %v3815_v57 = vadd.f32 -1.0, %v4491_v22  ;;  %v2684_v59 = vsel %vm2664_vm10, %v2660_v23, %v3814_v56 }
0x1691   :  { %v3813_v26 = vadd.f32 -1.0, %v4493_v18  ;;  %v2682_v4 = vsel %vm2662_vm12, %v2658_v20, %v3812_v37 }
0x1692   :  { %v2685_v24 = vsel %vm2665_vm11, %v2661_v33, %v3815_v57 }
0x1693   :  { %v2687_v2 = vpack.c.bf16 %v2685_v24, %v2684_v59  ;;  %v2683_v55 = vsel %vm2663_vm13, %v2659_v43, %v3813_v26  ;;  %v4396_v24 = vld [vmem:[%s5531_s1 + $0x30] sm:$0xff]  }
0x1694   :  { %v2686_v51 = vpack.c.bf16 %v2683_v55, %v2682_v4 }
0x1695   :  { %v2732_v5 = vsel %vm154_vm1, %v2687_v2, 0 }
0x1696   :  { %4261 = vmatpush3.bf16.xpose.msra.mxu1 %v2732_v5  ;;  %v2689_v13 = vsel %vm154_vm1, %v2686_v51, 0  ;;  %v4397_v51 = vld [vmem:[%s5531_s1 + $0x38] sm:$0xff]  }
0x1697   :  { %4255 = vmatpush3.bf16.xpose.msra.mxu0 %v2689_v13  ;;  %4272 = vmatprep.subr.bf16.mxu1 %v4575_v3 }
0x1698   :  { %4266 = vmatprep.subr.bf16.mxu0 %v4575_v3 }
0x169d   :  { %4263 = vmatmul.mubr.msk.bf16.vlgmr.msra.gmra.mrb[76].mxu1 %vm154_vm1, %v4995_v25 }
0x169e   :  { %4257 = vmatmul.mubr.msk.bf16.vlgmr.msra.gmra.mrb[76].mxu0 %vm154_vm1, %v4995_v25  ;;  %4273 = vmatpush3.bf16.msra.mxu1 %v5140_v19 }
0x169f   :  { %4267 = vmatpush3.bf16.msra.mxu0 %v5146_v34  ;;  %4268 = vmatprep.mubr.msk.bf16.mxu0 %vm4576_vm0, %v4575_v3 }
0x16a0   :  { %4278 = vmatprep.subr.bf16.mxu0 %v4575_v3  ;;  %4274 = vmatprep.mubr.msk.bf16.mxu1 %vm4576_vm0, %v4575_v3 }
0x16a1   :  { %4286 = vmatprep.subr.bf16.mxu1 %v4575_v3 }
0x1770   :  { %v2768_v23 = vpop.f32.mrb[76].mxu1 }
0x1771   :  { %v2725_v10 = vpop.f32.mrb[76].mxu0  ;;  %v4264_v20 = vpop.f32.mrb[77].mxu1  ;;  %v2769_v34 = vadd.f32 %v2768_v23, %v5010_v27 }
0x1772   :  { %v2726_v48 = vadd.f32 %v2725_v10, %v5010_v27  ;;  %v4258_v15 = vpop.f32.mrb[77].mxu0  ;;  %v2771_v33 = vpop.f32.mrb[78].mxu1 }
0x1773   :  { %v2728_v19 = vpop.f32.mrb[78].mxu0  ;;  %v4265_v39 = vpop.f32.mrb[79].mxu1  ;;  %v2777_v28 = vsel %vm1173_vm2, %v2769_v34, -inf }
0x1774   :  { %v4259_v60 = vpop.f32.mrb[79].mxu0  ;;  %v2774_v43 = vsel %vm1173_vm2, %v2726_v48, -inf }
0x1775   :  { %2775 = vmax.xlane.f32.xlu0 %v2774_v43 }
0x1779   :  { %2778 = vmax.xlane.f32.xlu0 %v2777_v28 }
0x1802   :  { %v2776_v9 = vpop.xlane.xlu0 %2775 }
0x1803   :  { %v2780_v32 = vsub.f32 %v2726_v48, %v2776_v9  ;;  %v3825_v48 = vld [vmem:[%s5533_s27 + $0x3] ss:$0 sm:$0xff] }
0x1805   :  { %v2782_v49 = vmul.f32 1.442695, %v2780_v32 }
0x1806   :  { %v2779_v17 = vpop.xlane.xlu0 %2778 }
0x1807   :  { %4494 = vpow2.f32 %v2782_v49  ;;  %v2781_v21 = vsub.f32 %v2769_v34, %v2779_v17 }
0x1809   :  { %v2784_v36 = vmul.f32 1.442695, %v2781_v21 }
0x180b   :  { %4496 = vpow2.f32 %v2784_v36 }
0x1811   :  { %v4495_v50 = vpop.eup %4494 }
0x1812   :  { %v2786_v56 = vsel %vm1173_vm2, %v4495_v50, 0.0 }
0x1813   :  { %2787 = vadd.xlane.f32.xlu1 %v2786_v56 }
0x1815   :  { %v4497_v22 = vpop.eup %4496 }
0x1816   :  { %v2789_v37 = vsel %vm1173_vm2, %v4497_v22, 0.0 }
0x1817   :  { %2790 = vadd.xlane.f32.xlu1 %v2789_v37 }
0x18a0   :  { %v2788_v18 = vpop.xlane.xlu1 %2787 }
0x18a1   :  { %4498 = vrcp.f32 %v2788_v18 }
0x18a4   :  { %v2791_v57 = vpop.xlane.xlu1 %2790 }
0x18a5   :  { %4500 = vrcp.f32 %v2791_v57 }
0x18ab   :  { %v4499_v26 = vpop.eup %4498 }
0x18ac   :  { %v2794_v59 = vmul.f32 %v4499_v26, %v4495_v50 }
0x18ae   :  { %v2796_v2 = vpack.c.bf16 %v2794_v59, %v2794_v59 }
0x18af   :  { %v4501_v4 = vpop.eup %4500 }
0x18b0   :  { %v2795_v55 = vmul.f32 %v4501_v4, %v4497_v22  ;;  %4269 = vmatmul.mubr.msk.bf16.vlgmr.msra.gmra.mrb[80].mxu0 %vm1199_vm3, %v2796_v2 }
0x18b1   :  { %4279 = vmatpush3.bf16.msra.mxu0 %v4396_v24  ;;  %4282 = vmatprep.mubr.msk.bf16.mxu0 %vm4576_vm0, %v4575_v3 }
0x18b2   :  { %v2797_v5 = vpack.c.bf16 %v2795_v55, %v2795_v55  ;;  %4280 = vmatprep.subr.bf16.mxu0 %v4575_v3 }
0x18b4   :  { %4275 = vmatmul.mubr.msk.bf16.vlgmr.msra.gmra.mrb[80].mxu1 %vm1199_vm3, %v2797_v5 }
0x18b5   :  { %4281 = vmatpush3.bf16.msra.mxu0 %v4397_v51  ;;  %4287 = vmatpush3.bf16.msra.mxu1 %v5175_v8  ;;  %v3001_v8 = vpack.c.b16 %v5306_v44, %v5306_v44 }
0x18b6   :  { %4294 = vmatprep.subr.bf16.mxu0 %v4575_v3  ;;  %4288 = vmatprep.subr.bf16.mxu1 %v4575_v3 }
0x18b7   :  { %4290 = vmatprep.mubr.msk.bf16.mxu1 %vm4576_vm0, %v4575_v3 }
0x18b8   :  { %4283 = vmatmul.mubr.msk.bf16.vlgmr.msra.gmra.mrb[84].mxu0 %vm154_vm1, %v4786_v35 }
0x18b9   :  { %4295 = vmatpush3.bf16.msra.mxu0 %v5187_v53  ;;  %4298 = vmatprep.mubr.msk.bf16.mxu0 %vm4576_vm0, %v4575_v3 }
0x18ba   :  { %4296 = vmatprep.subr.bf16.mxu0 %v4575_v3  ;;  %4289 = vmatpush3.bf16.msra.mxu1 %v5196_v1 }
0x18bb   :  { %4302 = vmatprep.subr.bf16.mxu1 %v4575_v3 }
0x18bd   :  { %4297 = vmatpush3.bf16.msra.mxu0 %v5203_v11 }
0x18be   :  { %4308 = vmatprep.subr.bf16.mxu0 %v4575_v3 }
0x18c0   :  { %4299 = vmatmul.mubr.msk.bf16.vlgmr.msra.gmra.mrb[88].mxu0 %vm154_vm1, %v3001_v8 }
0x18c1   :  { %4310 = vmatprep.mubr.msk.bf16.mxu0 %vm4576_vm0, %v4575_v3 }
0x18c6   :  { %4309 = vmatpush3.bf16.xpose.msra.mxu0 %v4842_v63 }
0x18c7   :  { %4320 = vmatprep.subr.bf16.mxu0 %v4575_v3 }
0x1983   :  { %v2835_v35 = vpop.f32.mrb[80].mxu0 }
0x1984   :  { %v4270_v53 = vpop.f32.mrb[81].mxu0  ;;  %v3273_v11 = vpack.c.bf16 %v2835_v35, %v2835_v35 }
0x1985   :  { %v2838_v1 = vpop.f32.mrb[82].mxu0 }
0x1986   :  { %v4271_v13 = vpop.f32.mrb[83].mxu0  ;;  %v3277_v39 = vunpack.c.l.b16 %v3273_v11 }
0x1987   :  { %v2878_v23 = vpop.f32.mrb[80].mxu1 }
0x1988   :  { %v3274_v10 = vpack.c.bf16 %v2878_v23, %v2878_v23  ;;  %v4276_v20 = vpop.f32.mrb[81].mxu1 }
0x1989   :  { %v2881_v44 = vpop.f32.mrb[82].mxu1 }
0x198a   :  { %v3278_v15 = vunpack.c.l.b16 %v3274_v10  ;;  %v4277_v33 = vpop.f32.mrb[83].mxu1 }
0x198b   :  { %v2943_v19 = vpop.f32.mrb[84].mxu0 }
0x198c   :  { %v3279_v63 = vrot.slane %v3278_v15, 7  ;;  %v2944_v34 = vadd.f32 %v3825_v48, %v2943_v19  ;;  %v4284_v60 = vpop.f32.mrb[85].mxu0 }
0x198d   :  { %v2946_v43 = vpop.f32.mrb[86].mxu0 }
0x198e   :  { %v5386_v28 = vsel %vm1403_vm7, %v3279_v63, %v3277_v39  ;;  %v2951_v9 = vpack.c.bf16 %v2944_v34, %v2944_v34  ;;  %v4285_v32 = vpop.f32.mrb[87].mxu0 }
0x1990   :  { %4291 = vmatmul.mubr.msk.bf16.vlgmr.msra.gmra.mrb[84].mxu1 %vm154_vm1, %v2951_v9 }
0x1991   :  { %4303 = vmatpush3.bf16.xpose.msra.mxu1 %v4832_v61  ;;  %4304 = vmatprep.mubr.msk.bf16.mxu1 %vm4576_vm0, %v4575_v3 }
0x1992   :  { %4314 = vmatprep.subr.bf16.mxu1 %v4575_v3 }
0x1993   :  { %v3039_v49 = vpop.f32.mrb[88].mxu0 }
0x1994   :  { %v4300_v17 = vpop.f32.mrb[89].mxu0 }
0x1995   :  { %v3042_v21 = vpop.f32.mrb[90].mxu0 }
0x1996   :  { %v4301_v36 = vpop.f32.mrb[91].mxu0 }
0x1997   :  { %v3281_v36 = vpack.c.b16 %v5386_v28, %v5386_v28 }
0x1a63   :  { %v2989_v50 = vpop.f32.mrb[84].mxu1 }
0x1a64   :  { %v3040_v56 = vadd.f32 %v3039_v49, %v2989_v50  ;;  %v4292_v22 = vpop.f32.mrb[85].mxu1 }
0x1a65   :  { %v2992_v37 = vpop.f32.mrb[86].mxu1 }
0x1a66   :  { %v3045_v18 = vadd.f32 %v5228_v0, %v3040_v56  ;;  %v4293_v57 = vpop.f32.mrb[87].mxu1 }
0x1a68   :  { %4502 = vtanh.f32 %v3045_v18 }
0x1a72   :  { %v4503_v26 = vpop.eup %4502 }
0x1a73   :  { %v3047_v61 = vmul.f32 %v5234_v62, %v4503_v26 }
0x1a75   :  { %v3055_v59 = vrot.slane %v3047_v61, %v4847_v6 }
0x1a77   :  { %v3063_v24 = vrot.slane %v3055_v59, %v4847_v6  ;;  %v3056_v2 = vcombine.high %v3055_v59, %v3055_v59 }
0x1a79   :  { %v3073_v4 = vpack.c.bf16 %v3063_v24, %v3063_v24  ;;  %v3070_v55 = vrot.slane %v3056_v2, %v4847_v6 }
0x1a7b   :  { %4305 = vmatmul.mubr.msk.bf16.vlgmr.msra.gmra.mrb[88].mxu1 %vm154_vm1, %v3073_v4  ;;  %v3074_v51 = vpack.c.bf16 %v3070_v55, %v3070_v55 }
0x1a7c   :  { %4315 = vmatpush3.bf16.msra.mxu1 %v4895_v14  ;;  %4316 = vmatprep.mubr.msk.bf16.mxu1 %vm4576_vm0, %v4575_v3 }
0x1a7d   :  { %4311 = vmatmul.mubr.msk.bf16.vlgmr.msra.gmra.mrb[92].mxu0 %vm154_vm1, %v3074_v51  ;;  %4326 = vmatprep.subr.bf16.mxu1 %v4575_v3 }
0x1a7e   :  { %4321 = vmatpush3.bf16.msra.mxu0 %v4925_v29  ;;  %4322 = vmatprep.mubr.msk.bf16.mxu0 %vm4576_vm0, %v4575_v3 }
0x1a7f   :  { %4334 = vmatprep.subr.bf16.mxu0 %v5252_v16 }
0x1b4e   :  { %v3112_v0 = vpop.f32.mrb[88].mxu1 }
0x1b4f   :  { %v3113_v62 = vadd.f32 %v3112_v0, %v4882_v47  ;;  %v4306_v5 = vpop.f32.mrb[89].mxu1 }
0x1b50   :  { %v3115_v8 = vpop.f32.mrb[90].mxu1  ;;  %v3155_v14 = vpop.f32.mrb[92].mxu0 }
0x1b51   :  { %v3156_v35 = vadd.f32 %v3155_v14, %v4882_v47  ;;  %v4307_v53 = vpop.f32.mrb[91].mxu1  ;;  %v4312_v1 = vpop.f32.mrb[93].mxu0  ;;  %v3161_v13 = vadd.f32 %v3113_v62, %v4885_v52 }
0x1b52   :  { %v3158_v23 = vpop.f32.mrb[94].mxu0 }
0x1b53   :  { %v4313_v11 = vpop.f32.mrb[95].mxu0  ;;  %v3163_v29 = vsel %vm719_vm4, %v3161_v13, -inf  ;;  %v3162_v10 = vadd.f32 %v3156_v35, %v4878_v45 }
0x1b54   :  { %3164 = vmax.xlane.f32.xlu0 %v3163_v29 }
0x1b55   :  { %v3166_v20 = vsel %vm719_vm4, %v3162_v10, -inf }
0x1b58   :  { %3167 = vmax.xlane.f32.xlu0 %v3166_v20 }
0x1be1   :  { %v3165_v44 = vpop.xlane.xlu0 %3164 }
0x1be2   :  { %v3169_v48 = vsub.f32 %v3161_v13, %v3165_v44 }
0x1be4   :  { %v3171_v15 = vmul.f32 1.442695, %v3169_v48 }
0x1be5   :  { %v3168_v33 = vpop.xlane.xlu0 %3167 }
0x1be6   :  { %4504 = vpow2.f32 %v3171_v15  ;;  %v3170_v47 = vsub.f32 %v3162_v10, %v3168_v33 }
0x1be8   :  { %v3173_v19 = vmul.f32 1.442695, %v3170_v47 }
0x1bea   :  { %4506 = vpow2.f32 %v3173_v19 }
0x1bf0   :  { %v4505_v39 = vpop.eup %4504 }
0x1bf1   :  { %v3175_v52 = vsel %vm719_vm4, %v4505_v39, 0.0 }
0x1bf2   :  { %3176 = vadd.xlane.f32.xlu1 %v3175_v52 }
0x1bf4   :  { %v4507_v63 = vpop.eup %4506 }
0x1bf5   :  { %v3178_v34 = vsel %vm719_vm4, %v4507_v63, 0.0 }
0x1bf6   :  { %3179 = vadd.xlane.f32.xlu1 %v3178_v34 }
0x1c7f   :  { %v3177_v45 = vpop.xlane.xlu1 %3176 }
0x1c80   :  { %4508 = vrcp.f32 %v3177_v45 }
0x1c83   :  { %v3180_v60 = vpop.xlane.xlu1 %3179 }
0x1c84   :  { %4510 = vrcp.f32 %v3180_v60 }
0x1c8a   :  { %v4509_v43 = vpop.eup %4508 }
0x1c8b   :  { %v3183_v9 = vmul.f32 %v4509_v43, %v4505_v39 }
0x1c8d   :  { %v3185_v32 = vpack.c.bf16 %v3183_v9, %v3183_v9 }
0x1c8e   :  { %v4511_v49 = vpop.eup %4510 }
0x1c8f   :  { %v3184_v17 = vmul.f32 %v4511_v49, %v4507_v63  ;;  %4317 = vmatmul.mubr.msk.bf16.vlgmr.msra.gmra.mrb[92].mxu1 %vm744_vm6, %v3185_v32 }
0x1c90   :  { %4327 = vmatpush3.bf16.msra.mxu1 %v5267_v58  ;;  %4330 = vmatprep.mubr.msk.bf16.mxu1 %vm4576_vm0, %v4575_v3 }
0x1c91   :  { %v3186_v21 = vpack.c.bf16 %v3184_v17, %v3184_v17  ;;  %4328 = vmatprep.subr.bf16.mxu1 %v4575_v3 }
0x1c93   :  { %4323 = vmatmul.mubr.msk.bf16.vlgmr.msra.gmra.mrb[96].mxu0 %vm744_vm6, %v3186_v21 }
0x1c94   :  { %4329 = vmatpush3.bf16.msra.mxu1 %v5277_v12  ;;  %4335 = vmatpush3.bf16.msra.mxu0 %v5252_v16 }
0x1c95   :  { %4336 = vmatprep.subr.bf16.mxu0 %v5286_v7  ;;  %4342 = vmatprep.subr.bf16.mxu1 %v4575_v3 }
0x1c97   :  { %4331 = vmatmul.mubr.msk.bf16.vlgmr.msra.gmra.mrb[96].mxu1 %vm154_vm1, %v3281_v36 }
0x1c98   :  { %4337 = vmatpush3.bf16.msra.mxu0 %v5286_v7  ;;  %4344 = vmatprep.mubr.msk.bf16.mxu1 %vm4576_vm0, %v4575_v3 }
0x1c99   :  { %4348 = vmatprep.subr.bf16.mxu0 %v4575_v3 }
0x1d62   :  { %v3224_v58 = vpop.f32.mrb[92].mxu1 }
0x1d63   :  { %v4318_v12 = vpop.f32.mrb[93].mxu1 }
0x1d64   :  { %v3227_v50 = vpop.f32.mrb[94].mxu1 }
0x1d65   :  { %v4319_v16 = vpop.f32.mrb[95].mxu1 }
0x1d66   :  { %v3267_v56 = vpop.f32.mrb[96].mxu0 }
0x1d67   :  { %v4324_v22 = vpop.f32.mrb[97].mxu0 }
0x1d68   :  { %v3270_v28 = vpop.f32.mrb[98].mxu0 }
0x1d69   :  { %v4325_v37 = vpop.f32.mrb[99].mxu0 }
0x1d6a   :  { %v3319_v18 = vpop.f32.mrb[96].mxu1 }
0x1d6b   :  { %v3320_v57 = vadd.f32 %v5302_v38, %v3319_v18  ;;  %v4332_v26 = vpop.f32.mrb[97].mxu1 }
0x1d6c   :  { %v3322_v61 = vpop.f32.mrb[98].mxu1 }
0x1d6d   :  { %v3325_v59 = vpack.c.bf16 %v3320_v57, %v3320_v57  ;;  %v4333_v7 = vpop.f32.mrb[99].mxu1 }
0x1d6f   :  { %v3333_v24 = vrot.slane %v3325_v59, %v4847_v6 }
0x1d71   :  { %v3340_v2 = vrot.slane %v3333_v24, %v4847_v6 }
0x1d73   :  { %v3342_v4 = vunpack.i.h.s16 %v3340_v2  ;;  %v3836_v55 = vpack.i.b16 %v3340_v2, %v3340_v2 }
0x1d75   :  { %v3344_v51 = vpack.i.b16 %v3342_v4, %v3342_v4  ;;  %v3348_v0 = vrot.slane %v3836_v55, %v4875_v40 }
0x1d77   :  { %v3352_v62 = vrot.slane %v3344_v51, %v4875_v40  ;;  %v3354_v5 = vpack.i.b16 %v3348_v0, %v3348_v0 }
0x1d79   :  { %v3361_v8 = vpack.i.b16 %v3352_v62, %v3352_v62  ;;  %v3359_v14 = vrot.slane %v3354_v5, %v4875_v40 }
0x1d7b   :  { %v3366_v38 = vrot.slane %v3361_v8, %v4875_v40  ;;  %v3367_v35 = vmul.bf16 %v3359_v14, %v4767_v31 }
0x1d7d   :  { %4338 = vmatprep.mubr.msk.bf16.mxu0 %vm154_vm1, %v3367_v35  ;;  %v3368_v53 = vmul.bf16 %v3366_v38, %v4765_v30  ;;  %v4549_v38 = vld [vmem:[%s5530_s30 + $0x8] sm:$0xff]   ;;  %v4550_v35 = vld [vmem:[%s5530_s30] sm:$0xff]   ;;  %s4580_s30 = smov [#allocation4]  }
0x1d7e   :  { %s3695_s18 = sshll.u32 %s4580_s30, 4  ;;  %s3696_s18 = int_to_ptr.vmem [resolvable:$true] %s3695_s18 }
0x1d7f   :  { %4339 = vmatmul.mubr.msk.bf16.vlgmr.msra.gmra.mrb[100].mxu0 %vm154_vm1, %v3368_v53  ;;  %s4551_s20 = scalar_lea.vmem %s3696_s18, 32  ;;  %p4556_p1 = scmp.lt.s32.totalorder %s3696_s18, %s3696_s18 }
0x1d80   :  { %4350 = vmatprep.mubr.msk.bf16.mxu0 %vm4576_vm0, %v4575_v3  ;;  %p4552_p0 = scmp.ne.s32.totalorder %s3696_s18, %s4551_s20  ;;  %p4557_p2 = scmp.lt.s32.totalorder %s4551_s20, %s4551_s20 }
0x1d82   :  { %p4558_p3 = por %p4557_p2, %p4556_p1 }
0x1d84   :  { %p4559_p4 = pnand %p4558_p3, %p4552_p0 }
0x1e52   :  { %v4340_v6 = vpop.f32.mrb[100].mxu0 }
0x1e53   :  { %v3418_v1 = vadd.f32 %v4340_v6, %v4970_v41  ;;  %v3409_v13 = vpop.f32.mrb[101].mxu0 }
0x1e54   :  { %v3410_v23 = vadd.f32 %v3409_v13, %v4973_v42  ;;  %v4341_v11 = vpop.f32.mrb[102].mxu0 }
0x1e55   :  { %v3430_v29 = vmin.f32 %v3418_v1, 0.0  ;;  %v3421_v10 = vadd.f32 %v4341_v11, %v4976_v46  ;;  %v3412_v31 = vpop.f32.mrb[103].mxu0  ;;  %v3455_v46 = vrot.slane %v3267_v56, %v4875_v40  ;;  %vm3426_vm4 = vcmp.gt.f32.partialorder %v3418_v1, 0.0 }
0x1e56   :  { %v3428_v20 = vmin.f32 %v3410_v23, 0.0  ;;  %v3413_v44 = vadd.f32 %v3412_v31, %v4980_v54  ;;  %v3451_v54 = vrot.slane %v3224_v58, %v4875_v40  ;;  %vm3424_vm6 = vcmp.gt.f32.partialorder %v3410_v23, 0.0 }
0x1e57   :  { %v3436_v30 = vmul.f32 1.442695, %v3430_v29  ;;  %v3431_v48 = vmin.f32 %v3421_v10, 0.0  ;;  %vm3427_vm14 = vcmp.gt.f32.partialorder %v3421_v10, 0.0 }
0x1e58   :  { %v3432_v15 = vmul.f32 1.442695, %v3428_v20  ;;  %v3429_v33 = vmin.f32 %v3413_v44, 0.0  ;;  %vm3425_vm15 = vcmp.gt.f32.partialorder %v3413_v44, 0.0 }
0x1e59   :  { %4512 = vpow2.f32 %v3436_v30  ;;  %v3438_v47 = vmul.f32 1.442695, %v3431_v48 }
0x1e5a   :  { %4514 = vpow2.f32 %v3432_v15  ;;  %v3434_v19 = vmul.f32 1.442695, %v3429_v33 }
0x1e5b   :  { %4516 = vpow2.f32 %v3438_v47 }
0x1e5c   :  { %4518 = vpow2.f32 %v3434_v19 }
0x1e63   :  { %v4513_v41 = vpop.eup %4512 }
0x1e64   :  { %v4515_v42 = vpop.eup %4514  ;;  %v3841_v39 = vadd.f32 -1.0, %v4513_v41 }
0x1e65   :  { %v4517_v52 = vpop.eup %4516  ;;  %v3839_v63 = vadd.f32 -1.0, %v4515_v42 }
0x1e66   :  { %v4519_v34 = vpop.eup %4518  ;;  %v3446_v45 = vsel %vm3426_vm4, %v3418_v1, %v3841_v39  ;;  %v3842_v60 = vadd.f32 -1.0, %v4517_v52 }
0x1e67   :  { %v3458_v43 = vmul.f32 %v3455_v46, %v3446_v45  ;;  %v3444_v9 = vsel %vm3424_vm6, %v3410_v23, %v3839_v63  ;;  %v3840_v32 = vadd.f32 -1.0, %v4519_v34 }
0x1e68   :  { %v3456_v49 = vmul.f32 %v3451_v54, %v3444_v9  ;;  %v3447_v17 = vsel %vm3427_vm14, %v3421_v10, %v3842_v60 }
0x1e69   :  { %v3466_v21 = vmin.f32 %v3458_v43, 0.0  ;;  %v3459_v36 = vmul.f32 %v3455_v46, %v3447_v17  ;;  %v3445_v12 = vsel %vm3425_vm15, %v3413_v44, %v3840_v32  ;;  %vm3462_vm5 = vcmp.gt.f32.partialorder %v3458_v43, 0.0 }
0x1e6a   :  { %v3464_v50 = vmin.f32 %v3456_v49, 0.0  ;;  %v3457_v16 = vmul.f32 %v3451_v54, %v3445_v12  ;;  %vm3460_vm9 = vcmp.gt.f32.partialorder %v3456_v49, 0.0 }
0x1e6b   :  { %v3472_v56 = vmul.f32 1.442695, %v3466_v21  ;;  %v3467_v22 = vmin.f32 %v3459_v36, 0.0  ;;  %vm3463_vm8 = vcmp.gt.f32.partialorder %v3459_v36, 0.0 }
0x1e6c   :  { %v3468_v28 = vmul.f32 1.442695, %v3464_v50  ;;  %v3465_v37 = vmin.f32 %v3457_v16, 0.0  ;;  %vm3461_vm10 = vcmp.gt.f32.partialorder %v3457_v16, 0.0 }
0x1e6d   :  { %4520 = vpow2.f32 %v3472_v56  ;;  %v3474_v40 = vmul.f32 1.442695, %v3467_v22 }
0x1e6e   :  { %4522 = vpow2.f32 %v3468_v28  ;;  %v3470_v58 = vmul.f32 1.442695, %v3465_v37 }
0x1e6f   :  { %4524 = vpow2.f32 %v3474_v40 }
0x1e70   :  { %4526 = vpow2.f32 %v3470_v58 }
0x1e77   :  { %v4521_v18 = vpop.eup %4520 }
0x1e78   :  { %v4523_v57 = vpop.eup %4522  ;;  %v3845_v26 = vadd.f32 -1.0, %v4521_v18 }
0x1e79   :  { %v4525_v61 = vpop.eup %4524  ;;  %v3843_v59 = vadd.f32 -1.0, %v4523_v57 }
0x1e7a   :  { %v4527_v7 = vpop.eup %4526  ;;  %v3846_v24 = vadd.f32 -1.0, %v4525_v61  ;;  %v3482_v4 = vsel %vm3462_vm5, %v3458_v43, %v3845_v26 }
0x1e7b   :  { %v3844_v2 = vadd.f32 -1.0, %v4527_v7  ;;  %v3480_v0 = vsel %vm3460_vm9, %v3456_v49, %v3843_v59 }
0x1e7c   :  { %v3483_v55 = vsel %vm3463_vm8, %v3459_v36, %v3846_v24 }
0x1e7d   :  { %v3485_v51 = vpack.c.bf16 %v3483_v55, %v3482_v4  ;;  %v3481_v62 = vsel %vm3461_vm10, %v3457_v16, %v3844_v2 }
0x1e7e   :  { %v3484_v5 = vpack.c.bf16 %v3481_v62, %v3480_v0 }
0x1e7f   :  { %v3530_v8 = vsel %vm154_vm1, %v3485_v51, 0 }
0x1e80   :  { %4349 = vmatpush3.bf16.xpose.msra.mxu0 %v3530_v8  ;;  %v3487_v14 = vsel %vm154_vm1, %v3484_v5, 0 }
0x1e81   :  { %4343 = vmatpush3.bf16.xpose.msra.mxu1 %v3487_v14  ;;  %4360 = vmatprep.subr.bf16.mxu0 %v4575_v3 }
0x1e82   :  { %4354 = vmatprep.subr.bf16.mxu1 %v4575_v3 }
0x1e87   :  { %4351 = vmatmul.mubr.msk.bf16.vlgmr.msra.gmra.mrb[104].mxu0 %vm154_vm1, %v4995_v25 }
0x1e88   :  { %4345 = vmatmul.mubr.msk.bf16.vlgmr.msra.gmra.mrb[100].mxu1 %vm154_vm1, %v4995_v25  ;;  %4361 = vmatpush3.bf16.msra.mxu0 %v4549_v38 }
0x1e89   :  { %4355 = vmatpush3.bf16.msra.mxu1 %v4550_v35  ;;  %4362 = vmatprep.mubr.msk.bf16.mxu0 %vm4576_vm0, %v4575_v3 }
0x1e8a   :  { %4356 = vmatprep.mubr.msk.bf16.mxu1 %vm4576_vm0, %v4575_v3  ;;  %vm3687_vm0 = vcmask 254976  }
0x1f5a   :  { %v3566_v53 = vpop.f32.mrb[104].mxu0 }
0x1f5b   :  { %v3567_v6 = vadd.f32 %v3566_v53, %v5010_v27  ;;  %v3523_v25 = vpop.f32.mrb[100].mxu1  ;;  %v4352_v1 = vpop.f32.mrb[105].mxu0 }
0x1f5c   :  { %v3524_v13 = vadd.f32 %v3523_v25, %v5010_v27  ;;  %v4346_v23 = vpop.f32.mrb[101].mxu1  ;;  %v3569_v11 = vpop.f32.mrb[106].mxu0 }
0x1f5d   :  { %v3526_v29 = vpop.f32.mrb[102].mxu1  ;;  %v4353_v10 = vpop.f32.mrb[107].mxu0  ;;  %v3575_v31 = vsel %vm1173_vm2, %v3567_v6, -inf }
0x1f5e   :  { %3576 = vmax.xlane.f32.xlu0 %v3575_v31  ;;  %v4347_v20 = vpop.f32.mrb[103].mxu1  ;;  %v3572_v44 = vsel %vm1173_vm2, %v3524_v13, -inf }
0x1f5f   :  { %3573 = vmax.xlane.f32.xlu1 %v3572_v44 }
0x1feb   :  { %v3577_v30 = vpop.xlane.xlu0 %3576 }
0x1fec   :  { %v3579_v3 = vsub.f32 %v3567_v6, %v3577_v30  ;;  %v3574_v48 = vpop.xlane.xlu1 %3573 }
0x1fed   :  { %v3578_v15 = vsub.f32 %v3524_v13, %v3574_v48 }
0x1fee   :  { %v3582_v33 = vmul.f32 1.442695, %v3579_v3 }
0x1fef   :  { %v3580_v47 = vmul.f32 1.442695, %v3578_v15 }
0x1ff0   :  { %4528 = vpow2.f32 %v3582_v33 }
0x1ff1   :  { %4530 = vpow2.f32 %v3580_v47 }
0x1ffa   :  { %v4529_v27 = vpop.eup %4528 }
0x1ffb   :  { %v4531_v19 = vpop.eup %4530  ;;  %v3587_v41 = vsel %vm1173_vm2, %v4529_v27, 0.0 }
0x1ffc   :  { %3588 = vadd.xlane.f32.xlu0 %v3587_v41  ;;  %v3584_v42 = vsel %vm1173_vm2, %v4531_v19, 0.0 }
0x1ffd   :  { %3585 = vadd.xlane.f32.xlu1 %v3584_v42 }
0x2089   :  { %v3589_v39 = vpop.xlane.xlu0 %3588 }
0x208a   :  { %4532 = vrcp.f32 %v3589_v39  ;;  %v3586_v52 = vpop.xlane.xlu1 %3585 }
0x208b   :  { %4534 = vrcp.f32 %v3586_v52 }
0x2094   :  { %v4533_v46 = vpop.eup %4532 }
0x2095   :  { %v4535_v63 = vpop.eup %4534  ;;  %v3593_v34 = vmul.f32 %v4533_v46, %v4529_v27 }
0x2096   :  { %v3592_v54 = vmul.f32 %v4535_v63, %v4531_v19 }
0x2097   :  { %v3595_v45 = vpack.c.bf16 %v3593_v34, %v3593_v34 }
0x2098   :  { %v3594_v60 = vpack.c.bf16 %v3592_v54, %v3592_v54 }
0x2099   :  { %4363 = vmatmul.mubr.msk.bf16.vlgmr.msra.gmra.mrb[108].mxu0 %vm1199_vm3, %v3595_v45 }
0x209a   :  { %4357 = vmatmul.mubr.msk.bf16.vlgmr.msra.gmra.mrb[104].mxu1 %vm1199_vm3, %v3594_v60 }
0x216c   :  { %v3676_v43 = vpop.f32.mrb[108].mxu0 }
0x216d   :  { %v3684_v9 = vrot.slane %v3676_v43, 7  ;;  %v3633_v32 = vpop.f32.mrb[104].mxu1  ;;  %v4364_v49 = vpop.f32.mrb[109].mxu0 }
0x216e   :  { %v4358_v17 = vpop.f32.mrb[105].mxu1  ;;  %v3679_v21 = vpop.f32.mrb[110].mxu0 }
0x216f   :  { %v3685_v36 = vsel %vm1403_vm7, %v3684_v9, %v3633_v32  ;;  %v3636_v12 = vpop.f32.mrb[106].mxu1  ;;  %v4365_v50 = vpop.f32.mrb[111].mxu0 }
0x2170   :  { %v4359_v16 = vpop.f32.mrb[107].mxu1  ;;  %3688 = vst.msk [vmem:[#allocation4] sm:$0x3] %vm3687_vm0, %v3685_v36 }
0x2171   :  { %4562 = shalt.err (!%p4559_p4)
}
0x2172   :  { %s4563_s9 = scalar_lea.hbm %s5513_s23, 32 }
0x2173   :  { %p4564_p5 = scmp.ne.s32.totalorder %s5513_s23, %s4563_s9  ;;  %p4567_p6 = scmp.lt.u32.totalorder %s4563_s9, %s5513_s23 }
0x2175   :  { %p4569_p7 = pnand %p4567_p6, %p4564_p5 }
0x2177   :  { %4572 = shalt.err (!%p4569_p7)
}
0x2178   :  { %3698 = dma.vmem_to_hbm [thread:$0]  %s3696_s18, 32, %s5513_s23, [#allocation5]  }
0x2179   :  { %4573 = dma.done.wait [#allocation5], 32  }
0x217a   :  { %4574 = vsyncadd [#allocation5], 4294967264 }
0x217b   :  { %3702 = vsyncpa [#allocation5], 1 }

</bundles_post_ra>
